<compile_context>
chip_gen: v6e
topology: v6e:2x2x1
jax: 0.10.0
libtpu: 0.0.40
codegen_flags: <defaults>
</compile_context>

<pallas_src>
import functools

import jax
import jax.numpy as jnp
from jax.experimental import pallas as pl
from jax.experimental.pallas import tpu as pltpu


# ------------------------------------------------------------------
# Fused kernel: expand -> depthwise -> project (+ fused shortcut) for one
# (image, output-row-strip) grid cell.
# ------------------------------------------------------------------
def _fused_inverted_block_kernel(x_ref, w1_ref, b1_ref, w2_ref, b2_ref,
                                 w3_ref, b3_ref, o_ref, mid_ref, dw_ref,
                                 *, H, W, Cin, planes, Cout, stride,
                                 THo, THm, R, shortcut):
    r = pl.program_id(1)
    Wo = o_ref.shape[2]
    f32 = jnp.float32

    # ---- expand (1x1 conv, BN scale folded into w1) into the padded VMEM
    #      scratch holding this strip's expanded rows + 3x3 halo -------------
    def expand_rows(src_row, dst_row, nrows):
        # 8-row sub-blocks keep the (nb*W, planes) f32 result register-bounded.
        for off in range(0, nrows, 8):
            nb = min(8, nrows - off)
            xin = x_ref[0, pl.ds(src_row + off, nb), :, :]       # (nb,W,Cin) bf16
            z = jnp.dot(xin.reshape(nb * W, Cin), w1_ref[...],
                        preferred_element_type=f32)
            z = jnp.clip(z + b1_ref[...], 0.0, 6.0)              # relu6
            mid_ref[dst_row + off:dst_row + off + nb, 1:W + 1, :] = (
                z.reshape(nb, W, planes))

    # halo columns (0 and W+1) are never written by expand_rows -> zero once
    # per image (r == 0 runs first for every image on every core because the
    # r axis is "arbitrary", i.e. never sharded across TensorCores).
    @pl.when(r == 0)
    def _():
        mid_ref[:, 0:1, :] = jnp.zeros((THm, 1, planes), f32)
        mid_ref[:, W + 1:W + 2, :] = jnp.zeros((THm, 1, planes), f32)

    if R == 1:
        # single strip covers the whole image (all offsets static)
        n_valid = min(H, THm - 1)
        mid_ref[0:1, :, :] = jnp.zeros((1, mid_ref.shape[1], planes), f32)
        expand_rows(0, 1, n_valid)
        if 1 + n_valid < THm:
            mid_ref[1 + n_valid:, :, :] = jnp.zeros(
                (THm - 1 - n_valid, mid_ref.shape[1], planes), f32)
    else:
        last_src = (R - 1) * THo * stride - 1          # static
        last_nrows = min(THm, H - last_src)            # static

        @pl.when(r == 0)
        def _():
            mid_ref[0:1, :, :] = jnp.zeros((1, mid_ref.shape[1], planes), f32)
            expand_rows(0, 1, THm - 1)

        if R > 2:
            @pl.when(jnp.logical_and(r > 0, r < R - 1))
            def _():
                expand_rows(r * (THo * stride) - 1, 0, THm)

        @pl.when(r == R - 1)
        def _():
            expand_rows(last_src, 0, last_nrows)
            if last_nrows < THm:                       # bottom pad row(s)
                mid_ref[last_nrows:, :, :] = jnp.zeros(
                    (THm - last_nrows, mid_ref.shape[1], planes), f32)

    # ---- depthwise 3x3 (BN scale folded into w2): register-bounded
    #      (row-subblock x plane-chunk) tiles, relu6'd result staged in the
    #      bf16 dw scratch that feeds the project matmul ----------------------
    w2f = w2_ref[...]                                   # (3, 3, planes) f32
    b2f = b2_ref[...]                                   # (1, planes)    f32
    RB = min(8, THo)
    PC = min(128, planes)
    for r0 in range(0, THo, RB):
        rb = min(RB, THo - r0)
        for c0 in range(0, planes, PC):
            pc = min(PC, planes - c0)
            acc = jnp.zeros((rb, Wo, pc), f32)
            for kh in range(3):
                for kw in range(3):
                    if stride == 1:
                        patch = mid_ref[r0 + kh:r0 + kh + rb,
                                        kw:kw + Wo, c0:c0 + pc]
                    else:
                        # TODO(synk): sublane-strided reads; unexercised on HW.
                        patch = mid_ref[pl.ds(r0 * stride + kh, rb, stride),
                                        pl.ds(kw, Wo, stride), c0:c0 + pc]
                    acc = acc + patch * w2f[kh, kw, c0:c0 + pc]
            dwv = jnp.clip(acc + b2f[:, c0:c0 + pc], 0.0, 6.0)
            dw_ref[r0 * Wo:(r0 + rb) * Wo, c0:c0 + pc] = (
                dwv.reshape(rb * Wo, pc).astype(dw_ref.dtype))

    # ---- project (1x1 conv) with the conv shortcut fused into the same
    #      matmul ([dw | x] @ [w3 ; ws], bias pre-folded in the wrapper) ------
    if shortcut == "conv":                              # stride==1, Cin != Cout
        xs = x_ref[0, pl.ds(r * THo, THo), :, :].reshape(THo * W, Cin)
        dw_ref[:, planes:planes + Cin] = xs             # already bf16
    y = jnp.dot(dw_ref[...], w3_ref[...],
                preferred_element_type=f32) + b3_ref[...]
    if shortcut == "identity":                          # stride==1, Cin == Cout
        xs = x_ref[0, pl.ds(r * THo, THo), :, :].reshape(THo * W, Cin)
        y = y + xs.astype(f32)
    o_ref[0] = y.reshape(THo, Wo, Cout).astype(o_ref.dtype)


# ------------------------------------------------------------------
# BN folding (inference running-stats semantics) + weight prep
# ------------------------------------------------------------------
def fold_bn(gamma, beta, mean, var, eps=1e-5):
    scale = gamma / jnp.sqrt(var + eps)
    bias = beta - mean * scale
    return scale, bias


def _prepare_params(params, *, in_channels, out_channels, stride, compute_dtype):
    s1, b1 = fold_bn(*params["bn1"])
    s2, b2 = fold_bn(*params["bn2"])
    s3, b3 = fold_bn(*params["bn3"])
    w1 = (params["w1"] * s1[None, :]).astype(compute_dtype)
    w2 = (params["w2"] * s2[None, None, :]).astype(jnp.float32)
    w3 = (params["w3"] * s3[None, :]).astype(compute_dtype)
    if stride == 1 and in_channels != out_channels:
        ss, bs = fold_bn(*params["bns"])
        ws = (params["ws"] * ss[None, :]).astype(compute_dtype)
        w3 = jnp.concatenate([w3, ws], axis=0)     # fuse shortcut into project
        b3 = b3 + bs
        shortcut = "conv"
    elif stride == 1:
        shortcut = "identity"
    else:
        shortcut = "none"
    return {
        "w1": w1, "b1": b1[None, :].astype(jnp.float32),
        "w2": w2, "b2": b2[None, :].astype(jnp.float32),
        "w3": w3, "b3": b3[None, :].astype(jnp.float32),
        "shortcut": shortcut,
    }


# ------------------------------------------------------------------
# Primary entry point: NHWC in -> NHWC out (no layout transposes around the
# kernel; a bf16 NHWC model keeps this layout/dtype end-to-end).
# ------------------------------------------------------------------
def inverted_block_nhwc(x_nhwc, params, *, stride, row_tile=None,
                        compute_dtype=jnp.bfloat16, out_dtype=jnp.float32):
    N, H, W, Cin = x_nhwc.shape
    planes = params["w1"].shape[1]
    Cout = params["w3"].shape[1]
    Ho = (H - 1) // stride + 1
    Wo = (W - 1) // stride + 1
    Wp = ((W + 2 + 7) // 8) * 8            # sublane-aligned scratch width

    prep = _prepare_params(params, in_channels=Cin, out_channels=Cout,
                           stride=stride, compute_dtype=compute_dtype)
    shortcut = prep["shortcut"]
    Kp = prep["w3"].shape[0]               # planes (+ Cin if conv shortcut)

    # row-strip height: target project-matmul M = THo*Wo >= 256, VMEM-capped,
    # and it must divide Ho.
    if row_tile is None:
        row_tile = max(8, pl.cdiv(256, max(Wo, 1)))
    THo = max(1, min(int(row_tile), Ho))
    while Ho % THo:
        THo -= 1

    def _mid_bytes(t):
        return ((t - 1) * stride + 3) * Wp * planes * 4

    while THo > 1 and _mid_bytes(THo) > (8 << 20):
        THo -= 1
        while Ho % THo:
            THo -= 1
    R = Ho // THo
    THm = (THo - 1) * stride + 3           # expanded rows per strip (+halo)

    x = x_nhwc.astype(compute_dtype)       # no-op when the model is bf16 already

    def wspec(shape):
        return pl.BlockSpec(shape, lambda n, r, _nd=len(shape): (0,) * _nd)

    in_specs = [
        # r-invariant index: DMA'd once per image, resident across all strips.
        pl.BlockSpec((1, H, W, Cin), lambda n, r: (n, 0, 0, 0)),
        wspec((Cin, planes)),        # w1 (BN folded, bf16)
        wspec((1, planes)),          # b1
        wspec((3, 3, planes)),       # w2 (BN folded, f32)
        wspec((1, planes)),          # b2
        wspec((Kp, Cout)),           # [w3 ; ws] (BN folded, bf16)
        wspec((1, Cout)),            # b3 (+ bs)
    ]
    out_specs = pl.BlockSpec((1, THo, Wo, Cout), lambda n, r: (n, r, 0, 0))

    # --- VMEM budget from the actual resident set -----------------------------
    isz = jnp.dtype(compute_dtype).itemsize
    osz = jnp.dtype(out_dtype).itemsize
    x_block = H * W * Cin * isz
    out_block = THo * Wo * Cout * osz
    w_bytes = ((Cin * planes + Kp * Cout) * isz
               + 9 * planes * 4 + (2 * planes + Cout) * 4)
    mid_bytes = THm * Wp * planes * 4
    dw_bytes = THo * Wo * Kp * isz
    resident = (2 * x_block + 2 * out_block + 2 * w_bytes
                + mid_bytes + dw_bytes)
    vmem_limit = max(resident + (2 << 20), 16 << 20)
    vmem_limit = min(vmem_limit, max(48 << 20, resident + (2 << 20)))

    flops = N * (2 * H * W * Cin * planes
                 + 18 * Ho * Wo * planes
                 + 2 * Ho * Wo * Kp * Cout)
    bytes_accessed = (N * H * W * Cin * isz
                      + N * Ho * Wo * Cout * osz + w_bytes)

    kernel = functools.partial(
        _fused_inverted_block_kernel,
        H=H, W=W, Cin=Cin, planes=planes, Cout=Cout, stride=stride,
        THo=THo, THm=THm, R=R, shortcut=shortcut)

    return pl.pallas_call(
        kernel,
        out_shape=jax.ShapeDtypeStruct((N, Ho, Wo, Cout), out_dtype),
        grid=(N, R),
        in_specs=in_specs,
        out_specs=out_specs,
        scratch_shapes=[
            pltpu.VMEM((THm, Wp, planes), jnp.float32),     # padded expand rows
            pltpu.VMEM((THo * Wo, Kp), compute_dtype),      # staged dw (+ x) bf16
        ],
        compiler_params=pltpu.CompilerParams(
            dimension_semantics=("parallel", "arbitrary"),
            vmem_limit_bytes=int(vmem_limit)),
        cost_estimate=pl.CostEstimate(
            flops=int(flops), transcendentals=0,
            bytes_accessed=int(bytes_accessed)),
    )(x, prep["w1"], prep["b1"], prep["w2"], prep["b2"],
      prep["w3"], prep["b3"])


# PyTorch-layout drop-in wrapper (NCHW f32 in / NCHW f32 out).  The two
# transposes here are the model-boundary conversion only; chained blocks should
# use inverted_block_nhwc directly to avoid them.
def inverted_block(x_nchw, params, *, stride, **kwargs):
    y = inverted_block_nhwc(jnp.transpose(x_nchw, (0, 2, 3, 1)), params,
                            stride=stride, **kwargs)
    return jnp.transpose(y, (0, 3, 1, 2))


# ------------------------------------------------------------------
# Pure-JAX references (same folded-BN / bf16-matmul / bf16-activation math)
# ------------------------------------------------------------------
def reference_block_nhwc(x_nhwc, params, *, stride, compute_dtype=jnp.bfloat16):
    N, H, W, Cin = x_nhwc.shape
    planes = params["w1"].shape[1]
    Cout = params["w3"].shape[1]
    s1, b1 = fold_bn(*params["bn1"])
    s2, b2 = fold_bn(*params["bn2"])
    s3, b3 = fold_bn(*params["bn3"])
    xc = x_nhwc.astype(compute_dtype)

    w1 = (params["w1"] * s1[None, :]).astype(compute_dtype)
    z = jnp.dot(xc.reshape(-1, Cin), w1,
                preferred_element_type=jnp.float32) + b1[None, :]
    z = jnp.clip(z, 0.0, 6.0).reshape(N, H, W, planes)

    w2 = params["w2"] * s2[None, None, :]
    zp = jnp.pad(z, ((0, 0), (1, 1), (1, 1), (0, 0)))
    Ho = (H - 1) // stride + 1
    Wo = (W - 1) // stride + 1
    acc = jnp.zeros((N, Ho, Wo, planes), jnp.float32)
    for kh in range(3):
        for kw in range(3):
            patch = zp[:, kh:kh + (Ho - 1) * stride + 1:stride,
                       kw:kw + (Wo - 1) * stride + 1:stride, :]
            acc = acc + patch * w2[kh, kw, :]
    dw = jnp.clip(acc + b2[None, None, None, :], 0.0, 6.0)

    w3 = (params["w3"] * s3[None, :]).astype(compute_dtype)
    y = jnp.dot(dw.reshape(-1, planes).astype(compute_dtype), w3,
                preferred_element_type=jnp.float32) + b3[None, :]
    if stride == 1 and Cin != Cout:
        ss, bs = fold_bn(*params["bns"])
        ws = (params["ws"] * ss[None, :]).astype(compute_dtype)
        y = y + jnp.dot(xc.reshape(-1, Cin), ws,
                        preferred_element_type=jnp.float32) + bs[None, :]
    elif stride == 1:
        y = y + xc.reshape(-1, Cin).astype(jnp.float32)
    return y.reshape(N, Ho, Wo, Cout)


def reference_block(x_nchw, params, *, stride, compute_dtype=jnp.bfloat16):
    y = reference_block_nhwc(jnp.transpose(x_nchw, (0, 2, 3, 1)), params,
                             stride=stride, compute_dtype=compute_dtype)
    return jnp.transpose(y, (0, 3, 1, 2))


# ------------------------------------------------------------------
# Deterministic parameter init (PyTorch layouts mapped to matmul layouts)
# ------------------------------------------------------------------
def init_params(key, in_channels, out_channels, expansion):
    planes = expansion * in_channels
    ks = jax.random.split(key, 8)

    def bn(k, c):
        k1, k2, k3 = jax.random.split(k, 3)
        gamma = 1.0 + 0.1 * jax.random.normal(k1, (c,), jnp.float32)
        beta = 0.1 * jax.random.normal(k2, (c,), jnp.float32)
        mean = 0.1 * jax.random.normal(k3, (c,), jnp.float32)
        var = jnp.ones((c,), jnp.float32)
        return (gamma, beta, mean, var)

    return {
        # conv1: PyTorch (planes, in, 1, 1) -> stored as (in, planes)
        "w1": 0.1 * jax.random.normal(ks[0], (in_channels, planes), jnp.float32),
        "bn1": bn(ks[1], planes),
        # conv2 depthwise: PyTorch (planes, 1, 3, 3) -> stored as (3, 3, planes)
        "w2": 0.1 * jax.random.normal(ks[2], (3, 3, planes), jnp.float32),
        "bn2": bn(ks[3], planes),
        # conv3: PyTorch (out, planes, 1, 1) -> stored as (planes, out)
        "w3": 0.1 * jax.random.normal(ks[4], (planes, out_channels), jnp.float32),
        "bn3": bn(ks[5], out_channels),
        # shortcut conv: (out, in, 1, 1) -> (in, out)
        "ws": 0.1 * jax.random.normal(ks[6], (in_channels, out_channels),
                                      jnp.float32),
        "bns": bn(ks[7], out_channels),
    }


if __name__ == "__main__":
    key = jax.random.PRNGKey(0)
    N, H, W = 2, 16, 16

    configs = [
        # (in_channels, out_channels, expansion, stride, row_tile)
        (32, 128, 4, 1, None),   # conv-BN shortcut fused into project; M=256, R=1
        (32, 32, 4, 1, None),    # identity shortcut
        (32, 128, 4, 1, 4),      # forced R=4: exercises multi-strip halo paths
    ]

    for idx, (cin, cout, exp, stride, row_tile) in enumerate(configs):
        kx, kp = jax.random.split(jax.random.fold_in(key, idx))
        x_nchw = jax.random.normal(kx, (N, cin, H, W), jnp.float32)
        params = init_params(kp, cin, cout, exp)

        # Model-boundary conversion done ONCE: a bf16/NHWC model keeps this
        # layout & dtype end-to-end, so the block itself sees no transposes.
        x_nhwc = jnp.transpose(x_nchw, (0, 2, 3, 1)).astype(jnp.bfloat16)

        y = jax.block_until_ready(
            inverted_block_nhwc(x_nhwc, params, stride=stride,
                                row_tile=row_tile))
        y_ref = reference_block_nhwc(x_nhwc, params, stride=stride)

        Ho = (H - 1) // stride + 1
        assert y.shape == (N, Ho, Ho, cout), y.shape
        err = float(jnp.max(jnp.abs(y - y_ref)))
        assert jnp.allclose(y, y_ref, atol=5e-3, rtol=5e-3), (
            f"NHWC config {idx}: max abs diff {err}")

    # PyTorch-layout drop-in parity check (NCHW f32 in / NCHW f32 out).
    cin, cout, exp, stride = configs[0][:4]
    kx, kp = jax.random.split(jax.random.fold_in(key, 100))
    x_nchw = jax.random.normal(kx, (N, cin, H, W), jnp.float32)
    params = init_params(kp, cin, cout, exp)
    y = jax.block_until_ready(inverted_block(x_nchw, params, stride=stride))
    y_ref = reference_block(x_nchw, params, stride=stride)
    assert y.shape == (N, cout, H, W), y.shape
    assert jnp.allclose(y, y_ref, atol=5e-3, rtol=5e-3), (
        f"NCHW wrapper: max abs diff {float(jnp.max(jnp.abs(y - y_ref)))}")

    print("KERNEL_OK")
</pallas_src>

<mosaic_0001>
module attributes {stable_mosaic.version = 11 : i64} {
  func.func @_fused_inverted_block_kernel(%arg0: i32, %arg1: i32, %arg2: memref<1x16x16x32xbf16, #tpu.memory_space<vmem>>, %arg3: memref<32x128xbf16, #tpu.memory_space<vmem>>, %arg4: memref<1x128xf32, #tpu.memory_space<vmem>>, %arg5: memref<3x3x128xf32, #tpu.memory_space<vmem>>, %arg6: memref<1x128xf32, #tpu.memory_space<vmem>>, %arg7: memref<160x128xbf16, #tpu.memory_space<vmem>>, %arg8: memref<1x128xf32, #tpu.memory_space<vmem>>, %arg9: memref<1x16x16x128xf32, #tpu.memory_space<vmem>>, %arg10: memref<18x24x128xf32, #tpu.memory_space<vmem>>, %arg11: memref<256x160xbf16, #tpu.memory_space<vmem>>) attributes {dimension_semantics = [#tpu.dimension_semantics<parallel>, #tpu.dimension_semantics<arbitrary>], iteration_bounds = array<i64: 2, 1>, scalar_prefetch = 0 : i64, scratch_operands = 2 : i64, tpu.core_type = #tpu.core_type<tc>, window_params = [{transform_indices = @transform_0, window_bounds = array<i64: 1, 16, 16, 32>}, {pipeline_mode = #tpu.pipeline_mode<synchronous>, transform_indices = @transform_1, window_bounds = array<i64: 32, 128>}, {pipeline_mode = #tpu.pipeline_mode<synchronous>, transform_indices = @transform_2, window_bounds = array<i64: 1, 128>}, {pipeline_mode = #tpu.pipeline_mode<synchronous>, transform_indices = @transform_3, window_bounds = array<i64: 3, 3, 128>}, {pipeline_mode = #tpu.pipeline_mode<synchronous>, transform_indices = @transform_4, window_bounds = array<i64: 1, 128>}, {pipeline_mode = #tpu.pipeline_mode<synchronous>, transform_indices = @transform_5, window_bounds = array<i64: 160, 128>}, {pipeline_mode = #tpu.pipeline_mode<synchronous>, transform_indices = @transform_6, window_bounds = array<i64: 1, 128>}, {transform_indices = @transform_7, window_bounds = array<i64: 1, 16, 16, 128>}]} {
    %c0_i32 = arith.constant 0 : i32
    %0 = arith.cmpi eq, %arg1, %c0_i32 : i32
    %1 = arith.extui %0 : i1 to i32
    %c0_i32_0 = arith.constant 0 : i32
    %2 = arith.cmpi ne, %1, %c0_i32_0 : i32
    scf.if %2 {
      %cst_113 = arith.constant 0.000000e+00 : f32
      %201 = vector.broadcast %cst_113 : f32 to vector<18x1x128xf32>
      %c0_114 = arith.constant 0 : index
      %c0_115 = arith.constant 0 : index
      %c0_116 = arith.constant 0 : index
      %202 = vector.load %arg10[%c0_114, %c0_115, %c0_116] : memref<18x24x128xf32, #tpu.memory_space<vmem>>, vector<18x1x128xf32>
      tpu.vector_store %arg10[%c0_114, %c0_115, %c0_116], %201 {strides = array<i32>} : memref<18x24x128xf32, #tpu.memory_space<vmem>>, vector<18x1x128xf32>,
      %cst_117 = arith.constant 0.000000e+00 : f32
      %203 = vector.broadcast %cst_117 : f32 to vector<18x1x128xf32>
      %c0_118 = arith.constant 0 : index
      %c17_119 = arith.constant 17 : index
      %c0_120 = arith.constant 0 : index
      %204 = vector.load %arg10[%c0_118, %c17_119, %c0_120] : memref<18x24x128xf32, #tpu.memory_space<vmem>>, vector<18x1x128xf32>
      tpu.vector_store %arg10[%c0_118, %c17_119, %c0_120], %203 {strides = array<i32>} : memref<18x24x128xf32, #tpu.memory_space<vmem>>, vector<18x1x128xf32>,
    } else {
    }
    %cst = arith.constant 0.000000e+00 : f32
    %3 = vector.broadcast %cst : f32 to vector<1x24x128xf32>
    %c0 = arith.constant 0 : index
    %c0_1 = arith.constant 0 : index
    %c0_2 = arith.constant 0 : index
    %4 = vector.load %arg10[%c0, %c0_1, %c0_2] : memref<18x24x128xf32, #tpu.memory_space<vmem>>, vector<1x24x128xf32>
    tpu.vector_store %arg10[%c0, %c0_1, %c0_2], %3 {strides = array<i32>} : memref<18x24x128xf32, #tpu.memory_space<vmem>>, vector<1x24x128xf32>,
    %c0_3 = arith.constant 0 : index
    %c0_4 = arith.constant 0 : index
    %c0_5 = arith.constant 0 : index
    %c0_6 = arith.constant 0 : index
    %5 = vector.load %arg2[%c0_3, %c0_4, %c0_5, %c0_6] : memref<1x16x16x32xbf16, #tpu.memory_space<vmem>>, vector<1x8x16x32xbf16>
    %6 = vector.shape_cast %5 : vector<1x8x16x32xbf16> to vector<8x16x32xbf16>
    %7 = vector.shape_cast %6 : vector<8x16x32xbf16> to vector<128x32xbf16>
    %c0_7 = arith.constant 0 : index
    %c0_8 = arith.constant 0 : index
    %8 = vector.load %arg3[%c0_7, %c0_8] : memref<32x128xbf16, #tpu.memory_space<vmem>>, vector<32x128xbf16>
    %cst_9 = arith.constant dense<0.000000e+00> : vector<128x128xf32>
    %9 = tpu.matmul %7, %8, %cst_9 {dimension_numbers = #tpu.dot_dimension_numbers<[1], [0], [0], [1], [0, 0, 1, 1], [], []>} : vector<128x32xbf16>, vector<32x128xbf16>, vector<128x128xf32> -> vector<128x128xf32>
    %c0_10 = arith.constant 0 : index
    %c0_11 = arith.constant 0 : index
    %10 = vector.load %arg4[%c0_10, %c0_11] : memref<1x128xf32, #tpu.memory_space<vmem>>, vector<1x128xf32>
    %11 = vector.broadcast %10 : vector<1x128xf32> to vector<128x128xf32>
    %12 = arith.addf %9, %11 : vector<128x128xf32>
    %cst_12 = arith.constant 0.000000e+00 : f32
    %cst_13 = arith.constant 6.000000e+00 : f32
    %13 = vector.broadcast %cst_12 : f32 to vector<128x128xf32>
    %14 = arith.maximumf %13, %12 : vector<128x128xf32>
    %15 = vector.broadcast %cst_13 : f32 to vector<128x128xf32>
    %16 = arith.minimumf %15, %14 : vector<128x128xf32>
    %17 = vector.shape_cast %16 : vector<128x128xf32> to vector<8x16x128xf32>
    %c1 = arith.constant 1 : index
    %c1_14 = arith.constant 1 : index
    %c0_15 = arith.constant 0 : index
    %18 = vector.load %arg10[%c1, %c1_14, %c0_15] : memref<18x24x128xf32, #tpu.memory_space<vmem>>, vector<8x16x128xf32>
    tpu.vector_store %arg10[%c1, %c1_14, %c0_15], %17 {strides = array<i32>} : memref<18x24x128xf32, #tpu.memory_space<vmem>>, vector<8x16x128xf32>,
    %c0_16 = arith.constant 0 : index
    %c8 = arith.constant 8 : index
    %c0_17 = arith.constant 0 : index
    %c0_18 = arith.constant 0 : index
    %19 = vector.load %arg2[%c0_16, %c8, %c0_17, %c0_18] : memref<1x16x16x32xbf16, #tpu.memory_space<vmem>>, vector<1x8x16x32xbf16>
    %20 = vector.shape_cast %19 : vector<1x8x16x32xbf16> to vector<8x16x32xbf16>
    %21 = vector.shape_cast %20 : vector<8x16x32xbf16> to vector<128x32xbf16>
    %c0_19 = arith.constant 0 : index
    %c0_20 = arith.constant 0 : index
    %22 = vector.load %arg3[%c0_19, %c0_20] : memref<32x128xbf16, #tpu.memory_space<vmem>>, vector<32x128xbf16>
    %cst_21 = arith.constant dense<0.000000e+00> : vector<128x128xf32>
    %23 = tpu.matmul %21, %22, %cst_21 {dimension_numbers = #tpu.dot_dimension_numbers<[1], [0], [0], [1], [0, 0, 1, 1], [], []>} : vector<128x32xbf16>, vector<32x128xbf16>, vector<128x128xf32> -> vector<128x128xf32>
    %c0_22 = arith.constant 0 : index
    %c0_23 = arith.constant 0 : index
    %24 = vector.load %arg4[%c0_22, %c0_23] : memref<1x128xf32, #tpu.memory_space<vmem>>, vector<1x128xf32>
    %25 = vector.broadcast %24 : vector<1x128xf32> to vector<128x128xf32>
    %26 = arith.addf %23, %25 : vector<128x128xf32>
    %cst_24 = arith.constant 0.000000e+00 : f32
    %cst_25 = arith.constant 6.000000e+00 : f32
    %27 = vector.broadcast %cst_24 : f32 to vector<128x128xf32>
    %28 = arith.maximumf %27, %26 : vector<128x128xf32>
    %29 = vector.broadcast %cst_25 : f32 to vector<128x128xf32>
    %30 = arith.minimumf %29, %28 : vector<128x128xf32>
    %31 = vector.shape_cast %30 : vector<128x128xf32> to vector<8x16x128xf32>
    %c9 = arith.constant 9 : index
    %c1_26 = arith.constant 1 : index
    %c0_27 = arith.constant 0 : index
    %32 = vector.load %arg10[%c9, %c1_26, %c0_27] : memref<18x24x128xf32, #tpu.memory_space<vmem>>, vector<8x16x128xf32>
    tpu.vector_store %arg10[%c9, %c1_26, %c0_27], %31 {strides = array<i32>} : memref<18x24x128xf32, #tpu.memory_space<vmem>>, vector<8x16x128xf32>,
    %cst_28 = arith.constant 0.000000e+00 : f32
    %33 = vector.broadcast %cst_28 : f32 to vector<1x24x128xf32>
    %c17 = arith.constant 17 : index
    %c0_29 = arith.constant 0 : index
    %c0_30 = arith.constant 0 : index
    %34 = vector.load %arg10[%c17, %c0_29, %c0_30] : memref<18x24x128xf32, #tpu.memory_space<vmem>>, vector<1x24x128xf32>
    tpu.vector_store %arg10[%c17, %c0_29, %c0_30], %33 {strides = array<i32>} : memref<18x24x128xf32, #tpu.memory_space<vmem>>, vector<1x24x128xf32>,
    %c0_31 = arith.constant 0 : index
    %c0_32 = arith.constant 0 : index
    %c0_33 = arith.constant 0 : index
    %35 = vector.load %arg5[%c0_31, %c0_32, %c0_33] : memref<3x3x128xf32, #tpu.memory_space<vmem>>, vector<3x3x128xf32>
    %c0_34 = arith.constant 0 : index
    %c0_35 = arith.constant 0 : index
    %36 = vector.load %arg6[%c0_34, %c0_35] : memref<1x128xf32, #tpu.memory_space<vmem>>, vector<1x128xf32>
    %cst_36 = arith.constant 0.000000e+00 : f32
    %37 = vector.broadcast %cst_36 : f32 to vector<8x16x128xf32>
    %c0_37 = arith.constant 0 : index
    %c0_38 = arith.constant 0 : index
    %c0_39 = arith.constant 0 : index
    %38 = vector.load %arg10[%c0_37, %c0_38, %c0_39] : memref<18x24x128xf32, #tpu.memory_space<vmem>>, vector<8x16x128xf32>
    %39 = vector.extract_strided_slice %35 {offsets = [0, 0, 0], sizes = [1, 1, 128], strides = [1, 1, 1]} : vector<3x3x128xf32> to vector<1x1x128xf32>
    %40 = vector.shape_cast %39 : vector<1x1x128xf32> to vector<128xf32>
    %41 = vector.shape_cast %40 : vector<128xf32> to vector<1x1x128xf32>
    %42 = vector.broadcast %41 : vector<1x1x128xf32> to vector<8x16x128xf32>
    %43 = arith.mulf %38, %42 : vector<8x16x128xf32>
    %44 = arith.addf %37, %43 : vector<8x16x128xf32>
    %c0_40 = arith.constant 0 : index
    %c1_41 = arith.constant 1 : index
    %c0_42 = arith.constant 0 : index
    %45 = vector.load %arg10[%c0_40, %c1_41, %c0_42] : memref<18x24x128xf32, #tpu.memory_space<vmem>>, vector<8x16x128xf32>
    %46 = vector.extract_strided_slice %35 {offsets = [0, 1, 0], sizes = [1, 1, 128], strides = [1, 1, 1]} : vector<3x3x128xf32> to vector<1x1x128xf32>
    %47 = vector.shape_cast %46 : vector<1x1x128xf32> to vector<128xf32>
    %48 = vector.shape_cast %47 : vector<128xf32> to vector<1x1x128xf32>
    %49 = vector.broadcast %48 : vector<1x1x128xf32> to vector<8x16x128xf32>
    %50 = arith.mulf %45, %49 : vector<8x16x128xf32>
    %51 = arith.addf %44, %50 : vector<8x16x128xf32>
    %c0_43 = arith.constant 0 : index
    %c2 = arith.constant 2 : index
    %c0_44 = arith.constant 0 : index
    %52 = vector.load %arg10[%c0_43, %c2, %c0_44] : memref<18x24x128xf32, #tpu.memory_space<vmem>>, vector<8x16x128xf32>
    %53 = vector.extract_strided_slice %35 {offsets = [0, 2, 0], sizes = [1, 1, 128], strides = [1, 1, 1]} : vector<3x3x128xf32> to vector<1x1x128xf32>
    %54 = vector.shape_cast %53 : vector<1x1x128xf32> to vector<128xf32>
    %55 = vector.shape_cast %54 : vector<128xf32> to vector<1x1x128xf32>
    %56 = vector.broadcast %55 : vector<1x1x128xf32> to vector<8x16x128xf32>
    %57 = arith.mulf %52, %56 : vector<8x16x128xf32>
    %58 = arith.addf %51, %57 : vector<8x16x128xf32>
    %c1_45 = arith.constant 1 : index
    %c0_46 = arith.constant 0 : index
    %c0_47 = arith.constant 0 : index
    %59 = vector.load %arg10[%c1_45, %c0_46, %c0_47] : memref<18x24x128xf32, #tpu.memory_space<vmem>>, vector<8x16x128xf32>
    %60 = vector.extract_strided_slice %35 {offsets = [1, 0, 0], sizes = [1, 1, 128], strides = [1, 1, 1]} : vector<3x3x128xf32> to vector<1x1x128xf32>
    %61 = vector.shape_cast %60 : vector<1x1x128xf32> to vector<128xf32>
    %62 = vector.shape_cast %61 : vector<128xf32> to vector<1x1x128xf32>
    %63 = vector.broadcast %62 : vector<1x1x128xf32> to vector<8x16x128xf32>
    %64 = arith.mulf %59, %63 : vector<8x16x128xf32>
    %65 = arith.addf %58, %64 : vector<8x16x128xf32>
    %c1_48 = arith.constant 1 : index
    %c1_49 = arith.constant 1 : index
    %c0_50 = arith.constant 0 : index
    %66 = vector.load %arg10[%c1_48, %c1_49, %c0_50] : memref<18x24x128xf32, #tpu.memory_space<vmem>>, vector<8x16x128xf32>
    %67 = vector.extract_strided_slice %35 {offsets = [1, 1, 0], sizes = [1, 1, 128], strides = [1, 1, 1]} : vector<3x3x128xf32> to vector<1x1x128xf32>
    %68 = vector.shape_cast %67 : vector<1x1x128xf32> to vector<128xf32>
    %69 = vector.shape_cast %68 : vector<128xf32> to vector<1x1x128xf32>
    %70 = vector.broadcast %69 : vector<1x1x128xf32> to vector<8x16x128xf32>
    %71 = arith.mulf %66, %70 : vector<8x16x128xf32>
    %72 = arith.addf %65, %71 : vector<8x16x128xf32>
    %c1_51 = arith.constant 1 : index
    %c2_52 = arith.constant 2 : index
    %c0_53 = arith.constant 0 : index
    %73 = vector.load %arg10[%c1_51, %c2_52, %c0_53] : memref<18x24x128xf32, #tpu.memory_space<vmem>>, vector<8x16x128xf32>
    %74 = vector.extract_strided_slice %35 {offsets = [1, 2, 0], sizes = [1, 1, 128], strides = [1, 1, 1]} : vector<3x3x128xf32> to vector<1x1x128xf32>
    %75 = vector.shape_cast %74 : vector<1x1x128xf32> to vector<128xf32>
    %76 = vector.shape_cast %75 : vector<128xf32> to vector<1x1x128xf32>
    %77 = vector.broadcast %76 : vector<1x1x128xf32> to vector<8x16x128xf32>
    %78 = arith.mulf %73, %77 : vector<8x16x128xf32>
    %79 = arith.addf %72, %78 : vector<8x16x128xf32>
    %c2_54 = arith.constant 2 : index
    %c0_55 = arith.constant 0 : index
    %c0_56 = arith.constant 0 : index
    %80 = vector.load %arg10[%c2_54, %c0_55, %c0_56] : memref<18x24x128xf32, #tpu.memory_space<vmem>>, vector<8x16x128xf32>
    %81 = vector.extract_strided_slice %35 {offsets = [2, 0, 0], sizes = [1, 1, 128], strides = [1, 1, 1]} : vector<3x3x128xf32> to vector<1x1x128xf32>
    %82 = vector.shape_cast %81 : vector<1x1x128xf32> to vector<128xf32>
    %83 = vector.shape_cast %82 : vector<128xf32> to vector<1x1x128xf32>
    %84 = vector.broadcast %83 : vector<1x1x128xf32> to vector<8x16x128xf32>
    %85 = arith.mulf %80, %84 : vector<8x16x128xf32>
    %86 = arith.addf %79, %85 : vector<8x16x128xf32>
    %c2_57 = arith.constant 2 : index
    %c1_58 = arith.constant 1 : index
    %c0_59 = arith.constant 0 : index
    %87 = vector.load %arg10[%c2_57, %c1_58, %c0_59] : memref<18x24x128xf32, #tpu.memory_space<vmem>>, vector<8x16x128xf32>
    %88 = vector.extract_strided_slice %35 {offsets = [2, 1, 0], sizes = [1, 1, 128], strides = [1, 1, 1]} : vector<3x3x128xf32> to vector<1x1x128xf32>
    %89 = vector.shape_cast %88 : vector<1x1x128xf32> to vector<128xf32>
    %90 = vector.shape_cast %89 : vector<128xf32> to vector<1x1x128xf32>
    %91 = vector.broadcast %90 : vector<1x1x128xf32> to vector<8x16x128xf32>
    %92 = arith.mulf %87, %91 : vector<8x16x128xf32>
    %93 = arith.addf %86, %92 : vector<8x16x128xf32>
    %c2_60 = arith.constant 2 : index
    %c2_61 = arith.constant 2 : index
    %c0_62 = arith.constant 0 : index
    %94 = vector.load %arg10[%c2_60, %c2_61, %c0_62] : memref<18x24x128xf32, #tpu.memory_space<vmem>>, vector<8x16x128xf32>
    %95 = vector.extract_strided_slice %35 {offsets = [2, 2, 0], sizes = [1, 1, 128], strides = [1, 1, 1]} : vector<3x3x128xf32> to vector<1x1x128xf32>
    %96 = vector.shape_cast %95 : vector<1x1x128xf32> to vector<128xf32>
    %97 = vector.shape_cast %96 : vector<128xf32> to vector<1x1x128xf32>
    %98 = vector.broadcast %97 : vector<1x1x128xf32> to vector<8x16x128xf32>
    %99 = arith.mulf %94, %98 : vector<8x16x128xf32>
    %100 = arith.addf %93, %99 : vector<8x16x128xf32>
    %101 = vector.shape_cast %36 : vector<1x128xf32> to vector<1x1x128xf32>
    %102 = vector.broadcast %101 : vector<1x1x128xf32> to vector<8x16x128xf32>
    %103 = arith.addf %100, %102 : vector<8x16x128xf32>
    %cst_63 = arith.constant 0.000000e+00 : f32
    %cst_64 = arith.constant 6.000000e+00 : f32
    %104 = vector.broadcast %cst_63 : f32 to vector<8x16x128xf32>
    %105 = arith.maximumf %104, %103 : vector<8x16x128xf32>
    %106 = vector.broadcast %cst_64 : f32 to vector<8x16x128xf32>
    %107 = arith.minimumf %106, %105 : vector<8x16x128xf32>
    %108 = vector.shape_cast %107 : vector<8x16x128xf32> to vector<128x128xf32>
    %109 = arith.truncf %108 : vector<128x128xf32> to vector<128x128xbf16>
    %c0_65 = arith.constant 0 : index
    %c0_66 = arith.constant 0 : index
    %110 = vector.load %arg11[%c0_65, %c0_66] : memref<256x160xbf16, #tpu.memory_space<vmem>>, vector<128x128xbf16>
    tpu.vector_store %arg11[%c0_65, %c0_66], %109 {strides = array<i32>} : memref<256x160xbf16, #tpu.memory_space<vmem>>, vector<128x128xbf16>,
    %cst_67 = arith.constant 0.000000e+00 : f32
    %111 = vector.broadcast %cst_67 : f32 to vector<8x16x128xf32>
    %c8_68 = arith.constant 8 : index
    %c0_69 = arith.constant 0 : index
    %c0_70 = arith.constant 0 : index
    %112 = vector.load %arg10[%c8_68, %c0_69, %c0_70] : memref<18x24x128xf32, #tpu.memory_space<vmem>>, vector<8x16x128xf32>
    %113 = vector.extract_strided_slice %35 {offsets = [0, 0, 0], sizes = [1, 1, 128], strides = [1, 1, 1]} : vector<3x3x128xf32> to vector<1x1x128xf32>
    %114 = vector.shape_cast %113 : vector<1x1x128xf32> to vector<128xf32>
    %115 = vector.shape_cast %114 : vector<128xf32> to vector<1x1x128xf32>
    %116 = vector.broadcast %115 : vector<1x1x128xf32> to vector<8x16x128xf32>
    %117 = arith.mulf %112, %116 : vector<8x16x128xf32>
    %118 = arith.addf %111, %117 : vector<8x16x128xf32>
    %c8_71 = arith.constant 8 : index
    %c1_72 = arith.constant 1 : index
    %c0_73 = arith.constant 0 : index
    %119 = vector.load %arg10[%c8_71, %c1_72, %c0_73] : memref<18x24x128xf32, #tpu.memory_space<vmem>>, vector<8x16x128xf32>
    %120 = vector.extract_strided_slice %35 {offsets = [0, 1, 0], sizes = [1, 1, 128], strides = [1, 1, 1]} : vector<3x3x128xf32> to vector<1x1x128xf32>
    %121 = vector.shape_cast %120 : vector<1x1x128xf32> to vector<128xf32>
    %122 = vector.shape_cast %121 : vector<128xf32> to vector<1x1x128xf32>
    %123 = vector.broadcast %122 : vector<1x1x128xf32> to vector<8x16x128xf32>
    %124 = arith.mulf %119, %123 : vector<8x16x128xf32>
    %125 = arith.addf %118, %124 : vector<8x16x128xf32>
    %c8_74 = arith.constant 8 : index
    %c2_75 = arith.constant 2 : index
    %c0_76 = arith.constant 0 : index
    %126 = vector.load %arg10[%c8_74, %c2_75, %c0_76] : memref<18x24x128xf32, #tpu.memory_space<vmem>>, vector<8x16x128xf32>
    %127 = vector.extract_strided_slice %35 {offsets = [0, 2, 0], sizes = [1, 1, 128], strides = [1, 1, 1]} : vector<3x3x128xf32> to vector<1x1x128xf32>
    %128 = vector.shape_cast %127 : vector<1x1x128xf32> to vector<128xf32>
    %129 = vector.shape_cast %128 : vector<128xf32> to vector<1x1x128xf32>
    %130 = vector.broadcast %129 : vector<1x1x128xf32> to vector<8x16x128xf32>
    %131 = arith.mulf %126, %130 : vector<8x16x128xf32>
    %132 = arith.addf %125, %131 : vector<8x16x128xf32>
    %c9_77 = arith.constant 9 : index
    %c0_78 = arith.constant 0 : index
    %c0_79 = arith.constant 0 : index
    %133 = vector.load %arg10[%c9_77, %c0_78, %c0_79] : memref<18x24x128xf32, #tpu.memory_space<vmem>>, vector<8x16x128xf32>
    %134 = vector.extract_strided_slice %35 {offsets = [1, 0, 0], sizes = [1, 1, 128], strides = [1, 1, 1]} : vector<3x3x128xf32> to vector<1x1x128xf32>
    %135 = vector.shape_cast %134 : vector<1x1x128xf32> to vector<128xf32>
    %136 = vector.shape_cast %135 : vector<128xf32> to vector<1x1x128xf32>
    %137 = vector.broadcast %136 : vector<1x1x128xf32> to vector<8x16x128xf32>
    %138 = arith.mulf %133, %137 : vector<8x16x128xf32>
    %139 = arith.addf %132, %138 : vector<8x16x128xf32>
    %c9_80 = arith.constant 9 : index
    %c1_81 = arith.constant 1 : index
    %c0_82 = arith.constant 0 : index
    %140 = vector.load %arg10[%c9_80, %c1_81, %c0_82] : memref<18x24x128xf32, #tpu.memory_space<vmem>>, vector<8x16x128xf32>
    %141 = vector.extract_strided_slice %35 {offsets = [1, 1, 0], sizes = [1, 1, 128], strides = [1, 1, 1]} : vector<3x3x128xf32> to vector<1x1x128xf32>
    %142 = vector.shape_cast %141 : vector<1x1x128xf32> to vector<128xf32>
    %143 = vector.shape_cast %142 : vector<128xf32> to vector<1x1x128xf32>
    %144 = vector.broadcast %143 : vector<1x1x128xf32> to vector<8x16x128xf32>
    %145 = arith.mulf %140, %144 : vector<8x16x128xf32>
    %146 = arith.addf %139, %145 : vector<8x16x128xf32>
    %c9_83 = arith.constant 9 : index
    %c2_84 = arith.constant 2 : index
    %c0_85 = arith.constant 0 : index
    %147 = vector.load %arg10[%c9_83, %c2_84, %c0_85] : memref<18x24x128xf32, #tpu.memory_space<vmem>>, vector<8x16x128xf32>
    %148 = vector.extract_strided_slice %35 {offsets = [1, 2, 0], sizes = [1, 1, 128], strides = [1, 1, 1]} : vector<3x3x128xf32> to vector<1x1x128xf32>
    %149 = vector.shape_cast %148 : vector<1x1x128xf32> to vector<128xf32>
    %150 = vector.shape_cast %149 : vector<128xf32> to vector<1x1x128xf32>
    %151 = vector.broadcast %150 : vector<1x1x128xf32> to vector<8x16x128xf32>
    %152 = arith.mulf %147, %151 : vector<8x16x128xf32>
    %153 = arith.addf %146, %152 : vector<8x16x128xf32>
    %c10 = arith.constant 10 : index
    %c0_86 = arith.constant 0 : index
    %c0_87 = arith.constant 0 : index
    %154 = vector.load %arg10[%c10, %c0_86, %c0_87] : memref<18x24x128xf32, #tpu.memory_space<vmem>>, vector<8x16x128xf32>
    %155 = vector.extract_strided_slice %35 {offsets = [2, 0, 0], sizes = [1, 1, 128], strides = [1, 1, 1]} : vector<3x3x128xf32> to vector<1x1x128xf32>
    %156 = vector.shape_cast %155 : vector<1x1x128xf32> to vector<128xf32>
    %157 = vector.shape_cast %156 : vector<128xf32> to vector<1x1x128xf32>
    %158 = vector.broadcast %157 : vector<1x1x128xf32> to vector<8x16x128xf32>
    %159 = arith.mulf %154, %158 : vector<8x16x128xf32>
    %160 = arith.addf %153, %159 : vector<8x16x128xf32>
    %c10_88 = arith.constant 10 : index
    %c1_89 = arith.constant 1 : index
    %c0_90 = arith.constant 0 : index
    %161 = vector.load %arg10[%c10_88, %c1_89, %c0_90] : memref<18x24x128xf32, #tpu.memory_space<vmem>>, vector<8x16x128xf32>
    %162 = vector.extract_strided_slice %35 {offsets = [2, 1, 0], sizes = [1, 1, 128], strides = [1, 1, 1]} : vector<3x3x128xf32> to vector<1x1x128xf32>
    %163 = vector.shape_cast %162 : vector<1x1x128xf32> to vector<128xf32>
    %164 = vector.shape_cast %163 : vector<128xf32> to vector<1x1x128xf32>
    %165 = vector.broadcast %164 : vector<1x1x128xf32> to vector<8x16x128xf32>
    %166 = arith.mulf %161, %165 : vector<8x16x128xf32>
    %167 = arith.addf %160, %166 : vector<8x16x128xf32>
    %c10_91 = arith.constant 10 : index
    %c2_92 = arith.constant 2 : index
    %c0_93 = arith.constant 0 : index
    %168 = vector.load %arg10[%c10_91, %c2_92, %c0_93] : memref<18x24x128xf32, #tpu.memory_space<vmem>>, vector<8x16x128xf32>
    %169 = vector.extract_strided_slice %35 {offsets = [2, 2, 0], sizes = [1, 1, 128], strides = [1, 1, 1]} : vector<3x3x128xf32> to vector<1x1x128xf32>
    %170 = vector.shape_cast %169 : vector<1x1x128xf32> to vector<128xf32>
    %171 = vector.shape_cast %170 : vector<128xf32> to vector<1x1x128xf32>
    %172 = vector.broadcast %171 : vector<1x1x128xf32> to vector<8x16x128xf32>
    %173 = arith.mulf %168, %172 : vector<8x16x128xf32>
    %174 = arith.addf %167, %173 : vector<8x16x128xf32>
    %175 = vector.shape_cast %36 : vector<1x128xf32> to vector<1x1x128xf32>
    %176 = vector.broadcast %175 : vector<1x1x128xf32> to vector<8x16x128xf32>
    %177 = arith.addf %174, %176 : vector<8x16x128xf32>
    %cst_94 = arith.constant 0.000000e+00 : f32
    %cst_95 = arith.constant 6.000000e+00 : f32
    %178 = vector.broadcast %cst_94 : f32 to vector<8x16x128xf32>
    %179 = arith.maximumf %178, %177 : vector<8x16x128xf32>
    %180 = vector.broadcast %cst_95 : f32 to vector<8x16x128xf32>
    %181 = arith.minimumf %180, %179 : vector<8x16x128xf32>
    %182 = vector.shape_cast %181 : vector<8x16x128xf32> to vector<128x128xf32>
    %183 = arith.truncf %182 : vector<128x128xf32> to vector<128x128xbf16>
    %c128 = arith.constant 128 : index
    %c0_96 = arith.constant 0 : index
    %184 = vector.load %arg11[%c128, %c0_96] : memref<256x160xbf16, #tpu.memory_space<vmem>>, vector<128x128xbf16>
    tpu.vector_store %arg11[%c128, %c0_96], %183 {strides = array<i32>} : memref<256x160xbf16, #tpu.memory_space<vmem>>, vector<128x128xbf16>,
    %c16_i32 = arith.constant 16 : i32
    %185 = arith.muli %arg1, %c16_i32 : i32
    %c0_97 = arith.constant 0 : index
    %186 = arith.index_cast %185 : i32 to index
    %c0_98 = arith.constant 0 : index
    %c0_99 = arith.constant 0 : index
    %187 = vector.load %arg2[%c0_97, %186, %c0_98, %c0_99] : memref<1x16x16x32xbf16, #tpu.memory_space<vmem>>, vector<1x16x16x32xbf16>
    %188 = vector.shape_cast %187 : vector<1x16x16x32xbf16> to vector<16x16x32xbf16>
    %189 = vector.shape_cast %188 : vector<16x16x32xbf16> to vector<256x32xbf16>
    %c0_100 = arith.constant 0 : index
    %c128_101 = arith.constant 128 : index
    %190 = vector.load %arg11[%c0_100, %c128_101] : memref<256x160xbf16, #tpu.memory_space<vmem>>, vector<256x32xbf16>
    tpu.vector_store %arg11[%c0_100, %c128_101], %189 {strides = array<i32>} : memref<256x160xbf16, #tpu.memory_space<vmem>>, vector<256x32xbf16>,
    %c0_102 = arith.constant 0 : index
    %c0_103 = arith.constant 0 : index
    %191 = vector.load %arg11[%c0_102, %c0_103] : memref<256x160xbf16, #tpu.memory_space<vmem>>, vector<256x160xbf16>
    %c0_104 = arith.constant 0 : index
    %c0_105 = arith.constant 0 : index
    %192 = vector.load %arg7[%c0_104, %c0_105] : memref<160x128xbf16, #tpu.memory_space<vmem>>, vector<160x128xbf16>
    %cst_106 = arith.constant dense<0.000000e+00> : vector<256x128xf32>
    %193 = tpu.matmul %191, %192, %cst_106 {dimension_numbers = #tpu.dot_dimension_numbers<[1], [0], [0], [1], [0, 0, 1, 1], [], []>} : vector<256x160xbf16>, vector<160x128xbf16>, vector<256x128xf32> -> vector<256x128xf32>
    %c0_107 = arith.constant 0 : index
    %c0_108 = arith.constant 0 : index
    %194 = vector.load %arg8[%c0_107, %c0_108] : memref<1x128xf32, #tpu.memory_space<vmem>>, vector<1x128xf32>
    %195 = vector.broadcast %194 : vector<1x128xf32> to vector<256x128xf32>
    %196 = arith.addf %193, %195 : vector<256x128xf32>
    %197 = vector.shape_cast %196 : vector<256x128xf32> to vector<16x16x128xf32>
    %c0_109 = arith.constant 0 : index
    %c0_110 = arith.constant 0 : index
    %c0_111 = arith.constant 0 : index
    %c0_112 = arith.constant 0 : index
    %198 = vector.load %arg9[%c0_109, %c0_110, %c0_111, %c0_112] : memref<1x16x16x128xf32, #tpu.memory_space<vmem>>, vector<1x16x16x128xf32>
    %199 = vector.shape_cast %198 : vector<1x16x16x128xf32> to vector<16x16x128xf32>
    %200 = vector.shape_cast %197 : vector<16x16x128xf32> to vector<1x16x16x128xf32>
    tpu.vector_store %arg9[%c0_109, %c0_110, %c0_111, %c0_112], %200 {strides = array<i32>} : memref<1x16x16x128xf32, #tpu.memory_space<vmem>>, vector<1x16x16x128xf32>,
    return
  }
  func.func @transform_0(%arg0: i32, %arg1: i32) -> (i32, i32, i32, i32) {
    %c0_i32 = arith.constant 0 : i32
    %c0_i32_0 = arith.constant 0 : i32
    %c0_i32_1 = arith.constant 0 : i32
    %c0_i32_2 = arith.constant 0 : i32
    return %arg0, %c0_i32, %c0_i32_0, %c0_i32_1 : i32, i32, i32, i32
  }
  func.func @transform_1(%arg0: i32, %arg1: i32) -> (i32, i32) {
    %c0_i32 = arith.constant 0 : i32
    %c0_i32_0 = arith.constant 0 : i32
    %c0_i32_1 = arith.constant 0 : i32
    return %c0_i32, %c0_i32_0 : i32, i32
  }
  func.func @transform_2(%arg0: i32, %arg1: i32) -> (i32, i32) {
    %c0_i32 = arith.constant 0 : i32
    %c0_i32_0 = arith.constant 0 : i32
    %c0_i32_1 = arith.constant 0 : i32
    return %c0_i32, %c0_i32_0 : i32, i32
  }
  func.func @transform_3(%arg0: i32, %arg1: i32) -> (i32, i32, i32) {
    %c0_i32 = arith.constant 0 : i32
    %c0_i32_0 = arith.constant 0 : i32
    %c0_i32_1 = arith.constant 0 : i32
    %c0_i32_2 = arith.constant 0 : i32
    return %c0_i32, %c0_i32_0, %c0_i32_1 : i32, i32, i32
  }
  func.func @transform_4(%arg0: i32, %arg1: i32) -> (i32, i32) {
    %c0_i32 = arith.constant 0 : i32
    %c0_i32_0 = arith.constant 0 : i32
    %c0_i32_1 = arith.constant 0 : i32
    return %c0_i32, %c0_i32_0 : i32, i32
  }
  func.func @transform_5(%arg0: i32, %arg1: i32) -> (i32, i32) {
    %c0_i32 = arith.constant 0 : i32
    %c0_i32_0 = arith.constant 0 : i32
    %c0_i32_1 = arith.constant 0 : i32
    return %c0_i32, %c0_i32_0 : i32, i32
  }
  func.func @transform_6(%arg0: i32, %arg1: i32) -> (i32, i32) {
    %c0_i32 = arith.constant 0 : i32
    %c0_i32_0 = arith.constant 0 : i32
    %c0_i32_1 = arith.constant 0 : i32
    return %c0_i32, %c0_i32_0 : i32, i32
  }
  func.func @transform_7(%arg0: i32, %arg1: i32) -> (i32, i32, i32, i32) {
    %c0_i32 = arith.constant 0 : i32
    %c0_i32_0 = arith.constant 0 : i32
    %c0_i32_1 = arith.constant 0 : i32
    return %arg0, %arg1, %c0_i32, %c0_i32_0 : i32, i32, i32, i32
  }
}

</mosaic_0001>

<bundles_post_ra>
// kernel: tpu_custom_call.1
= control target key start
LH: loop header
LB: loop body
LE: loop exit
PB: predicated region body
PF: predicated region fallthrough
CT: control target
= control target key end

     0   :  { %s4978_s0 = inlined_call_operand.hbm [shape: bf16[2,16,16,32], index: 0, kind: input, shape index: {}]   ;;  %s4979_s1 = inlined_call_operand.hbm [shape: bf16[32,128], index: 1, kind: input, shape index: {}]   ;;  %s4980_s2 = inlined_call_operand.vmem [shape: f32[1,128], index: 2, kind: input, shape index: {}]   ;;  %s4981_s3 = inlined_call_operand.hbm [shape: f32[3,3,128], index: 3, kind: input, shape index: {}]   ;;  %s4982_s4 = inlined_call_operand.vmem [shape: f32[1,128], index: 4, kind: input, shape index: {}]   ;;  %s4983_s5 = inlined_call_operand.hbm [shape: bf16[160,128], index: 5, kind: input, shape index: {}]   ;;  %s4984_s6 = inlined_call_operand.vmem [shape: f32[1,128], index: 6, kind: input, shape index: {}]   ;;  %s4985_s7 = inlined_call_operand.hbm [shape: f32[2,16,16,128], index: 7, kind: output, shape index: {}]  }
   0x1   :  { %5001 = sst [smem:[#allocation62_spill]] %s4979_s1 }
   0x2   :  { %5002 = sst [smem:[#allocation63_spill]] %s4981_s3 }
   0x3   :  { %5003 = sst [smem:[#allocation64_spill]] %s4983_s5 }
   0x4   :  { %12 = vsyncpa [#allocation5], 0 }
   0x5   :  { %14 = vsyncpa [#allocation5 + $0x1], 0 }
   0x6   :  { %15 = vsyncpa [#allocation8], 0 }
   0x7   :  { %16 = vsyncpa [#allocation11], 0 }
   0x8   :  { %17 = vsyncpa [#allocation6], 0 }
   0x9   :  { %19 = vsyncpa [#allocation6 + $0x1], 0  ;;  %s3479_s24 = smov 0   ;;  %s3481_s25 = smov 0  }
   0xa   :  { %s3483_s26 = smov 0   ;;  %s3485_s27 = smov 0  }
   0xb   :  { %s3487_s28 = smov 0   ;;  %s3489_s29 = smov 0  }
   0xc LB: > { %s2778_s30 = sadd.s32 4294967295, %s3426_s29   ;;  %s2779_s8 = sadd.s32 4294967294, %s3426_s29   ;;  %s3426_s29 = sphi %s3489_s29, %s25_s29   ;;  %s3422_s28 = sphi %s3487_s28, %s5177_s28   ;;  %s3418_s27 = sphi %s3485_s27, %s5176_s27   ;;  %s3414_s26 = sphi %s3483_s26, %s5175_s26   ;;  %s3410_s25 = sphi %s3481_s25, %s5174_s25   ;;  %s3406_s24 = sphi %s3479_s24, %s5173_s24  }
   0xd   : > { %p57_p0 = scmp.ne.s32.totalorder %s3410_s25, %s3406_s24  ;;  %p3513_p1 = scmp.eq.s32.totalorder %s2778_s30, 0 }
   0xe   : > { %p3517_p2 = scmp.eq.s32.totalorder %s2778_s30, 1  ;;  %p215_p3 = scmp.eq.s32.totalorder %s2779_s8, 1 }
   0xf   : > { %p3523_p4 = por %p3513_p1, %p57_p0  ;;  %p2780_p5 = scmp.ge.s32.totalorder %s3426_s29, 1 }
  0x10   : > { %p3528_p6 = por %p215_p3, %p57_p0  ;;  %p222_p7 = scmp.lt.s32.totalorder %s3426_s29, 3 }
  0x11   : > { %s3428_s14 = smov [#allocation7]   ;;  %s3429_s17 = smov [#allocation9]  }
  0x12   : > { %s5007_s12 = scalar_select %p3528_p6, 1, 0 }
  0x13   : > { %p3533_p8 = pnand %p2780_p5, %p222_p7  ;;  %s234_s15 = sshll.u32 %s3428_s14, 4  ;;  %s235_s15 = int_to_ptr.vmem [resolvable:$true] %s234_s15 }
  0x14   : > { %s250_s18 = sshll.u32 %s3429_s17, 4  ;;  %s3430_s19 = smov [#allocation10]   ;;  %s251_s18 = int_to_ptr.vmem [resolvable:$true] %s250_s18 }
  0x15   : > { %p3075_p9 = pneg %p3533_p8  ;;  %s266_s20 = sshll.u32 %s3430_s19, 4  ;;  %s267_s20 = int_to_ptr.vmem [resolvable:$true] %s266_s20 }
  0x16   : > { %s3243_s21 = scalar_lea.vmem %s235_s15, 256  ;;  %p3251_p5 = scmp.lt.s32.totalorder %s235_s15, %s235_s15 }
  0x17   : > { %p3542_p11 = pnand %p3075_p9, %p3513_p1  ;;  %p3244_p13 = scmp.ne.s32.totalorder %s235_s15, %s3243_s21 }
  0x18   : > { %p3252_p7 = scmp.lt.s32.totalorder %s3243_s21, %s3243_s21 }
  0x19   : > { %p3234_p12 = pneg %p3542_p11 }
  0x1a   : > { %p3253_p9 = por %p3252_p7, %p3251_p5 }
  0x1b   : > { %p3246_p0 = pnand %p3244_p13, %p3234_p12 }
  0x1d   : > { %p3247_p3 = pneg %p3246_p0 }
  0x1f   : > { %p3254_p10 = pnand %p3253_p9, %p3247_p3 }
  0x21   : > { %3257 = shalt.err (!%p3254_p10)
}
  0x22   : > { %s4986_s22 = smov 64   ;;  %s4987_s23 = smov 4  }
  0x23   : > { %s5010_s1 = sld [smem:[#allocation62_spill]]  ;;  %s3269_s14 = scalar_lea.vmem %s251_s18, 192 }
  0x24   : > { %p3270_p13 = scmp.ne.s32.totalorder %s251_s18, %s3269_s14  ;;  %p3277_p3 = scmp.lt.s32.totalorder %s251_s18, %s251_s18 }
  0x25   : > { %p3278_p10 = scmp.lt.s32.totalorder %s3269_s14, %s3269_s14 }
  0x26   : > { %p3272_p0 = pnand %p3270_p13, %p3234_p12 }
  0x27   : > { %p3279_p7 = por %p3278_p10, %p3277_p3 }
  0x28   : > { %p3273_p5 = pneg %p3272_p0 }
  0x29   : > { %3078 = dma.hbm_to_vmem [thread:$0]  (!%p3542_p11), %s5010_s1, 256, %s235_s15, [#allocation8], %s4986_s22, %s4986_s22, %s4987_s23  }
  0x2a   : > { %p3280_p9 = pnand %p3279_p7, %p3273_p5 }
  0x2c   : > { %3283 = shalt.err (!%p3280_p9)
}
  0x2d   : > { %s5011_s3 = sld [smem:[#allocation63_spill]]  ;;  %s3295_s15 = scalar_lea.vmem %s267_s20, 1280 }
  0x2e   : > { %p3296_p6 = scmp.ne.s32.totalorder %s267_s20, %s3295_s15  ;;  %p3303_p3 = scmp.lt.s32.totalorder %s267_s20, %s267_s20 }
  0x2f   : > { %p3304_p5 = scmp.lt.s32.totalorder %s3295_s15, %s3295_s15 }
  0x30   : > { %p3298_p13 = pnand %p3296_p6, %p3234_p12 }
  0x31   : > { %p3305_p10 = por %p3304_p5, %p3303_p3 }
  0x32   : > { %p3299_p0 = pneg %p3298_p13 }
  0x33   : > { %3081 = dma.hbm_to_vmem [thread:$0]  (!%p3542_p11), %s5011_s3, 192, %s251_s18, [#allocation8], %s4986_s22, %s4986_s22, %s4987_s23  }
  0x34   : > { %p3306_p7 = pnand %p3305_p10, %p3299_p0 }
  0x36   : > { %3309 = shalt.err (!%p3306_p7)
}
  0x37   : > { %s5012_s5 = sld [smem:[#allocation64_spill]]  ;;  %s44_s18 = sadd.s32 1, %s3414_s26 }
  0x38   : > { %s37_s16 = sadd.s32 1, %s3422_s28  ;;  %p51_p6 = scmp.ne.s32.totalorder %s3414_s26, %s3410_s25 }
  0x39   : > { %p39_p12 = scmp.ge.s32.totalorder %s37_s16, 2  ;;  %p52_p9 = scmp.eq.s32.totalorder %s3426_s29, 0 }
  0x3a   : > { %p3588_p13 = por %p3517_p2, %p51_p6  ;;  %p3096_p0 = scmp.lt.s32.totalorder %s3426_s29, 2 }
  0x3b   : > { %s5179_s16 = smov (%p39_p12, %s37_s16), 0  ;;  %p53_p3 = por %p52_p9, %p51_p6 }
  0x3c   : > { %s5013_s8 = scalar_select %p3588_p13, 1, 0 }
  0x3d   : > { %3084 = dma.hbm_to_vmem [thread:$0]  (!%p3542_p11), %s5012_s5, 1280, %s267_s20, [#allocation11], %s4986_s22, %s4986_s22, %s4987_s23  }
  0x3e   : > { %s283_s14 = sand.u32 1, %s3414_s26   ;;  %s41_s17 = ssub.s32 %s3422_s28, %s5179_s16 }
  0x3f   : > { %p42_p5 = scmp.eq.s32.totalorder %s41_s17, 0  ;;  %s2785_s20 = sshll.u32 %s283_s14, 7 }
  0x40   : > { %s2945_s19 = sshll.u32 %s3422_s28, 11  ;;  %s287_s22 = scalar_lea.vmem [#allocation4], %s2785_s20 }
  0x41   : > { %s3600_s15 = scalar_select %p42_p5, %s3414_s26, %s44_s18  }
  0x42   : > { %s293_s10 = scalar_lea.hbm %s4978_s0, %s2945_s19  ;;  %s294_s23 = sshll.u32 %s287_s22, 4  ;;  %s295_s23 = int_to_ptr.vmem [resolvable:$true] %s294_s23 }
  0x43   : > { %p3607_p2 = pnand %p3096_p0, %p53_p3  ;;  %s284_s3 = scalar_lea.sflag [#allocation5], %s283_s14 }
  0x44   : > { %s3323_s17 = scalar_lea.vmem %s295_s23, 2048  ;;  %s3433_s18 = smov [#allocation4]  }
  0x45   : > { %p3312_p11 = pneg %p3607_p2  ;;  %p3324_p10 = scmp.ne.s32.totalorder %s295_s23, %s3323_s17 }
  0x46   : > { %s3328_s5 = sshll.u32 %s3433_s18, 4  ;;  %s3329_s5 = int_to_ptr.vmem [resolvable:$false] %s3328_s5 }
  0x47   : > { %p3326_p7 = pnand %p3324_p10, %p3312_p11  ;;  %s3330_s19 = scalar_lea.vmem %s3329_s5, 4096 }
  0x48   : > { %p3331_p12 = scmp.lt.s32.totalorder %s295_s23, %s3329_s5  ;;  %p3332_p9 = scmp.lt.s32.totalorder %s3330_s19, %s3323_s17 }
  0x49   : > { %p3327_p6 = pneg %p3326_p7 }
  0x4a   : > { %p3333_p5 = por %p3332_p9, %p3331_p12 }
  0x4c   : > { %p3334_p13 = pnand %p3333_p5, %p3327_p6 }
  0x4e   : > { %3337 = shalt.err (!%p3334_p13)
}
  0x4f   : > { %s5015_s22 = smov 4   ;;  %s5016_s20 = smov 64  }
  0x50   : > { %3088 = dma.hbm_to_vmem [thread:$0]  (!%p3607_p2), %s293_s10, 2048, %s295_s23, %s284_s3, %s5016_s20, %s5016_s20, %s5015_s22  }
  0x51   : > { %306 = sbr.rel (%p3533_p8) target bundleno = 768 (0x300), region = 48 }
  0x56   : > { %s3621_s14 = sand.u32 1, %s3410_s25  }
  0x57   : > { %s2789_s5 = sshll.u32 %s3621_s14, 7  ;;  %s309_s21 = scalar_lea.sflag [#allocation5], %s3621_s14 }
  0x58   : > { %s3625_s30 = scalar_lea.vmem [#allocation4], %s2789_s5 }
  0x59   : > { %3389 = dma.done.wait (%p3523_p4), %s309_s21, 2048  }
  0x5a   : > { %3391 = vsyncadd (%p3523_p4), %s309_s21, 4294965248 }
  0x5b   : > { %3393 = dma.done.wait (%p3513_p1), [#allocation8], 448  }
  0x5c   : > { %3395 = vsyncadd (%p3513_p1), [#allocation8], 4294966848 }
  0x5d   : > { %3397 = dma.done.wait (%p3513_p1), [#allocation11], 1280  }
  0x5e   : > { %3399 = vsyncadd (%p3513_p1), [#allocation11], 4294966016  ;;  %v3434_v0 = vmov 0.0   ;;  %v3158_v1 = vld [vmem:[#allocation7 + $0x8] sm:$0xff]   ;;  %v3159_v2 = vld [vmem:[#allocation7] sm:$0xff]   ;;  %vm479_vm0 = vcmask 261120   ;;  %v924_v28 = vlaneseq }
  0x5f   : > { %363 = vst [vmem:[#allocation2 + $0x30] sm:$0x1] %v3434_v0  ;;  %362 = vst [vmem:[#allocation2 + $0x18] sm:$0x1] %v3434_v0  ;;  %2999 = vmatprep.subr.bf16.mxu0 %v3158_v1  ;;  %v3160_v3 = vld [vmem:[%s3625_s30] sm:$0xff]   ;;  %v3162_v4 = vld [vmem:[#allocation7 + $0x8] sm:$0xff]  }
  0x60   : > { %364 = vst [vmem:[#allocation2 + $0x48] sm:$0x1] %v3434_v0  ;;  %365 = vst [vmem:[#allocation2 + $0x60] sm:$0x1] %v3434_v0  ;;  %3000 = vmatpush3.bf16.msra.mxu0 %v3158_v1  ;;  %3003 = vmatprep.mubr.msk.bf16.mxu0 %vm479_vm0, %v3160_v3  ;;  %v3161_v5 = vld [vmem:[%s3625_s30 + $0x8] sm:$0xff]   ;;  %v3163_v6 = vld [vmem:[%s3625_s30 + $0x10] sm:$0xff]  }
  0x61   : > { %366 = vst [vmem:[#allocation2 + $0x78] sm:$0x1] %v3434_v0  ;;  %367 = vst [vmem:[#allocation2 + $0x90] sm:$0x1] %v3434_v0  ;;  %3001 = vmatprep.subr.bf16.mxu0 %v3159_v2  ;;  %3019 = vmatprep.subr.bf16.mxu1 %v3162_v4  ;;  %v3165_v7 = vld [vmem:[#allocation7] sm:$0xff]   ;;  %v3167_v9 = vld [vmem:[%s3625_s30 + $0x48] sm:$0xff]  }
  0x62   : > { %368 = vst [vmem:[#allocation2 + $0xa8] sm:$0x1] %v3434_v0  ;;  %369 = vst [vmem:[#allocation2 + $0xc0] sm:$0x1] %v3434_v0  ;;  %3020 = vmatpush3.bf16.msra.mxu1 %v3162_v4  ;;  %v3166_v8 = vld [vmem:[%s3625_s30 + $0x40] sm:$0xff]   ;;  %v3170_v10 = vld [vmem:[%s3625_s30 + $0x50] sm:$0xff]  }
  0x63   : > { %370 = vst [vmem:[#allocation2 + $0xd8] sm:$0x1] %v3434_v0  ;;  %371 = vst [vmem:[#allocation2 + $0xf0] sm:$0x1] %v3434_v0  ;;  %3021 = vmatprep.subr.bf16.mxu1 %v3165_v7  ;;  %3023 = vmatprep.mubr.msk.bf16.mxu1 %vm479_vm0, %v3166_v8  ;;  %v3164_v11 = vld [vmem:[%s3625_s30 + $0x18] sm:$0xff]   ;;  %v3168_v12 = vld [vmem:[%s3625_s30 + $0x20] sm:$0xff]  }
  0x64   : > { %372 = vst [vmem:[#allocation2 + $0x108] sm:$0x1] %v3434_v0  ;;  %373 = vst [vmem:[#allocation2 + $0x120] sm:$0x1] %v3434_v0  ;;  %3002 = vmatpush3.bf16.msra.mxu0 %v3159_v2  ;;  %v3171_v13 = vld [vmem:[%s3625_s30 + $0x58] sm:$0xff]   ;;  %v3174_v14 = vld [vmem:[%s3625_s30 + $0x60] sm:$0xff]  }
  0x65   : > { %374 = vst [vmem:[#allocation2 + $0x138] sm:$0x1] %v3434_v0  ;;  %375 = vst [vmem:[#allocation2 + $0x150] sm:$0x1] %v3434_v0  ;;  %v3169_v15 = vld [vmem:[%s3625_s30 + $0x28] sm:$0xff]   ;;  %v3172_v16 = vld [vmem:[%s3625_s30 + $0x30] sm:$0xff]  }
  0x66   : > { %376 = vst [vmem:[#allocation2 + $0x168] sm:$0x1] %v3434_v0  ;;  %377 = vst [vmem:[#allocation2 + $0x180] sm:$0x1] %v3434_v0  ;;  %3022 = vmatpush3.bf16.msra.mxu1 %v3165_v7  ;;  %v3175_v17 = vld [vmem:[%s3625_s30 + $0x68] sm:$0xff]   ;;  %v3176_v18 = vld [vmem:[%s3625_s30 + $0x70] sm:$0xff]  }
  0x67   : > { %379 = vst [vmem:[#allocation2 + $0x11] sm:$0x1] %v3434_v0  ;;  %380 = vst [vmem:[#allocation2 + $0x29] sm:$0x1] %v3434_v0  ;;  %3004 = vmatmul.mubr.msk.bf16.vlgmr.msra.gmra.mxu0 %vm479_vm0, %v3161_v5  ;;  %v3173_v19 = vld [vmem:[%s3625_s30 + $0x38] sm:$0xff]   ;;  %v3435_v22 = vmov 0  }
  0x68   : > { %381 = vst [vmem:[#allocation2 + $0x41] sm:$0x1] %v3434_v0  ;;  %382 = vst [vmem:[#allocation2 + $0x59] sm:$0x1] %v3434_v0  ;;  %3007 = vmatprep.mubr.msk.bf16.mxu0 %vm479_vm0, %v3163_v6  ;;  %v3177_v20 = vld [vmem:[%s3625_s30 + $0x78] sm:$0xff]   ;;  %2453 = vmatprep.subr.bf16.mxu0 %v3435_v22  ;;  %v3179_v23 = vld [vmem:[#allocation10 + $0x30] sm:$0xff]  }
  0x69   : > { %383 = vst [vmem:[#allocation2 + $0x71] sm:$0x1] %v3434_v0  ;;  %384 = vst [vmem:[#allocation2 + $0x89] sm:$0x1] %v3434_v0  ;;  %3024 = vmatmul.mubr.msk.bf16.vlgmr.msra.gmra.mxu1 %vm479_vm0, %v3167_v9  ;;  %v3178_v21 = vld [vmem:[#allocation10 + $0x38] sm:$0xff]   ;;  %3039 = vmatprep.subr.bf16.mxu1 %v3435_v22  ;;  %v3180_v24 = vld [vmem:[#allocation10 + $0x28] sm:$0xff]  }
  0x6a   : > { %385 = vst [vmem:[#allocation2 + $0xa1] sm:$0x1] %v3434_v0  ;;  %386 = vst [vmem:[#allocation2 + $0xb9] sm:$0x1] %v3434_v0  ;;  %3027 = vmatprep.mubr.msk.bf16.mxu1 %vm479_vm0, %v3170_v10  ;;  %2454 = vmatpush1.bf16.msra.mxu0 %v3178_v21  ;;  %v3181_v25 = vld [vmem:[#allocation10 + $0x20] sm:$0xff]   ;;  %v3182_v26 = vld [vmem:[#allocation10 + $0x18] sm:$0xff]  }
  0x6b   : > { %387 = vst [vmem:[#allocation2 + $0xd1] sm:$0x1] %v3434_v0  ;;  %388 = vst [vmem:[#allocation2 + $0xe9] sm:$0x1] %v3434_v0  ;;  %3049 = vmatpush1.bf16.msra.mxu1 %v3178_v21  ;;  %2455 = vmatprep.subr.bf16.mxu0 %v3435_v22  ;;  %v3183_v27 = vld [vmem:[#allocation10 + $0x10] sm:$0xff]   ;;  %v925_v29 = vshrl.u32 %v924_v28, 7 }
  0x6c   : > { %389 = vst [vmem:[#allocation2 + $0x101] sm:$0x1] %v3434_v0  ;;  %390 = vst [vmem:[#allocation2 + $0x119] sm:$0x1] %v3434_v0  ;;  %3040 = vmatprep.subr.bf16.mxu1 %v3435_v22  ;;  %v3184_v31 = vld [vmem:[#allocation10 + $0x8] sm:$0xff]   ;;  %vm2109_vm1 = vcmask 257024  }
  0x6d   : > { %391 = vst [vmem:[#allocation2 + $0x131] sm:$0x1] %v3434_v0  ;;  %392 = vst [vmem:[#allocation2 + $0x149] sm:$0x1] %v3434_v0  ;;  %v926_v30 = vsub.s32 0, %v925_v29  ;;  %v978_v32 = vsub.s32 1, %v925_v29 }
  0x6e   : > { %393 = vst [vmem:[#allocation2 + $0x161] sm:$0x1] %v3434_v0  ;;  %394 = vst [vmem:[#allocation2 + $0x179] sm:$0x1] %v3434_v0  ;;  %2456 = vmatpush1.bf16.msra.mxu0 %v3179_v23  ;;  %v904_v33 = vld [vmem:[#allocation9] sm:$0x7] }
  0x6f   : > { %395 = vst [vmem:[#allocation2 + $0x191] sm:$0x1] %v3434_v0  ;;  %396 = vst [vmem:[#allocation2 + $0x1a9] sm:$0x1] %v3434_v0  ;;  %3008 = vmatmul.mubr.msk.bf16.gmra.mxu0 %vm479_vm0, %v3164_v11  ;;  %3050 = vmatpush1.bf16.msra.mxu1 %v3179_v23  ;;  %v3685_v34 = vrot.slane %v904_v33, %v926_v30  ;;  %v1030_v35 = vsub.s32 2, %v925_v29  ;;  %v3689_v37 = vrot.slane %v904_v33, %v978_v32  ;;  %s2793_s18 = sshll.u32 %s3621_s14, 8 }
  0x70   : > { %398 = vst [vmem:[#allocation2 + $0x8] sm:$0xff] %v3434_v0  ;;  %902 = vst [vmem:[#allocation2 + $0x1a0] sm:$0xff] %v3434_v0  ;;  %3011 = vmatprep.mubr.msk.bf16.mxu0 %vm479_vm0, %v3168_v12  ;;  %2457 = vmatprep.subr.bf16.mxu0 %v3435_v22  ;;  %v3694_v39 = vld [vmem:[%s4980_s2] ss:$0 sm:$0xff]  ;;  %v905_v48 = vld [vmem:[#allocation9 + $0x4] sm:$0x7] }
  0x71   : > { %397 = vst [vmem:[#allocation2] sm:$0xff] %v3434_v0  ;;  %399 = vst [vmem:[#allocation2 + $0x10] sm:$0xff] %v3434_v0  ;;  %3028 = vmatmul.mubr.msk.bf16.gmra.mxu1 %vm479_vm0, %v3171_v13  ;;  %3041 = vmatprep.subr.bf16.mxu1 %v3435_v22  ;;  %v928_v40 = vmul.f32 0.0, %v3685_v34  ;;  %v3698_v42 = vrot.slane %v904_v33, %v1030_v35  ;;  %v906_v53 = vld [vmem:[#allocation9 + $0x8] sm:$0x7]  ;;  %v3705_v57 = vrot.slane %v905_v48, %v978_v32  ;;  %s4858_s20 = scalar_lea.vmem [#allocation12], %s2793_s18 }
  0x72   : > { %901 = vst [vmem:[#allocation2 + $0x198] sm:$0xff] %v3434_v0  ;;  %903 = vst [vmem:[#allocation2 + $0x1a8] sm:$0xff] %v3434_v0  ;;  %3031 = vmatprep.mubr.msk.bf16.mxu1 %vm479_vm0, %v3174_v14  ;;  %2458 = vmatpush1.bf16.msra.mxu0 %v3180_v24  ;;  %v3709_v0 = vrot.slane %v905_v48, %v926_v30  ;;  %v3711_v1 = vrot.slane %v906_v53, %v926_v30  ;;  %s2978_s5 = sshll.u32 %s3418_s27, 12  ;;  %s2663_s21 = sshll.u32 %s4858_s20, 4  ;;  %s4928_s21 = int_to_ptr.vmem [resolvable:$true] %s2663_s21 }
  0x73   : > { %3051 = vmatpush1.bf16.msra.mxu1 %v3180_v24  ;;  %2459 = vmatprep.subr.bf16.mxu0 %v3435_v22  ;;  %5017 = vst [vmem:[#allocation17_spill] sm:$0xff] %v3689_v37  ;;  %5018 = vst [vmem:[#allocation18_spill] sm:$0xff] %v3694_v39  ;;  %v3713_v2 = vrot.slane %v906_v53, %v978_v32  ;;  %v3717_v7 = vrot.slane %v905_v48, %v1030_v35  ;;  %s4926_s3 = scalar_lea.hbm %s4985_s7, %s2978_s5  ;;  %s2647_s9 = scalar_lea.sflag [#allocation6], %s3621_s14 }
  0x74   : > { %3042 = vmatprep.subr.bf16.mxu1 %v3435_v22  ;;  %5019 = vst [vmem:[#allocation19_spill] sm:$0xff] %v3705_v57  ;;  %v3719_v8 = vrot.slane %v906_v53, %v1030_v35  ;;  %s3338_s27 = scalar_lea.vmem %s4928_s21, 4096  ;;  %p5170_p4 = scmp.ne.s32.totalorder %s5013_s8, 0 }
  0x75   : > { %5020 = vst [vmem:[#allocation20_spill] sm:$0xff] %v3713_v2  ;;  %p3339_p1 = scmp.ne.s32.totalorder %s4928_s21, %s3338_s27  ;;  %s3436_s11 = smov [#allocation12]  }
  0x76   : > { %2460 = vmatpush1.bf16.msra.mxu0 %v3181_v25  ;;  %s3342_s13 = sshll.u32 %s3436_s11, 4  ;;  %s3343_s13 = int_to_ptr.vmem [resolvable:$false] %s3342_s13 }
  0x77   : > { %3012 = vmatmul.mubr.msk.bf16.gmra.mxu0 %vm479_vm0, %v3169_v15  ;;  %3052 = vmatpush1.bf16.msra.mxu1 %v3181_v25  ;;  %p3340_p8 = pnand %p3339_p1, %p5170_p4  ;;  %s3344_s23 = scalar_lea.vmem %s3343_s13, 8192 }
  0x78   : > { %3015 = vmatprep.mubr.msk.bf16.mxu0 %vm479_vm0, %v3172_v16  ;;  %2461 = vmatprep.subr.bf16.mxu0 %v3435_v22  ;;  %v960_v36 = vld [vmem:[#allocation2 + $0x1] sm:$0xff]  ;;  %v961_v38 = vld [vmem:[#allocation2 + $0x9] sm:$0xff]  ;;  %p3345_p0 = scmp.lt.s32.totalorder %s4928_s21, %s3343_s13  ;;  %p3346_p3 = scmp.lt.s32.totalorder %s3344_s23, %s3338_s27 }
  0x79   : > { %3032 = vmatmul.mubr.msk.bf16.gmra.mxu1 %vm479_vm0, %v3175_v17  ;;  %3043 = vmatprep.subr.bf16.mxu1 %v3435_v22  ;;  %v980_v41 = vmul.f32 %v3689_v37, %v960_v36  ;;  %v1012_v43 = vld [vmem:[#allocation2 + $0x2] sm:$0xff]  ;;  %v981_v44 = vmul.f32 %v3689_v37, %v961_v38  ;;  %v1013_v46 = vld [vmem:[#allocation2 + $0xa] sm:$0xff]  ;;  %p3341_p13 = pneg %p3340_p8 }
  0x7a   : > { %3035 = vmatprep.mubr.msk.bf16.mxu1 %vm479_vm0, %v3176_v18  ;;  %2462 = vmatpush1.bf16.msra.mxu0 %v3182_v26  ;;  %v1032_v51 = vmul.f32 %v3698_v42, %v1012_v43  ;;  %v1033_v56 = vmul.f32 %v3698_v42, %v1013_v46  ;;  %p3347_p2 = por %p3346_p3, %p3345_p0 }
  0x7b   : > { %3053 = vmatpush1.bf16.msra.mxu1 %v3182_v26  ;;  %2463 = vmatprep.subr.bf16.mxu0 %v3435_v22  ;;  %v996_v50 = vadd.f32 %v980_v41, %v928_v40  ;;  %v997_v55 = vadd.f32 %v981_v44, %v928_v40 }
  0x7c   : > { %3044 = vmatprep.subr.bf16.mxu1 %v3435_v22  ;;  %p3348_p11 = pnand %p3347_p2, %p3341_p13 }
  0x7d   : > { %v3715_v3 = vadd.f32 %v1032_v51, %v996_v50  ;;  %v3721_v9 = vadd.f32 %v1033_v56, %v997_v55 }
  0x7e   : > { %2464 = vmatpush1.bf16.msra.mxu0 %v3183_v27 }
  0x7f   : > { %3016 = vmatmul.mubr.msk.bf16.gmra.mxu0 %vm479_vm0, %v3173_v19  ;;  %3054 = vmatpush1.bf16.msra.mxu1 %v3183_v27 }
  0x80   : > { %2465 = vmatprep.subr.bf16.mxu0 %v3435_v22  ;;  %3045 = vmatprep.subr.bf16.mxu1 %v3435_v22 }
  0x81   : > { %3036 = vmatmul.mubr.msk.bf16.gmra.mxu1 %vm479_vm0, %v3177_v20  ;;  %v3185_v20 = vld [vmem:[#allocation10] sm:$0xff]  }
  0x82   : > { %2466 = vmatpush1.bf16.msra.mxu0 %v3184_v31 }
  0x83   : > { %3055 = vmatpush1.bf16.msra.mxu1 %v3184_v31  ;;  %2467 = vmatprep.subr.bf16.mxu0 %v3435_v22 }
  0x84   : > { %3046 = vmatprep.subr.bf16.mxu1 %v3435_v22 }
  0x86   : > { %2468 = vmatpush1.bf16.msra.mxu0 %v3185_v20 }
  0x87   : > { %3056 = vmatpush1.bf16.msra.mxu1 %v3185_v20  ;;  %2481 = vmatprep.subr.bf16.mxu0 %v3435_v22 }
  0x88   : > { %3047 = vmatprep.subr.bf16.mxu1 %v3435_v22 }
 0x127   : > { %v3005_v45 = vpop.f32.mrf.mxu0 }
 0x128   : > { %v547_v47 = vadd.f32 %v3005_v45, %v3694_v39  ;;  %v3186_v45 = vld [vmem:[#allocation10 + $0x48] sm:$0xff]  }
 0x129   : > { %v538_v49 = vpop.f32.mrf.mxu0  ;;  %v3025_v59 = vpop.f32.mrf.mxu1  ;;  %2482 = vmatpush2.bf16.msra.mxu0 %v3186_v45  ;;  %3057 = vmatpush2.bf16.msra.mxu1 %v3186_v45 }
 0x12a   : > { %v603_v52 = vmax.f32 %v547_v47, 0.0  ;;  %v539_v54 = vadd.f32 %v3694_v39, %v538_v49  ;;  %v797_v63 = vadd.f32 %v3025_v59, %v3694_v39  ;;  %2483 = vmatprep.subr.bf16.mxu0 %v3435_v22  ;;  %3048 = vmatprep.subr.bf16.mxu1 %v3435_v22 }
 0x12b   : > { %v3006_v58 = vpop.f32.mrf.mxu0  ;;  %v788_v5 = vpop.f32.mrf.mxu1 }
 0x12c   : > { %v619_v60 = vmin.f32 %v603_v52, 6.0  ;;  %v601_v61 = vmax.f32 %v539_v54, 0.0  ;;  %v550_v62 = vadd.f32 %v3006_v58, %v3694_v39  ;;  %v853_v13 = vmax.f32 %v797_v63, 0.0 }
 0x12d   : > { %v541_v4 = vpop.f32.mrf.mxu0  ;;  %v3725_v14 = vadd.f32 %v3694_v39, %v788_v5  ;;  %v3026_v15 = vpop.f32.mrf.mxu1 }
 0x12e   : > { %636 = vst [vmem:[#allocation2 + $0x31] sm:$0xff] %v619_v60  ;;  %v617_v6 = vmin.f32 %v601_v61, 6.0  ;;  %v604_v10 = vmax.f32 %v550_v62, 0.0  ;;  %v542_v11 = vadd.f32 %v3694_v39, %v541_v4  ;;  %v984_v16 = vmul.f32 %v3689_v37, %v619_v60 }
 0x12f   : > { %v3009_v12 = vpop.f32.mrf.mxu0  ;;  %v3729_v17 = vmul.f32 %v3705_v57, %v619_v60  ;;  %v3733_v19 = vadd.f32 %v3026_v15, %v3694_v39  ;;  %v3736_v21 = vmul.f32 %v3713_v2, %v619_v60  ;;  %v869_v26 = vmin.f32 %v853_v13, 6.0  ;;  %v791_v27 = vpop.f32.mrf.mxu1 }
 0x130   : > { %634 = vst [vmem:[#allocation2 + $0x19] sm:$0xff] %v617_v6  ;;  %v563_v18 = vadd.f32 %v3009_v12, %v3694_v39  ;;  %v620_v23 = vmin.f32 %v604_v10, 6.0  ;;  %v602_v24 = vmax.f32 %v542_v11, 0.0  ;;  %v982_v28 = vmul.f32 %v3689_v37, %v617_v6 }
 0x131   : > { %v554_v25 = vpop.f32.mrf.mxu0  ;;  %v3740_v29 = vmul.f32 %v3705_v57, %v617_v6  ;;  %886 = vst [vmem:[#allocation2 + $0xf1] sm:$0xff] %v869_v26  ;;  %v851_v35 = vmax.f32 %v3725_v14, 0.0  ;;  %v3746_v38 = vadd.f32 %v3694_v39, %v791_v27  ;;  %v3760_v50 = vmul.f32 %v3689_v37, %v869_v26  ;;  %v3187_v6 = vld [vmem:[#allocation10 + $0x40] sm:$0xff]  }
 0x132   : > { %v607_v30 = vmax.f32 %v563_v18, 0.0  ;;  %v555_v31 = vadd.f32 %v3694_v39, %v554_v25  ;;  %637 = vst [vmem:[#allocation2 + $0x39] sm:$0xff] %v620_v23  ;;  %v618_v32 = vmin.f32 %v602_v24, 6.0  ;;  %v985_v40 = vmul.f32 %v3689_v37, %v620_v23  ;;  %2484 = vmatpush2.bf16.msra.mxu0 %v3187_v6  ;;  %3058 = vmatpush2.bf16.msra.mxu1 %v3187_v6 }
 0x133   : > { %v3010_v33 = vpop.f32.mrf.mxu0  ;;  %v3753_v47 = vmul.f32 %v3705_v57, %v620_v23  ;;  %v3756_v48 = vmul.f32 %v3713_v2, %v620_v23  ;;  %v3767_v54 = vmul.f32 %v3705_v57, %v869_v26  ;;  %v3770_v55 = vmul.f32 %v3713_v2, %v869_v26 }
 0x134   : > { %v623_v41 = vmin.f32 %v607_v30, 6.0  ;;  %v605_v43 = vmax.f32 %v555_v31, 0.0  ;;  %v566_v44 = vadd.f32 %v3010_v33, %v3694_v39  ;;  %635 = vst [vmem:[#allocation2 + $0x21] sm:$0xff] %v618_v32  ;;  %v983_v49 = vmul.f32 %v3689_v37, %v618_v32 }
 0x135   : > { %v912_v46 = vld [vmem:[#allocation2 + $0x30] sm:$0xff]  ;;  %v557_v51 = vpop.f32.mrf.mxu0  ;;  %v3764_v53 = vmul.f32 %v3705_v57, %v618_v32  ;;  %5021 = vst [vmem:[#allocation21_spill] sm:$0xff] %v3770_v55  ;;  %v3799_v23 = vmin.f32 %v851_v35, 6.0 }
 0x136   : > { %v932_v52 = vmul.f32 %v3685_v34, %v912_v46  ;;  %640 = vst [vmem:[#allocation2 + $0x61] sm:$0xff] %v623_v41  ;;  %v3773_v56 = vmul.f32 %v3709_v0, %v912_v46  ;;  %v3776_v58 = vmul.f32 %v3711_v1, %v912_v46  ;;  %v621_v60 = vmin.f32 %v605_v43, 6.0 }
 0x137   : > { %v910_v59 = vld [vmem:[#allocation2 + $0x18] sm:$0xff]  ;;  %v608_v61 = vmax.f32 %v566_v44, 0.0  ;;  %v3782_v5 = vadd.f32 %v3694_v39, %v557_v51  ;;  %v988_v10 = vmul.f32 %v3689_v37, %v623_v41  ;;  %v3787_v11 = vmul.f32 %v3705_v57, %v623_v41  ;;  %884 = vst [vmem:[#allocation2 + $0xd9] sm:$0xff] %v3799_v23 }
 0x138   : > { %v1000_v62 = vadd.f32 %v984_v16, %v932_v52  ;;  %v930_v63 = vmul.f32 %v3685_v34, %v910_v59  ;;  %v1084_v4 = vmul.f32 %v3709_v0, %v910_v59  ;;  %v3790_v12 = vmul.f32 %v3713_v2, %v623_v41  ;;  %638 = vst [vmem:[#allocation2 + $0x49] sm:$0xff] %v621_v60 }
 0x139   : > { %v3792_v13 = vmin.f32 %v608_v61, 6.0  ;;  %v913_v15 = vld [vmem:[#allocation2 + $0x38] sm:$0xff]  ;;  %v3796_v20 = vmul.f32 %v3689_v37, %v621_v60  ;;  %v1140_v22 = vmul.f32 %v3705_v57, %v621_v60  ;;  %v3804_v27 = vmul.f32 %v3713_v2, %v621_v60 }
 0x13a   : > { %v1100_v14 = vadd.f32 %v1084_v4, %v3715_v3  ;;  %v1016_v16 = vld [vmem:[#allocation2 + $0x32] sm:$0xff]  ;;  %v1017_v18 = vld [vmem:[#allocation2 + $0x3a] sm:$0xff]  ;;  %v998_v24 = vadd.f32 %v982_v28, %v930_v63  ;;  %v933_v25 = vmul.f32 %v3685_v34, %v913_v15  ;;  %v1087_v31 = vmul.f32 %v3709_v0, %v913_v15 }
 0x13b   : > { %v1036_v26 = vmul.f32 %v3698_v42, %v1016_v16  ;;  %641 = vst [vmem:[#allocation2 + $0x69] sm:$0xff] %v3792_v13  ;;  %v1037_v30 = vmul.f32 %v3698_v42, %v1017_v18  ;;  %v911_v32 = vld [vmem:[#allocation2 + $0x20] sm:$0xff]  ;;  %v1190_v43 = vmul.f32 %v3717_v7, %v1016_v16  ;;  %v3814_v44 = vmul.f32 %v3717_v7, %v1017_v18 }
 0x13c   : > { %v1152_v3 = vadd.f32 %v3740_v29, %v1100_v14  ;;  %v1014_v33 = vld [vmem:[#allocation2 + $0x1a] sm:$0xff]  ;;  %v1001_v35 = vadd.f32 %v985_v40, %v933_v25  ;;  %v1015_v45 = vld [vmem:[#allocation2 + $0x22] sm:$0xff]  ;;  %v1242_v29 = vmul.f32 %v3711_v1, %v913_v15  ;;  %v931_v51 = vmul.f32 %v3685_v34, %v911_v32 }
 0x13d   : > { %v1052_v41 = vadd.f32 %v1036_v26, %v1000_v62  ;;  %v916_v46 = vld [vmem:[#allocation2 + $0x60] sm:$0xff]  ;;  %v1034_v52 = vmul.f32 %v3698_v42, %v1014_v33  ;;  %v1085_v59 = vmul.f32 %v3709_v0, %v911_v32  ;;  %v1345_v40 = vmul.f32 %v3719_v8, %v1016_v16 }
 0x13e   : > { %v3820_v60 = vadd.f32 %v1037_v30, %v1001_v35  ;;  %v1188_v61 = vmul.f32 %v3717_v7, %v1014_v33  ;;  %v936_v62 = vmul.f32 %v3685_v34, %v916_v46  ;;  %v999_v63 = vadd.f32 %v983_v49, %v931_v51  ;;  %v3013_v35 = vpop.f32.mrf.mxu0 }
 0x13f   : > { %v1035_v4 = vmul.f32 %v3698_v42, %v1015_v45  ;;  %v1050_v6 = vadd.f32 %v1034_v52, %v998_v24  ;;  %v1101_v14 = vadd.f32 %v1085_v59, %v3721_v9  ;;  %v914_v15 = vld [vmem:[#allocation2 + $0x48] sm:$0xff]  ;;  %v1346_v25 = vmul.f32 %v3719_v8, %v1017_v18 }
 0x140   : > { %v1189_v26 = vmul.f32 %v3717_v7, %v1015_v45  ;;  %v1204_v32 = vadd.f32 %v1188_v61, %v1152_v3  ;;  %v1004_v30 = vadd.f32 %v988_v10, %v936_v62  ;;  %v1088_v49 = vmul.f32 %v3709_v0, %v914_v15 }
 0x141   : > { %v1051_v36 = vadd.f32 %v1035_v4, %v999_v63  ;;  %v1102_v16 = vadd.f32 %v3773_v56, %v1050_v6  ;;  %v1153_v33 = vadd.f32 %v3764_v53, %v1101_v14  ;;  %v3834_v9 = vmul.f32 %v3709_v0, %v916_v46 }
 0x142   : > { %v917_v51 = vld [vmem:[#allocation2 + $0x68] sm:$0xff]  ;;  %v1257_v24 = vadd.f32 %v3776_v58, %v1204_v32  ;;  %v3837_v18 = vmul.f32 %v3711_v1, %v916_v46  ;;  %v934_v45 = vmul.f32 %v3685_v34, %v914_v15  ;;  %v1104_v56 = vadd.f32 %v1088_v49, %v1052_v41  ;;  %v570_v46 = vpop.f32.mrf.mxu0 }
 0x143   : > { %v1020_v28 = vld [vmem:[#allocation2 + $0x62] sm:$0xff]  ;;  %v937_v10 = vmul.f32 %v3685_v34, %v917_v51  ;;  %v1205_v3 = vadd.f32 %v1189_v26, %v1153_v33  ;;  %v1154_v53 = vadd.f32 %v3729_v17, %v1102_v16  ;;  %v1021_v52 = vld [vmem:[#allocation2 + $0x6a] sm:$0xff]  ;;  %v1243_v61 = vmul.f32 %v3711_v1, %v914_v15 }
 0x144   : > { %v1309_v59 = vadd.f32 %v3736_v21, %v1257_v24  ;;  %v989_v58 = vmul.f32 %v3689_v37, %v3792_v13  ;;  %v1040_v62 = vmul.f32 %v3698_v42, %v1020_v28  ;;  %v1103_v63 = vadd.f32 %v1087_v31, %v1051_v36  ;;  %v1235_v24 = vld [vmem:[#allocation2 + $0xd8] sm:$0xff] }
 0x145   : > { %v1258_v4 = vadd.f32 %v1242_v29, %v1205_v3  ;;  %v3847_v6 = vadd.f32 %v1140_v22, %v1104_v56  ;;  %v1206_v14 = vadd.f32 %v1190_v43, %v1154_v53  ;;  %v1041_v17 = vmul.f32 %v3698_v42, %v1021_v52  ;;  %v3014_v29 = vpop.f32.mrf.mxu0 }
 0x146   : > { %v3849_v26 = vadd.f32 %v1345_v40, %v1309_v59  ;;  %v1005_v41 = vadd.f32 %v989_v58, %v937_v10  ;;  %v3852_v32 = vadd.f32 %v1040_v62, %v1004_v30  ;;  %v3856_v15 = vadd.f32 %v3796_v20, %v934_v45 }
 0x147   : > { %v1310_v21 = vadd.f32 %v3756_v48, %v1258_v4  ;;  %v1259_v16 = vadd.f32 %v1243_v61, %v1206_v14  ;;  %v3859_v33 = vmul.f32 %v3709_v0, %v917_v51  ;;  %v3865_v22 = vmul.f32 %v3705_v57, %v3792_v13  ;;  %v1516_v48 = vld [vmem:[#allocation2 + $0xf0] sm:$0xff] }
 0x148   : > { %5022 = vst [vmem:[#allocation22_spill] sm:$0xff] %v3849_v26  ;;  %v3861_v36 = vadd.f32 %v1041_v17, %v1005_v41  ;;  %v3868_v31 = vmul.f32 %v3717_v7, %v1020_v28  ;;  %v3871_v43 = vmul.f32 %v3717_v7, %v1021_v52  ;;  %v3876_v40 = vmul.f32 %v3711_v1, %v917_v51 }
 0x149   : > { %v3873_v20 = vadd.f32 %v1346_v25, %v1310_v21  ;;  %v3880_v30 = vmul.f32 %v3713_v2, %v3792_v13  ;;  %v1532_v49 = vmul.f32 %v1516_v48, %v3685_v34  ;;  %v3884_v10 = vadd.f32 %v3804_v27, %v1259_v16  ;;  %v3029_v21 = vpop.f32.mrf.mxu1 }
 0x14a   : > { %5023 = vst [vmem:[#allocation23_spill] sm:$0xff] %v3861_v36  ;;  %v3887_v3 = vmul.f32 %v3719_v8, %v1020_v28  ;;  %v5025_v45 = vmax.f32 %v3782_v5, 0.0  ;;  %v1155_v56 = vadd.f32 %v3753_v47, %v1103_v63  ;;  %v3893_v51 = vmul.f32 %v3719_v8, %v1021_v52 }
 0x14b   : > { %5024 = vst [vmem:[#allocation24_spill] sm:$0xff] %v3873_v20  ;;  %v3896_v13 = vadd.f32 %v3760_v50, %v1532_v49  ;;  %v3899_v53 = vmul.f32 %v1516_v48, %v3709_v0  ;;  %v3902_v27 = vmul.f32 %v1516_v48, %v3711_v1  ;;  %v3906_v5 = vmul.f32 %v3711_v1, %v1235_v24  ;;  %v573_v50 = vpop.f32.mrf.mxu0 }
 0x14c   : > { %v622_v25 = vmin.f32 %v5025_v45, 6.0  ;;  %v3910_v47 = vmul.f32 %v3713_v2, %v3799_v23  ;;  %v1530_v52 = vmul.f32 %v1235_v24, %v3685_v34  ;;  %v1207_v61 = vadd.f32 %v3814_v44, %v1155_v56 }
 0x14d   : > { %5026 = vst [vmem:[#allocation25_spill] sm:$0xff] %v3902_v27  ;;  %5027 = vst [vmem:[#allocation26_spill] sm:$0xff] %v3906_v5  ;;  %v1578_v58 = vmul.f32 %v3689_v37, %v3799_v23  ;;  %v579_v62 = vadd.f32 %v3013_v35, %v3694_v39  ;;  %v5029_v63 = vmax.f32 %v3733_v19, 0.0  ;;  %v571_v14 = vadd.f32 %v3694_v39, %v570_v46 }
 0x14e   : > { %639 = vst [vmem:[#allocation2 + $0x51] sm:$0xff] %v622_v25  ;;  %v987_v28 = vmul.f32 %v3689_v37, %v622_v25  ;;  %5028 = vst [vmem:[#allocation27_spill] sm:$0xff] %v3910_v47  ;;  %v1141_v59 = vmul.f32 %v3705_v57, %v622_v25  ;;  %v852_v41 = vmax.f32 %v3746_v38, 0.0  ;;  %v3923_v17 = vadd.f32 %v3014_v29, %v3694_v39  ;;  %v3017_v29 = vpop.f32.mrf.mxu0 }
 0x14f   : > { %v870_v4 = vmin.f32 %v5029_v63, 6.0  ;;  %v1296_v16 = vmul.f32 %v3713_v2, %v622_v25  ;;  %v611_v48 = vmax.f32 %v579_v62, 0.0  ;;  %v3927_v44 = vadd.f32 %v3694_v39, %v573_v50  ;;  %v804_v62 = vpop.f32.mrf.mxu1 }
 0x150   : > { %v3930_v49 = vadd.f32 %v3029_v21, %v3694_v39  ;;  %v3932_v35 = vadd.f32 %v1578_v58, %v1530_v52  ;;  %v3935_v19 = vmul.f32 %v1235_v24, %v3709_v0  ;;  %v3939_v38 = vmul.f32 %v3705_v57, %v3799_v23 }
 0x151   : > { %887 = vst [vmem:[#allocation2 + $0xf9] sm:$0xff] %v870_v4  ;;  %v609_v46 = vmax.f32 %v571_v14, 0.0  ;;  %v627_v45 = vmin.f32 %v611_v48, 6.0  ;;  %v1581_v25 = vmul.f32 %v3689_v37, %v870_v4  ;;  %v3943_v56 = vmul.f32 %v3705_v57, %v870_v4 }
 0x152   : > { %5030 = vst [vmem:[#allocation28_spill] sm:$0xff] %v3935_v19  ;;  %5031 = vst [vmem:[#allocation29_spill] sm:$0xff] %v3939_v38  ;;  %v3945_v50 = vmin.f32 %v852_v41, 6.0  ;;  %v3948_v52 = vmul.f32 %v3713_v2, %v870_v4  ;;  %v3958_v4 = vadd.f32 %v3017_v29, %v3694_v39 }
 0x153   : > { %5032 = vst [vmem:[#allocation30_spill] sm:$0xff] %v3943_v56  ;;  %v3950_v24 = vmin.f32 %v609_v46, 6.0  ;;  %644 = vst [vmem:[#allocation2 + $0x91] sm:$0xff] %v627_v45  ;;  %v992_v48 = vmul.f32 %v3689_v37, %v627_v45  ;;  %v3961_v46 = vadd.f32 %v3694_v39, %v804_v62  ;;  %v3974_v62 = vmul.f32 %v3713_v2, %v627_v45 }
 0x154   : > { %5033 = vst [vmem:[#allocation31_spill] sm:$0xff] %v3948_v52  ;;  %885 = vst [vmem:[#allocation2 + $0xe1] sm:$0xff] %v3945_v50  ;;  %v3967_v52 = vmul.f32 %v3705_v57, %v627_v45  ;;  %v3980_v19 = vmul.f32 %v3713_v2, %v3945_v50 }
 0x155   : > { %v915_v63 = vld [vmem:[#allocation2 + $0x50] sm:$0xff]  ;;  %642 = vst [vmem:[#allocation2 + $0x79] sm:$0xff] %v3950_v24  ;;  %5035 = vst [vmem:[#allocation33_spill] sm:$0xff] %v3974_v62 }
 0x156   : > { %v1018_v14 = vld [vmem:[#allocation2 + $0x4a] sm:$0xff]  ;;  %v1019_v21 = vld [vmem:[#allocation2 + $0x52] sm:$0xff]  ;;  %v935_v58 = vmul.f32 %v3685_v34, %v915_v63  ;;  %v1089_v47 = vmul.f32 %v3709_v0, %v915_v63  ;;  %5034 = vst [vmem:[#allocation32_spill] sm:$0xff] %v3967_v52  ;;  %v1244_v41 = vmul.f32 %v3711_v1, %v915_v63  ;;  %5036 = vst [vmem:[#allocation34_spill] sm:$0xff] %v3980_v19 }
 0x157   : > { %v1038_v23 = vmul.f32 %v3698_v42, %v1018_v14  ;;  %v1192_v55 = vmul.f32 %v3717_v7, %v1018_v14  ;;  %v1347_v29 = vmul.f32 %v3719_v8, %v1018_v14  ;;  %v1039_v27 = vmul.f32 %v3698_v42, %v1019_v21 }
 0x158   : > { %v1003_v5 = vadd.f32 %v987_v28, %v935_v58  ;;  %v1105_v38 = vadd.f32 %v1089_v47, %v3820_v60  ;;  %v1193_v20 = vmul.f32 %v3717_v7, %v1019_v21  ;;  %v1260_v52 = vadd.f32 %v1244_v41, %v1207_v61  ;;  %v1517_v14 = vld [vmem:[#allocation2 + $0xf8] sm:$0xff]  ;;  %v3988_v28 = vld [vmem:[%s4982_s4] ss:$0 sm:$0xff] }
 0x159   : > { %v1208_v26 = vadd.f32 %v1192_v55, %v3847_v6  ;;  %v1363_v63 = vadd.f32 %v1347_v29, %v3884_v10  ;;  %v1612_v36 = vld [vmem:[#allocation2 + $0xf2] sm:$0xff]  ;;  %v1613_v45 = vld [vmem:[#allocation2 + $0xfa] sm:$0xff]  ;;  %v1054_v60 = vadd.f32 %v1038_v23, %v3856_v15  ;;  %v1533_v19 = vmul.f32 %v1517_v14, %v3685_v34 }
 0x15a   : > { %v1055_v47 = vadd.f32 %v1039_v27, %v1003_v5  ;;  %v1157_v58 = vadd.f32 %v1141_v59, %v1105_v38  ;;  %v1312_v55 = vadd.f32 %v1296_v16, %v1260_v52  ;;  %v1348_v6 = vmul.f32 %v3719_v8, %v1019_v21  ;;  %v920_v41 = vld [vmem:[#allocation2 + $0x90] sm:$0xff] }
 0x15b   : > { %v1261_v62 = vadd.f32 %v3837_v18, %v1208_v26  ;;  %v1385_v10 = vadd.f32 %v3988_v28, %v1363_v63  ;;  %v1597_v29 = vadd.f32 %v1581_v25, %v1533_v19  ;;  %v1628_v56 = vmul.f32 %v1612_v36, %v3698_v42 }
 0x15c   : > { %v1209_v61 = vadd.f32 %v1193_v20, %v1157_v58  ;;  %v1629_v39 = vmul.f32 %v1613_v45, %v3698_v42  ;;  %v1364_v27 = vadd.f32 %v1348_v6, %v1312_v55  ;;  %v940_v59 = vmul.f32 %v3685_v34, %v920_v41  ;;  %v918_v52 = vld [vmem:[#allocation2 + $0x78] sm:$0xff]  ;;  %v1236_v55 = vld [vmem:[#allocation2 + $0xe0] sm:$0xff] }
 0x15d   : > { %v1313_v15 = vadd.f32 %v3790_v12, %v1261_v62  ;;  %v1401_v5 = vmax.f32 %v1385_v10, 0.0  ;;  %v1106_v18 = vadd.f32 %v3834_v9, %v1054_v60  ;;  %v1107_v26 = vadd.f32 %v3859_v33, %v1055_v47 }
 0x15e   : > { %v1262_v16 = vadd.f32 %v3876_v40, %v1209_v61  ;;  %v990_v20 = vmul.f32 %v3689_v37, %v3950_v24  ;;  %v1386_v38 = vadd.f32 %v3988_v28, %v1364_v27  ;;  %v4009_v12 = vmul.f32 %v3709_v0, %v920_v41 }
 0x15f   : > { %v4005_v19 = vadd.f32 %v3887_v3, %v1313_v15  ;;  %v1417_v25 = vmin.f32 %v1401_v5, 6.0  ;;  %v4012_v9 = vadd.f32 %v992_v48, %v940_v59  ;;  %v4015_v33 = vmul.f32 %v3711_v1, %v920_v41 }
 0x160   : > { %v1314_v23 = vadd.f32 %v3880_v30, %v1262_v16  ;;  %v4018_v40 = vadd.f32 %v1628_v56, %v3896_v13  ;;  %v1402_v21 = vmax.f32 %v1386_v38, 0.0  ;;  %v4020_v62 = vadd.f32 %v1629_v39, %v1597_v29  ;;  %v1340_v29 = vld [vmem:[#allocation2 + $0xe2] sm:$0xff] }
 0x161   : > { %5037 = vst [vmem:[#allocation35_spill] sm:$0xff] %v4005_v19  ;;  %v2948_v3 = vpack.c.bf16 %v1417_v25, %v1417_v25  ;;  %v1675_v63 = vmul.f32 %v1517_v14, %v3709_v0  ;;  %v4027_v47 = vmul.f32 %v1612_v36, %v3717_v7  ;;  %v4030_v30 = vmul.f32 %v1613_v45, %v3717_v7 }
 0x162   : > { %5038 = vst [vmem:[#allocation36_spill] sm:$0xff] %v4020_v62  ;;  %v4024_v60 = vadd.f32 %v3893_v51, %v1314_v23  ;;  %v938_v48 = vmul.f32 %v3685_v34, %v918_v52  ;;  %v1418_v58 = vmin.f32 %v1402_v21, 6.0  ;;  %v4034_v13 = vmul.f32 %v1517_v14, %v3711_v1  ;;  %v1339_v51 = vld [vmem:[#allocation2 + $0xda] sm:$0xff] }
 0x163   : > { %1497 = vst [vmem:[#allocation3 + $0x10] sm:$0xf] %v2948_v3  ;;  %v1092_v39 = vmul.f32 %v3709_v0, %v918_v52  ;;  %v1158_v56 = vadd.f32 %v3787_v11, %v1106_v18  ;;  %v4039_v6 = vmul.f32 %v1612_v36, %v3719_v8  ;;  %v4042_v10 = vmul.f32 %v1613_v45, %v3719_v8 }
 0x164   : > { %5039 = vst [vmem:[#allocation37_spill] sm:$0xff] %v4024_v60  ;;  %5040 = vst [vmem:[#allocation38_spill] sm:$0xff] %v4034_v13  ;;  %v4044_v61 = vadd.f32 %v990_v20, %v938_v48  ;;  %v1144_v41 = vmul.f32 %v3705_v57, %v3950_v24  ;;  %v2949_v14 = vpack.c.bf16 %v1418_v58, %v1418_v58  ;;  %v5048_v3 = vmax.f32 %v3923_v17, 0.0 }
 0x165   : > { %5041 = vst [vmem:[#allocation39_spill] sm:$0xff] %v4039_v6  ;;  %5042 = vst [vmem:[#allocation40_spill] sm:$0xff] %v4042_v10  ;;  %v1108_v15 = vadd.f32 %v1092_v39, %v3852_v32  ;;  %v1210_v27 = vadd.f32 %v3868_v31, %v1158_v56  ;;  %v1247_v11 = vmul.f32 %v3711_v1, %v918_v52  ;;  %v586_v52 = vpop.f32.mrf.mxu0  ;;  %v5049_v58 = vmax.f32 %v3927_v44, 0.0  ;;  %v3030_v56 = vpop.f32.mrf.mxu1 }
 0x166   : > { %v1299_v36 = vmul.f32 %v3713_v2, %v3950_v24  ;;  %v1531_v5 = vmul.f32 %v1236_v55, %v3685_v34  ;;  %v1579_v45 = vmul.f32 %v3689_v37, %v3945_v50  ;;  %v1626_v59 = vmul.f32 %v1339_v51, %v3698_v42  ;;  %1498 = vst [vmem:[#allocation3 + $0x18] sm:$0xf] %v2949_v14 }
 0x167   : > { %v4057_v18 = vadd.f32 %v1144_v41, %v1108_v15  ;;  %v1263_v16 = vadd.f32 %v1247_v11, %v1210_v27  ;;  %v4060_v32 = vmul.f32 %v3711_v1, %v1236_v55  ;;  %v1627_v31 = vmul.f32 %v1340_v29, %v3698_v42 }
 0x168   : > { %v4064_v20 = vmul.f32 %v3719_v8, %v1339_v51  ;;  %v4067_v24 = vmul.f32 %v3719_v8, %v1340_v29  ;;  %v1595_v38 = vadd.f32 %v1579_v45, %v1531_v5  ;;  %v1642_v25 = vadd.f32 %v1626_v59, %v3932_v35  ;;  %v807_v5 = vpop.f32.mrf.mxu1 }
 0x169   : > { %5043 = vst [vmem:[#allocation41_spill] sm:$0xff] %v4060_v32  ;;  %v4071_v23 = vmul.f32 %v1236_v55, %v3709_v0  ;;  %v4075_v21 = vmul.f32 %v3705_v57, %v3945_v50  ;;  %v628_v48 = vmin.f32 %v5048_v3, 6.0  ;;  %v626_v39 = vmin.f32 %v5049_v58, 6.0 }
 0x16a   : > { %5044 = vst [vmem:[#allocation42_spill] sm:$0xff] %v4064_v20  ;;  %5045 = vst [vmem:[#allocation43_spill] sm:$0xff] %v4067_v24  ;;  %v1643_v41 = vadd.f32 %v1627_v31, %v1595_v38  ;;  %v1690_v14 = vadd.f32 %v3899_v53, %v1642_v25  ;;  %v1159_v35 = vadd.f32 %v3865_v22, %v1107_v26  ;;  %v5050_v15 = vmax.f32 %v3930_v49, 0.0  ;;  %v3018_v26 = vpop.f32.mrf.mxu0 }
 0x16b   : > { %5046 = vst [vmem:[#allocation44_spill] sm:$0xff] %v4071_v23  ;;  %5047 = vst [vmem:[#allocation45_spill] sm:$0xff] %v4075_v21  ;;  %v4085_v27 = vadd.f32 %v1299_v36, %v1263_v16  ;;  %v4088_v50 = vmul.f32 %v1339_v51, %v3717_v7  ;;  %v4091_v17 = vmul.f32 %v1340_v29, %v3717_v7  ;;  %v855_v45 = vmax.f32 %v3961_v46, 0.0  ;;  %v5053_v16 = vld [vmem:[#allocation18_spill] sm:$0xff] }
 0x16c   : > { %v873_v55 = vmin.f32 %v5050_v15, 6.0  ;;  %645 = vst [vmem:[#allocation2 + $0x99] sm:$0xff] %v628_v48  ;;  %v993_v44 = vmul.f32 %v3689_v37, %v628_v48  ;;  %643 = vst [vmem:[#allocation2 + $0x81] sm:$0xff] %v626_v39  ;;  %v1691_v11 = vadd.f32 %v1675_v63, %v1643_v41  ;;  %v4095_v53 = vmul.f32 %v3705_v57, %v628_v48  ;;  %v5057_v41 = vld [vmem:[#allocation30_spill] sm:$0xff] }
 0x16d   : > { %5051 = vst [vmem:[#allocation46_spill] sm:$0xff] %v4088_v50  ;;  %5052 = vst [vmem:[#allocation47_spill] sm:$0xff] %v4091_v17  ;;  %v4098_v22 = vmul.f32 %v3713_v2, %v628_v48  ;;  %v991_v49 = vmul.f32 %v3689_v37, %v626_v39  ;;  %v4102_v51 = vmul.f32 %v3705_v57, %v626_v39  ;;  %v615_v63 = vmax.f32 %v3958_v4, 0.0 }
 0x16e   : > { %890 = vst [vmem:[#allocation2 + $0x121] sm:$0xff] %v873_v55  ;;  %v1211_v29 = vadd.f32 %v3871_v43, %v1159_v35  ;;  %v4106_v36 = vmul.f32 %v3713_v2, %v626_v39  ;;  %v1738_v59 = vadd.f32 %v3767_v54, %v1690_v14  ;;  %v587_v31 = vadd.f32 %v5053_v16, %v586_v52 }
 0x16f   : > { %v4113_v38 = vadd.f32 %v3030_v56, %v5053_v16  ;;  %v4116_v25 = vmul.f32 %v3689_v37, %v873_v55  ;;  %v4119_v43 = vmul.f32 %v3705_v57, %v873_v55  ;;  %v631_v3 = vmin.f32 %v615_v63, 6.0 }
 0x170   : > { %v4122_v48 = vadd.f32 %v3018_v26, %v5053_v16  ;;  %v4125_v4 = vmul.f32 %v3713_v2, %v873_v55  ;;  %v871_v46 = vmin.f32 %v855_v45, 6.0  ;;  %v613_v54 = vmax.f32 %v587_v31, 0.0 }
 0x171   : > { %5054 = vst [vmem:[#allocation18_spill] sm:$0xff] %v4119_v43  ;;  %v4128_v52 = vadd.f32 %v5053_v16, %v807_v5  ;;  %648 = vst [vmem:[#allocation2 + $0xc1] sm:$0xff] %v631_v3  ;;  %v4131_v58 = vmul.f32 %v3705_v57, %v631_v3  ;;  %v4134_v39 = vadd.f32 %v4027_v47, %v1738_v59 }
 0x172   : > { %5055 = vst [vmem:[#allocation48_spill] sm:$0xff] %v4125_v4  ;;  %v4138_v14 = vadd.f32 %v5057_v41, %v1691_v11  ;;  %v4141_v26 = vmul.f32 %v3713_v2, %v631_v3  ;;  %v4144_v63 = vmul.f32 %v3689_v37, %v631_v3  ;;  %888 = vst [vmem:[#allocation2 + $0x109] sm:$0xff] %v871_v46  ;;  %v4146_v5 = vmin.f32 %v613_v54, 6.0  ;;  %v5060_v4 = vld [vmem:[#allocation23_spill] sm:$0xff] }
 0x173   : > { %5056 = vst [vmem:[#allocation49_spill] sm:$0xff] %v4131_v58  ;;  %v921_v35 = vld [vmem:[#allocation2 + $0x98] sm:$0xff]  ;;  %v919_v11 = vld [vmem:[#allocation2 + $0x80] sm:$0xff]  ;;  %v4152_v41 = vmul.f32 %v3689_v37, %v871_v46  ;;  %v4155_v56 = vmul.f32 %v3705_v57, %v871_v46  ;;  %v4163_v20 = vmul.f32 %v3713_v2, %v871_v46 }
 0x174   : > { %v1024_v15 = vld [vmem:[#allocation2 + $0x92] sm:$0xff]  ;;  %v1025_v55 = vld [vmem:[#allocation2 + $0x9a] sm:$0xff]  ;;  %5058 = vst [vmem:[#allocation30_spill] sm:$0xff] %v4141_v26  ;;  %v941_v45 = vmul.f32 %v3685_v34, %v921_v35  ;;  %v1095_v24 = vmul.f32 %v3709_v0, %v921_v35  ;;  %v1023_v47 = vld [vmem:[#allocation2 + $0x82] sm:$0xff]  ;;  %v1250_v6 = vmul.f32 %v3711_v1, %v921_v35  ;;  %v939_v19 = vmul.f32 %v3685_v34, %v919_v11 }
 0x175   : > { %v1044_v59 = vmul.f32 %v3698_v42, %v1024_v15  ;;  %v1022_v31 = vld [vmem:[#allocation2 + $0x7a] sm:$0xff]  ;;  %v1045_v3 = vmul.f32 %v3698_v42, %v1025_v55  ;;  %v4160_v54 = vmul.f32 %v3717_v7, %v1024_v15  ;;  %646 = vst [vmem:[#allocation2 + $0xa9] sm:$0xff] %v4146_v5  ;;  %v4167_v10 = vmul.f32 %v3717_v7, %v1025_v55 }
 0x176   : > { %v1353_v60 = vmul.f32 %v3719_v8, %v1024_v15  ;;  %v1009_v43 = vadd.f32 %v993_v44, %v941_v45  ;;  %v1042_v32 = vmul.f32 %v3698_v42, %v1022_v31  ;;  %v1093_v13 = vmul.f32 %v3709_v0, %v919_v11  ;;  %v1520_v45 = vld [vmem:[#allocation2 + $0x120] sm:$0xff] }
 0x177   : > { %5059 = vst [vmem:[#allocation50_spill] sm:$0xff] %v4167_v10  ;;  %v1196_v26 = vmul.f32 %v3717_v7, %v1022_v31  ;;  %v1060_v46 = vadd.f32 %v1044_v59, %v4012_v9  ;;  %v1007_v58 = vadd.f32 %v991_v49, %v939_v19  ;;  %v1043_v17 = vmul.f32 %v3698_v42, %v1023_v47 }
 0x178   : > { %v1248_v50 = vmul.f32 %v3711_v1, %v919_v11  ;;  %v1058_v35 = vadd.f32 %v1042_v32, %v4044_v61  ;;  %v1109_v15 = vadd.f32 %v1093_v13, %v5060_v4  ;;  %v1351_v44 = vmul.f32 %v3719_v8, %v1022_v31  ;;  %v1078_v13 = vld [vmem:[#allocation2 + $0xc0] sm:$0xff] }
 0x179   : > { %v1212_v21 = vadd.f32 %v1196_v26, %v4057_v18  ;;  %v1354_v23 = vmul.f32 %v3719_v8, %v1025_v55  ;;  %v1059_v62 = vadd.f32 %v1043_v17, %v1007_v58  ;;  %v1536_v9 = vmul.f32 %v1520_v45, %v3685_v34  ;;  %v5061_v58 = vld [vmem:[#allocation33_spill] sm:$0xff]  ;;  %v1518_v26 = vld [vmem:[#allocation2 + $0x108] sm:$0xff] }
 0x17a   : > { %v1264_v10 = vadd.f32 %v1248_v50, %v1211_v29  ;;  %v1161_v19 = vadd.f32 %v4102_v51, %v1109_v15  ;;  %v1197_v49 = vmul.f32 %v3717_v7, %v1023_v47  ;;  %v1367_v61 = vadd.f32 %v1351_v44, %v4085_v27 }
 0x17b   : > { %v1265_v59 = vadd.f32 %v4015_v33, %v1212_v21  ;;  %v4188_v32 = vadd.f32 %v1045_v3, %v1009_v43  ;;  %v1110_v18 = vadd.f32 %v4009_v12, %v1058_v35  ;;  %v1352_v17 = vmul.f32 %v3719_v8, %v1023_v47 }
 0x17c   : > { %v1316_v4 = vadd.f32 %v4106_v36, %v1264_v10  ;;  %v4193_v50 = vadd.f32 %v1095_v24, %v1059_v62  ;;  %v1213_v29 = vadd.f32 %v1197_v49, %v1161_v19  ;;  %v1389_v55 = vadd.f32 %v3988_v28, %v1367_v61  ;;  %v3033_v10 = vpop.f32.mrf.mxu1  ;;  %v922_v3 = vld [vmem:[#allocation2 + $0xa8] sm:$0xff] }
 0x17d   : > { %v1317_v51 = vadd.f32 %v5061_v58, %v1265_v59  ;;  %v4198_v21 = vadd.f32 %v4116_v25, %v1536_v9  ;;  %v4201_v27 = vmul.f32 %v1520_v45, %v3709_v0  ;;  %v1528_v12 = vmul.f32 %v1078_v13, %v3685_v34 }
 0x17e   : > { %v1368_v33 = vadd.f32 %v1352_v17, %v1316_v4  ;;  %v1266_v36 = vadd.f32 %v1250_v6, %v1213_v29  ;;  %v1405_v43 = vmax.f32 %v1389_v55, 0.0  ;;  %v4205_v62 = vmul.f32 %v1520_v45, %v3711_v1  ;;  %v820_v59 = vpop.f32.mrf.mxu1 }
 0x17f   : > { %v1534_v24 = vmul.f32 %v1518_v26, %v3685_v34  ;;  %v4210_v11 = vmul.f32 %v3709_v0, %v1078_v13  ;;  %v1676_v25 = vmul.f32 %v1518_v26, %v3709_v0  ;;  %v1819_v31 = vmul.f32 %v1518_v26, %v3711_v1 }
 0x180   : > { %v1390_v47 = vadd.f32 %v3988_v28, %v1368_v33  ;;  %v1318_v35 = vadd.f32 %v4098_v22, %v1266_v36  ;;  %v4215_v15 = vadd.f32 %v1353_v60, %v1317_v51  ;;  %v1421_v6 = vmin.f32 %v1405_v43, 6.0  ;;  %v5064_v51 = vld [vmem:[#allocation32_spill] sm:$0xff]  ;;  %v3034_v43 = vpop.f32.mrf.mxu1 }
 0x181   : > { %v4218_v44 = vmul.f32 %v3711_v1, %v1078_v13  ;;  %v4221_v9 = vadd.f32 %v4144_v63, %v1528_v12  ;;  %v1692_v19 = vadd.f32 %v1676_v25, %v4018_v40  ;;  %v1835_v49 = vadd.f32 %v1819_v31, %v4134_v39  ;;  %v589_v63 = vpop.f32.mrf.mxu0 }
 0x182   : > { %5062 = vst [vmem:[#allocation23_spill] sm:$0xff] %v4215_v15  ;;  %v1406_v45 = vmax.f32 %v1390_v47, 0.0  ;;  %v2952_v61 = vpack.c.bf16 %v1421_v6, %v1421_v6  ;;  %v4226_v4 = vadd.f32 %v4152_v41, %v1534_v24  ;;  %v942_v60 = vmul.f32 %v3685_v34, %v922_v3 }
 0x183   : > { %v1096_v22 = vmul.f32 %v3709_v0, %v922_v3  ;;  %v4230_v17 = vadd.f32 %v1354_v23, %v1318_v35  ;;  %v4233_v29 = vadd.f32 %v4155_v56, %v1692_v19  ;;  %v994_v40 = vmul.f32 %v3689_v37, %v4146_v5  ;;  %v823_v19 = vpop.f32.mrf.mxu1 }
 0x184   : > { %v1422_v13 = vmin.f32 %v1406_v45, 6.0  ;;  %1501 = vst [vmem:[#allocation3 + $0x30] sm:$0xf] %v2952_v61  ;;  %v4238_v39 = vadd.f32 %v4163_v20, %v1835_v49  ;;  %v1148_v58 = vmul.f32 %v3705_v57, %v4146_v5  ;;  %v1162_v55 = vadd.f32 %v5064_v51, %v1110_v18 }
 0x185   : > { %5063 = vst [vmem:[#allocation33_spill] sm:$0xff] %v4230_v17  ;;  %v1112_v41 = vadd.f32 %v1096_v22, %v1060_v46  ;;  %v5065_v26 = vmax.f32 %v4113_v38, 0.0  ;;  %v5066_v56 = vmax.f32 %v4122_v48, 0.0  ;;  %v856_v36 = vmax.f32 %v4128_v52, 0.0 }
 0x186   : > { %v2953_v23 = vpack.c.bf16 %v1422_v13, %v1422_v13  ;;  %v1214_v20 = vadd.f32 %v4160_v54, %v1162_v55  ;;  %v1251_v46 = vmul.f32 %v3711_v1, %v922_v3  ;;  %v590_v47 = vadd.f32 %v5053_v16, %v589_v63  ;;  %v3037_v63 = vpop.f32.mrf.mxu1 }
 0x187   : > { %v874_v33 = vmin.f32 %v5065_v26, 6.0  ;;  %v632_v12 = vmin.f32 %v5066_v56, 6.0  ;;  %v4248_v24 = vadd.f32 %v1148_v58, %v1112_v41  ;;  %v4253_v18 = vadd.f32 %v994_v40, %v942_v60  ;;  %v5071_v41 = vld [vmem:[#allocation50_spill] sm:$0xff] }
 0x188   : > { %1502 = vst [vmem:[#allocation3 + $0x38] sm:$0xf] %v2953_v23  ;;  %v1303_v38 = vmul.f32 %v3713_v2, %v4146_v5  ;;  %v4260_v52 = vadd.f32 %v4030_v30, %v4138_v14  ;;  %v1267_v25 = vadd.f32 %v1251_v46, %v1214_v20  ;;  %v872_v3 = vmin.f32 %v856_v36, 6.0  ;;  %v5073_v23 = vld [vmem:[#allocation22_spill] sm:$0xff] }
 0x189   : > { %891 = vst [vmem:[#allocation2 + $0x129] sm:$0xff] %v874_v33  ;;  %v1585_v48 = vmul.f32 %v3689_v37, %v874_v33  ;;  %649 = vst [vmem:[#allocation2 + $0xc9] sm:$0xff] %v632_v12  ;;  %v4263_v54 = vmul.f32 %v3705_v57, %v874_v33  ;;  %v4266_v31 = vmul.f32 %v3713_v2, %v874_v33  ;;  %v614_v35 = vmax.f32 %v590_v47, 0.0 }
 0x18a   : > { %v1163_v5 = vadd.f32 %v4095_v53, %v4193_v50  ;;  %v829_v6 = vadd.f32 %v3033_v10, %v5053_v16  ;;  %v821_v45 = vadd.f32 %v5053_v16, %v820_v59  ;;  %v4272_v49 = vadd.f32 %v1303_v38, %v1267_v25  ;;  %889 = vst [vmem:[#allocation2 + $0x111] sm:$0xff] %v872_v3 }
 0x18b   : > { %5067 = vst [vmem:[#allocation32_spill] sm:$0xff] %v4263_v54  ;;  %v4275_v30 = vmul.f32 %v3705_v57, %v632_v12  ;;  %v4278_v14 = vmul.f32 %v3713_v2, %v632_v12  ;;  %v1577_v61 = vmul.f32 %v3689_v37, %v632_v12  ;;  %v1583_v60 = vmul.f32 %v3689_v37, %v872_v3 }
 0x18c   : > { %v630_v22 = vmin.f32 %v614_v35, 6.0  ;;  %v861_v53 = vmax.f32 %v829_v6, 0.0  ;;  %v859_v50 = vmax.f32 %v821_v45, 0.0  ;;  %v4283_v10 = vmul.f32 %v3705_v57, %v872_v3 }
 0x18d   : > { %5068 = vst [vmem:[#allocation51_spill] sm:$0xff] %v4278_v14  ;;  %v4286_v59 = vmul.f32 %v3713_v2, %v872_v3  ;;  %v4289_v13 = vadd.f32 %v3034_v43, %v5053_v16  ;;  %v4292_v40 = vadd.f32 %v5053_v16, %v823_v19  ;;  %v4295_v58 = vadd.f32 %v5071_v41, %v1163_v5 }
 0x18e   : > { %647 = vst [vmem:[#allocation2 + $0xb1] sm:$0xff] %v630_v22  ;;  %v4297_v51 = vmin.f32 %v861_v53, 6.0  ;;  %v4300_v55 = vadd.f32 %v3037_v63, %v5053_v16  ;;  %v4304_v26 = vadd.f32 %v3988_v28, %v5073_v23  ;;  %v4307_v12 = vmul.f32 %v3689_v37, %v630_v22 }
 0x18f   : > { %5069 = vst [vmem:[#allocation52_spill] sm:$0xff] %v4289_v13  ;;  %5070 = vst [vmem:[#allocation53_spill] sm:$0xff] %v4292_v40  ;;  %v4310_v36 = vmul.f32 %v3705_v57, %v630_v22  ;;  %v4313_v43 = vmul.f32 %v3713_v2, %v630_v22  ;;  %v4315_v20 = vmin.f32 %v859_v50, 6.0  ;;  %v5078_v22 = vld [vmem:[#allocation24_spill] sm:$0xff] }
 0x190   : > { %5072 = vst [vmem:[#allocation50_spill] sm:$0xff] %v4300_v55  ;;  %5074 = vst [vmem:[#allocation22_spill] sm:$0xff] %v4304_v26  ;;  %v1521_v33 = vld [vmem:[#allocation2 + $0x128] sm:$0xff]  ;;  %v4330_v53 = vadd.f32 %v3988_v28, %v5078_v22  ;;  %v5085_v57 = vld [vmem:[#allocation28_spill] sm:$0xff] }
 0x191   : > { %v1616_v56 = vld [vmem:[#allocation2 + $0x122] sm:$0xff]  ;;  %5075 = vst [vmem:[#allocation54_spill] sm:$0xff] %v4313_v43  ;;  %5076 = vst [vmem:[#allocation55_spill] sm:$0xff] %v4315_v20  ;;  %v1537_v16 = vmul.f32 %v1521_v33, %v3685_v34  ;;  %v1617_v46 = vld [vmem:[#allocation2 + $0x12a] sm:$0xff]  ;;  %v1679_v6 = vmul.f32 %v1521_v33, %v3709_v0  ;;  %v1822_v41 = vmul.f32 %v1521_v33, %v3711_v1 }
 0x192   : > { %v1632_v47 = vmul.f32 %v1616_v56, %v3698_v42  ;;  %v1079_v38 = vld [vmem:[#allocation2 + $0xc8] sm:$0xff]  ;;  %894 = vst [vmem:[#allocation2 + $0x151] sm:$0xff] %v4297_v51  ;;  %v1633_v5 = vmul.f32 %v1617_v46, %v3698_v42  ;;  %v4325_v45 = vmul.f32 %v1616_v56, %v3717_v7  ;;  %892 = vst [vmem:[#allocation2 + $0x139] sm:$0xff] %v4315_v20 }
 0x193   : > { %v1182_v25 = vld [vmem:[#allocation2 + $0xc2] sm:$0xff]  ;;  %v1183_v19 = vld [vmem:[#allocation2 + $0xca] sm:$0xff]  ;;  %5079 = vst [vmem:[#allocation24_spill] sm:$0xff] %v4330_v53  ;;  %v1601_v50 = vadd.f32 %v1585_v48, %v1537_v16  ;;  %v4333_v63 = vmul.f32 %v1617_v46, %v3717_v7  ;;  %v4337_v23 = vmul.f32 %v1616_v56, %v3719_v8  ;;  %v4343_v3 = vmul.f32 %v1617_v46, %v3719_v8  ;;  %v1615_v46 = vld [vmem:[#allocation2 + $0x112] sm:$0xff] }
 0x194   : > { %5077 = vst [vmem:[#allocation56_spill] sm:$0xff] %v4325_v45  ;;  %v4340_v35 = vadd.f32 %v1632_v47, %v4198_v21  ;;  %v4346_v17 = vmul.f32 %v3709_v0, %v1079_v38  ;;  %v4349_v22 = vmul.f32 %v3717_v7, %v1182_v25  ;;  %v1519_v48 = vld [vmem:[#allocation2 + $0x110] sm:$0xff]  ;;  %v4352_v15 = vmul.f32 %v3717_v7, %v1183_v19 }
 0x195   : > { %5080 = vst [vmem:[#allocation57_spill] sm:$0xff] %v4333_v63  ;;  %5081 = vst [vmem:[#allocation58_spill] sm:$0xff] %v4337_v23  ;;  %v1614_v16 = vld [vmem:[#allocation2 + $0x10a] sm:$0xff]  ;;  %v4355_v33 = vmul.f32 %v3711_v1, %v1079_v38  ;;  %v1529_v21 = vmul.f32 %v1079_v38, %v3685_v34  ;;  %v1624_v56 = vmul.f32 %v1182_v25, %v3698_v42 }
 0x196   : > { %5082 = vst [vmem:[#allocation59_spill] sm:$0xff] %v4340_v35  ;;  %5083 = vst [vmem:[#allocation60_spill] sm:$0xff] %v4343_v3  ;;  %v1625_v47 = vmul.f32 %v1183_v19, %v3698_v42  ;;  %v1535_v63 = vmul.f32 %v1519_v48, %v3685_v34  ;;  %v1630_v53 = vmul.f32 %v1614_v16, %v3698_v42  ;;  %v5086_v3 = vld [vmem:[#allocation36_spill] sm:$0xff] }
 0x197   : > { %v1631_v54 = vmul.f32 %v1615_v46, %v3698_v42  ;;  %v1593_v26 = vadd.f32 %v1577_v61, %v1529_v21  ;;  %v1640_v55 = vadd.f32 %v1624_v56, %v4221_v9  ;;  %v1677_v40 = vmul.f32 %v1519_v48, %v3709_v0 }
 0x198   : > { %v1772_v13 = vmul.f32 %v1614_v16, %v3717_v7  ;;  %v4367_v38 = vmul.f32 %v3719_v8, %v1182_v25  ;;  %v1599_v45 = vadd.f32 %v1583_v60, %v1535_v63  ;;  %v1773_v35 = vmul.f32 %v1615_v46, %v3717_v7  ;;  %v5088_v63 = vld [vmem:[#allocation29_spill] sm:$0xff] }
 0x199   : > { %v1820_v2 = vmul.f32 %v1519_v48, %v3711_v1  ;;  %v1641_v20 = vadd.f32 %v1625_v47, %v1593_v26  ;;  %v1688_v14 = vadd.f32 %v5085_v57, %v1640_v55  ;;  %v1693_v23 = vadd.f32 %v1677_v40, %v5086_v3  ;;  %v923_v57 = vld [vmem:[#allocation2 + $0xb0] sm:$0xff] }
 0x19a   : > { %5084 = vst [vmem:[#allocation61_spill] sm:$0xff] %v4367_v38  ;;  %v1788_v61 = vadd.f32 %v1772_v13, %v4233_v29  ;;  %v1646_v9 = vadd.f32 %v1630_v53, %v4226_v4  ;;  %v1647_v21 = vadd.f32 %v1631_v54, %v1599_v45  ;;  %v1915_v25 = vmul.f32 %v1614_v16, %v3719_v8  ;;  %v5087_v38 = vld [vmem:[#allocation44_spill] sm:$0xff]  ;;  %v1026_v55 = vld [vmem:[#allocation2 + $0xaa] sm:$0xff]  ;;  %v5090_v54 = vld [vmem:[#allocation45_spill] sm:$0xff] }
 0x19b   : > { %v1836_v56 = vadd.f32 %v1820_v2, %v4260_v52  ;;  %v1689_v60 = vadd.f32 %v5087_v38, %v1641_v20  ;;  %v1736_v43 = vadd.f32 %v5088_v63, %v1688_v14  ;;  %v1741_v48 = vadd.f32 %v4283_v10, %v1693_v23  ;;  %v5091_v20 = vld [vmem:[#allocation48_spill] sm:$0xff]  ;;  %v5092_v53 = vld [vmem:[#allocation46_spill] sm:$0xff]  ;;  %v5093_v38 = vld [vmem:[#allocation47_spill] sm:$0xff] }
 0x19c   : > { %v1837_v26 = vadd.f32 %v4205_v62, %v1788_v61  ;;  %v4381_v40 = vadd.f32 %v1633_v5, %v1601_v50  ;;  %v1916_v4 = vmul.f32 %v1615_v46, %v3719_v8  ;;  %v1931_v2 = vadd.f32 %v1915_v25, %v4238_v39  ;;  %v1027_v3 = vld [vmem:[#allocation2 + $0xb2] sm:$0xff] }
 0x19d   : > { %v1884_v29 = vadd.f32 %v4286_v59, %v1836_v56  ;;  %v4387_v52 = vmul.f32 %v3719_v8, %v1183_v19  ;;  %v1737_v13 = vadd.f32 %v5090_v54, %v1689_v60  ;;  %v1789_v14 = vadd.f32 %v1773_v35, %v1741_v48 }
 0x19e   : > { %5089 = vst [vmem:[#allocation28_spill] sm:$0xff] %v4381_v40  ;;  %v1885_v10 = vadd.f32 %v5091_v20, %v1837_v26  ;;  %v1947_v45 = vadd.f32 %v3988_v28, %v1931_v2  ;;  %v943_v5 = vmul.f32 %v3685_v34, %v923_v57  ;;  %v1046_v59 = vmul.f32 %v3698_v42, %v1026_v55  ;;  %v5096_v2 = vld [vmem:[#allocation49_spill] sm:$0xff] }
 0x19f   : > { %v1932_v62 = vadd.f32 %v1916_v4, %v1884_v29  ;;  %v1784_v50 = vadd.f32 %v5092_v53, %v1736_v43  ;;  %v4396_v39 = vadd.f32 %v4201_v27, %v1646_v9  ;;  %v4398_v19 = vadd.f32 %v1679_v6, %v1647_v21  ;;  %v5094_v21 = vld [vmem:[#allocation25_spill] sm:$0xff] }
 0x1a0   : > { %v1838_v23 = vadd.f32 %v1822_v41, %v1789_v14  ;;  %v1963_v16 = vmax.f32 %v1947_v45, 0.0  ;;  %v1011_v46 = vadd.f32 %v4307_v12, %v943_v5  ;;  %v1047_v47 = vmul.f32 %v3698_v42, %v1027_v3  ;;  %v1524_v5 = vld [vmem:[#allocation2 + $0x150] sm:$0xff] }
 0x1a1   : > { %v1948_v35 = vadd.f32 %v3988_v28, %v1932_v62  ;;  %v1785_v61 = vadd.f32 %v5093_v38, %v1737_v13  ;;  %v1062_v25 = vadd.f32 %v1046_v59, %v4253_v18  ;;  %v1097_v43 = vmul.f32 %v3709_v0, %v923_v57  ;;  %v5107_v38 = vld [vmem:[#allocation41_spill] sm:$0xff] }
 0x1a2   : > { %v1886_v56 = vadd.f32 %v4266_v31, %v1838_v23  ;;  %v1979_v9 = vmin.f32 %v1963_v16, 6.0  ;;  %v1063_v6 = vadd.f32 %v1047_v47, %v1011_v46  ;;  %v1200_v41 = vmul.f32 %v3717_v7, %v1026_v55  ;;  %v5101_v23 = vld [vmem:[#allocation38_spill] sm:$0xff]  ;;  %v5105_v46 = vld [vmem:[#allocation60_spill] sm:$0xff] }
 0x1a3   : > { %v1964_v27 = vmax.f32 %v1948_v35, 0.0  ;;  %v4409_v60 = vadd.f32 %v5094_v21, %v1784_v50  ;;  %v1113_v12 = vadd.f32 %v1097_v43, %v4188_v32  ;;  %v1114_v63 = vadd.f32 %v4210_v11, %v1062_v25  ;;  %v5109_v43 = vld [vmem:[#allocation51_spill] sm:$0xff] }
 0x1a4   : > { %v1201_v48 = vmul.f32 %v3717_v7, %v1027_v3  ;;  %v2964_v31 = vpack.c.bf16 %v1979_v9, %v1979_v9  ;;  %v1115_v18 = vadd.f32 %v4346_v17, %v1063_v6  ;;  %v1216_v29 = vadd.f32 %v1200_v41, %v4248_v24  ;;  %v5110_v6 = vld [vmem:[#allocation61_spill] sm:$0xff] }
 0x1a5   : > { %5095 = vst [vmem:[#allocation36_spill] sm:$0xff] %v4409_v60  ;;  %v1980_v26 = vmin.f32 %v1964_v27, 6.0  ;;  %v1165_v4 = vadd.f32 %v4310_v36, %v1113_v12  ;;  %v1166_v54 = vadd.f32 %v5096_v2, %v1114_v63  ;;  %v1252_v13 = vmul.f32 %v3711_v1, %v923_v57  ;;  %v4453_v12 = vpop.f32.mrf.mxu1  ;;  %v2105_v60 = vld [vmem:[%s3625_s30 + $0x70] sm:$0xf] }
 0x1a6   : > { %v1355_v14 = vmul.f32 %v3719_v8, %v1026_v55  ;;  %2059 = vst [vmem:[#allocation3 + $0x90] sm:$0xf] %v2964_v31  ;;  %v1167_v32 = vadd.f32 %v4275_v30, %v1115_v18  ;;  %v1269_v11 = vadd.f32 %v4218_v44, %v1216_v29  ;;  %v1356_v62 = vmul.f32 %v3719_v8, %v1027_v3  ;;  %v5097_v55 = vld [vmem:[#allocation30_spill] sm:$0xff] }
 0x1a7   : > { %v2965_v20 = vpack.c.bf16 %v1980_v26, %v1980_v26  ;;  %v1217_v45 = vadd.f32 %v1201_v48, %v1165_v4  ;;  %v1218_v17 = vadd.f32 %v4349_v22, %v1166_v54  ;;  %v1268_v24 = vadd.f32 %v1252_v13, %v4295_v58  ;;  %v5098_v3 = vld [vmem:[#allocation26_spill] sm:$0xff]  ;;  %v5117_v4 = vld [vmem:[#allocation55_spill] sm:$0xff]  ;;  %2138 = vst.msk [vmem:[#allocation3 + $0xe4] sm:$0xf] %vm2109_vm1, %v2105_v60 }
 0x1a8   : > { %v1371_v36 = vadd.f32 %v1355_v14, %v4272_v49  ;;  %v1219_v57 = vadd.f32 %v4352_v15, %v1167_v32  ;;  %v1321_v59 = vadd.f32 %v5097_v55, %v1269_v11  ;;  %v1540_v53 = vmul.f32 %v1524_v5, %v3685_v34  ;;  %v5100_v22 = vld [vmem:[#allocation54_spill] sm:$0xff]  ;;  %v5124_v55 = vld [vmem:[#allocation52_spill] sm:$0xff] }
 0x1a9   : > { %2060 = vst [vmem:[#allocation3 + $0x98] sm:$0xf] %v2965_v20  ;;  %v1588_v44 = vmul.f32 %v3689_v37, %v4297_v51  ;;  %v1270_v30 = vadd.f32 %v4355_v33, %v1217_v45  ;;  %v4433_v50 = vadd.f32 %v5098_v3, %v1218_v17  ;;  %v1320_v58 = vadd.f32 %v5100_v22, %v1268_v24  ;;  %v5103_v15 = vld [vmem:[#allocation58_spill] sm:$0xff]  ;;  %v1522_v33 = vld [vmem:[#allocation2 + $0x138] sm:$0xff]  ;;  %v5121_v17 = vld [vmem:[#allocation59_spill] sm:$0xff] }
 0x1aa   : > { %v1393_v49 = vadd.f32 %v3988_v28, %v1371_v36  ;;  %v4438_v35 = vadd.f32 %v5101_v23, %v1785_v61  ;;  %v4441_v16 = vadd.f32 %v5103_v15, %v1885_v10  ;;  %v4444_v47 = vadd.f32 %v5105_v46, %v1886_v56  ;;  %v5114_v56 = vld [vmem:[#allocation19_spill] sm:$0xff]  ;;  %v5118_v13 = vld [vmem:[#allocation18_spill] sm:$0xff]  ;;  %v3038_v36 = vpop.f32.mrf.mxu1  ;;  %v2078_v46 = vld [vmem:[%s3625_s30 + $0x4] sm:$0xf] }
 0x1ab   : > { %5099 = vst [vmem:[#allocation44_spill] sm:$0xff] %v4433_v50  ;;  %v4447_v25 = vadd.f32 %v5107_v38, %v1219_v57  ;;  %v1322_v27 = vadd.f32 %v5109_v43, %v1270_v30  ;;  %v1372_v9 = vadd.f32 %v1356_v62, %v1320_v58  ;;  %v4451_v41 = vadd.f32 %v5110_v6, %v1321_v59  ;;  %v5119_v62 = vld [vmem:[#allocation20_spill] sm:$0xff]  ;;  %v2077_v15 = vld [vmem:[%s3625_s30] sm:$0xf]  ;;  %v2081_v43 = vld [vmem:[%s3625_s30 + $0x10] sm:$0xf] }
 0x1ac   : > { %5102 = vst [vmem:[#allocation29_spill] sm:$0xff] %v4438_v35  ;;  %5104 = vst [vmem:[#allocation45_spill] sm:$0xff] %v4441_v16  ;;  %v1409_v21 = vmax.f32 %v1393_v49, 0.0  ;;  %v4455_v61 = vadd.f32 %v1588_v44, %v1540_v53  ;;  %v4458_v10 = vmul.f32 %v1524_v5, %v3709_v0  ;;  %v4462_v63 = vmul.f32 %v5114_v56, %v4297_v51  ;;  %v5126_v44 = vld [vmem:[#allocation53_spill] sm:$0xff]  ;;  %v5130_v49 = vld [vmem:[#allocation22_spill] sm:$0xff] }
 0x1ad   : > { %5106 = vst [vmem:[#allocation48_spill] sm:$0xff] %v4444_v47  ;;  %5108 = vst [vmem:[#allocation46_spill] sm:$0xff] %v4447_v25  ;;  %v4465_v48 = vmul.f32 %v1524_v5, %v3711_v1  ;;  %v1394_v26 = vadd.f32 %v3988_v28, %v1372_v9  ;;  %v1538_v18 = vmul.f32 %v1522_v33, %v3685_v34  ;;  %v5123_v5 = vld [vmem:[#allocation56_spill] sm:$0xff]  ;;  %v5125_v59 = vmax.f32 %v5124_v55, 0.0  ;;  %v2083_v9 = vld [vmem:[%s3625_s30 + $0x18] sm:$0xf] }
 0x1ae   : > { %5111 = vst [vmem:[#allocation47_spill] sm:$0xff] %v4451_v41  ;;  %5112 = vst [vmem:[#allocation25_spill] sm:$0xff] %v4455_v61  ;;  %v1425_v31 = vmin.f32 %v1409_v21, 6.0  ;;  %v1680_v29 = vmul.f32 %v1522_v33, %v3709_v0  ;;  %v1586_v2 = vmul.f32 %v3689_v37, %v5117_v4  ;;  %v1728_v54 = vmul.f32 %v5114_v56, %v5117_v4  ;;  %v2079_v38 = vld [vmem:[%s3625_s30 + $0x8] sm:$0xf]  ;;  %v3230_v60 = vld [vmem:[#allocation2 + $0x8] sm:$0xff] }
 0x1af   : > { %5113 = vst [vmem:[#allocation49_spill] sm:$0xff] %v4458_v10  ;;  %5115 = vst [vmem:[#allocation30_spill] sm:$0xff] %v4462_v63  ;;  %v1742_v14 = vadd.f32 %v5118_v13, %v4396_v39  ;;  %v1823_v20 = vmul.f32 %v1522_v33, %v3711_v1  ;;  %v1410_v32 = vmax.f32 %v1394_v26, 0.0  ;;  %v4479_v45 = vmul.f32 %v5119_v62, %v4297_v51  ;;  %v2080_v33 = vld [vmem:[%s3625_s30 + $0xc] sm:$0xf]  ;;  %v5132_v41 = vld [vmem:[#allocation32_spill] sm:$0xff] }
 0x1b0   : > { %5116 = vst [vmem:[#allocation26_spill] sm:$0xff] %v4465_v48  ;;  %v2956_v11 = vpack.c.bf16 %v1425_v31, %v1425_v31  ;;  %v1696_v24 = vadd.f32 %v1680_v29, %v5121_v17  ;;  %v4483_v39 = vadd.f32 %v4387_v52, %v1322_v27  ;;  %v878_v53 = vmin.f32 %v5125_v59, 6.0  ;;  %v5129_v52 = vld [vmem:[#allocation50_spill] sm:$0xff]  ;;  %v2084_v6 = vld [vmem:[%s3625_s30 + $0x1c] sm:$0xf]  ;;  %v5136_v10 = vld [vmem:[#allocation24_spill] sm:$0xff] }
 0x1b1   : > { %5120 = vst [vmem:[#allocation54_spill] sm:$0xff] %v4479_v45  ;;  %v1790_v57 = vadd.f32 %v5123_v5, %v1742_v14  ;;  %v5127_v30 = vmax.f32 %v5126_v44, 0.0  ;;  %v1426_v3 = vmin.f32 %v1410_v32, 6.0  ;;  %v865_v58 = vmax.f32 %v5129_v52, 0.0  ;;  %v2082_v27 = vld [vmem:[%s3625_s30 + $0x14] sm:$0xf] }
 0x1b2   : > { %5122 = vst [vmem:[#allocation38_spill] sm:$0xff] %v4483_v39  ;;  %1505 = vst [vmem:[#allocation3 + $0x50] sm:$0xf] %v2956_v11  ;;  %v4492_v22 = vadd.f32 %v1728_v54, %v1696_v24  ;;  %v1399_v23 = vmax.f32 %v5130_v49, 0.0  ;;  %v2085_v21 = vld [vmem:[%s3625_s30 + $0x20] sm:$0xf]  ;;  %v4522_v25 = vadd.f32 %v1586_v2, %v1538_v18  ;;  %v1871_v39 = vmul.f32 %v5119_v62, %v5117_v4  ;;  %v839_v4 = vpop.f32.mrf.mxu1 }
 0x1b3   : > { %v4490_v51 = vmin.f32 %v5127_v30, 6.0  ;;  %v2086_v26 = vld [vmem:[%s3625_s30 + $0x24] sm:$0xf]  ;;  %v2093_v31 = vld [vmem:[%s3625_s30 + $0x40] sm:$0xf]  ;;  %v1839_v50 = vadd.f32 %v1823_v20, %v1790_v57  ;;  %895 = vst [vmem:[#allocation2 + $0x159] sm:$0xff] %v878_v53  ;;  %v1743_v47 = vadd.f32 %v5132_v41, %v4398_v19  ;;  %v2957_v63 = vpack.c.bf16 %v1426_v3, %v1426_v3 }
 0x1b4   : > { %5128 = vst [vmem:[#allocation58_spill] sm:$0xff] %v4492_v22  ;;  %v2094_v29 = vld [vmem:[%s3625_s30 + $0x44] sm:$0xf]  ;;  %v2095_v54 = vld [vmem:[%s3625_s30 + $0x48] sm:$0xf]  ;;  %5131 = vst [vmem:[#allocation60_spill] sm:$0xff] %v4522_v25  ;;  %v4533_v45 = vmul.f32 %v3689_v37, %v878_v53  ;;  %v4536_v18 = vmul.f32 %v5114_v56, %v878_v53  ;;  %v4539_v2 = vmul.f32 %v5119_v62, %v878_v53 }
 0x1b5   : > { %v2096_v13 = vld [vmem:[%s3625_s30 + $0x4c] sm:$0xf]  ;;  %v2087_v14 = vld [vmem:[%s3625_s30 + $0x28] sm:$0xf]  ;;  %v2097_v11 = vld [vmem:[%s3625_s30 + $0x50] sm:$0xf]  ;;  %v4546_v19 = vmul.f32 %v3689_v37, %v4490_v51  ;;  %v4550_v41 = vmul.f32 %v5114_v56, %v4490_v51  ;;  %v4557_v40 = vadd.f32 %v1871_v39, %v1839_v50 }
 0x1b6   : > { %v2088_v32 = vld [vmem:[%s3625_s30 + $0x2c] sm:$0xf]  ;;  %v2098_v17 = vld [vmem:[%s3625_s30 + $0x54] sm:$0xf]  ;;  %v2089_v24 = vld [vmem:[%s3625_s30 + $0x30] sm:$0xf] }
 0x1b7   : > { %v2090_v5 = vld [vmem:[%s3625_s30 + $0x34] sm:$0xf]  ;;  %v2099_v55 = vld [vmem:[%s3625_s30 + $0x58] sm:$0xf]  ;;  %v2100_v59 = vld [vmem:[%s3625_s30 + $0x5c] sm:$0xf] }
 0x1b8   : > { %v2091_v44 = vld [vmem:[%s3625_s30 + $0x38] sm:$0xf]  ;;  %v2092_v30 = vld [vmem:[%s3625_s30 + $0x3c] sm:$0xf]  ;;  %v2101_v52 = vld [vmem:[%s3625_s30 + $0x60] sm:$0xf] }
 0x1b9   : > { %v2102_v49 = vld [vmem:[%s3625_s30 + $0x64] sm:$0xf]  ;;  %893 = vst [vmem:[#allocation2 + $0x141] sm:$0xff] %v4490_v51  ;;  %v2103_v16 = vld [vmem:[%s3625_s30 + $0x68] sm:$0xf]  ;;  %5133 = vst [vmem:[#allocation41_spill] sm:$0xff] %v4536_v18 }
 0x1ba   : > { %v2104_v35 = vld [vmem:[%s3625_s30 + $0x6c] sm:$0xf]  ;;  %5134 = vst [vmem:[#allocation51_spill] sm:$0xff] %v4539_v2  ;;  %v2106_v20 = vld [vmem:[%s3625_s30 + $0x74] sm:$0xf]  ;;  %5135 = vst [vmem:[#allocation61_spill] sm:$0xff] %v4550_v41 }
 0x1bb   : > { %v2107_v57 = vld [vmem:[%s3625_s30 + $0x78] sm:$0xf]  ;;  %v2108_v48 = vld [vmem:[%s3625_s30 + $0x7c] sm:$0xf]  ;;  %v881_v3 = vmin.f32 %v865_v58, 6.0  ;;  %v1400_v61 = vmax.f32 %v5136_v10, 0.0 }
 0x1bc   : > { %1506 = vst [vmem:[#allocation3 + $0x58] sm:$0xf] %v2957_v63  ;;  %v1415_v18 = vmin.f32 %v1399_v23, 6.0  ;;  %v3229_v53 = vld [vmem:[%s4980_s2] ss:$0 sm:$0xff]  ;;  %v4605_v63 = vmul.f32 %v3230_v60, %v3711_v1  ;;  %v1620_v39 = vld [vmem:[#allocation2 + $0x152] sm:$0xff] }
 0x1bd   : > { %v837_v2 = vadd.f32 %v3229_v53, %v4453_v12  ;;  %v848_v22 = vadd.f32 %v3229_v53, %v3038_v36  ;;  %v5137_v37 = vld [vmem:[#allocation57_spill] sm:$0xff]  ;;  %898 = vst [vmem:[#allocation2 + $0x181] sm:$0xff] %v881_v3  ;;  %v1416_v41 = vmin.f32 %v1400_v61, 6.0  ;;  %2110 = vst.msk [vmem:[#allocation3 + $0x4] sm:$0xf] %vm2109_vm1, %v2077_v15  ;;  %v4566_v10 = vadd.f32 %v3229_v53, %v839_v4  ;;  %v5138_v58 = vld [vmem:[#allocation35_spill] sm:$0xff] }
 0x1be   : > { %v4560_v25 = vadd.f32 %v5137_v37, %v1743_v47  ;;  %2111 = vst.msk [vmem:[#allocation3 + $0xc] sm:$0xf] %vm2109_vm1, %v2078_v46  ;;  %2112 = vst.msk [vmem:[#allocation3 + $0x14] sm:$0xf] %vm2109_vm1, %v2079_v38  ;;  %v1872_v37 = vmul.f32 %v5119_v62, %v4490_v51  ;;  %v2946_v50 = vpack.c.bf16 %v1415_v18, %v1415_v18  ;;  %v1525_v36 = vld [vmem:[#allocation2 + $0x158] sm:$0xff] }
 0x1bf   : > { %2113 = vst.msk [vmem:[#allocation3 + $0x1c] sm:$0xf] %vm2109_vm1, %v2080_v33  ;;  %2114 = vst.msk [vmem:[#allocation3 + $0x24] sm:$0xf] %vm2109_vm1, %v2081_v43  ;;  %v863_v47 = vmax.f32 %v837_v2, 0.0  ;;  %v866_v12 = vmax.f32 %v848_v22, 0.0  ;;  %v4599_v61 = vmul.f32 %v5114_v56, %v881_v3  ;;  %v4614_v23 = vadd.f32 %v3988_v28, %v5138_v58 }
 0x1c0   : > { %2115 = vst.msk [vmem:[#allocation3 + $0x2c] sm:$0xf] %vm2109_vm1, %v2082_v27  ;;  %2116 = vst.msk [vmem:[#allocation3 + $0x34] sm:$0xf] %vm2109_vm1, %v2083_v9  ;;  %v864_v22 = vmax.f32 %v4566_v10, 0.0  ;;  %v1541_v15 = vmul.f32 %v1525_v36, %v3685_v34  ;;  %v1621_v46 = vld [vmem:[#allocation2 + $0x15a] sm:$0xff] }
 0x1c1   : > { %2117 = vst.msk [vmem:[#allocation3 + $0x3c] sm:$0xf] %vm2109_vm1, %v2084_v6  ;;  %2118 = vst.msk [vmem:[#allocation3 + $0x44] sm:$0xf] %vm2109_vm1, %v2085_v21  ;;  %v4609_v51 = vmin.f32 %v866_v12, 6.0  ;;  %v1523_v38 = vld [vmem:[#allocation2 + $0x140] sm:$0xff] }
 0x1c2   : > { %2119 = vst.msk [vmem:[#allocation3 + $0x4c] sm:$0xf] %vm2109_vm1, %v2086_v26  ;;  %2126 = vst.msk [vmem:[#allocation3 + $0x84] sm:$0xf] %vm2109_vm1, %v2093_v31  ;;  %v1618_v33 = vld [vmem:[#allocation2 + $0x13a] sm:$0xff]  ;;  %v5140_v6 = vld [vmem:[#allocation23_spill] sm:$0xff]  ;;  %v1636_v31 = vmul.f32 %v1620_v39, %v3698_v42  ;;  %v1824_v18 = vmul.f32 %v1523_v38, %v3711_v1 }
 0x1c3   : > { %2127 = vst.msk [vmem:[#allocation3 + $0x8c] sm:$0xf] %vm2109_vm1, %v2094_v29  ;;  %2128 = vst.msk [vmem:[#allocation3 + $0x94] sm:$0xf] %vm2109_vm1, %v2095_v54  ;;  %v4620_v43 = vld [vmem:[%s4982_s4] ss:$0 sm:$0xff]  ;;  %v1637_v29 = vmul.f32 %v1621_v46, %v3698_v42  ;;  %v1683_v54 = vmul.f32 %v1525_v36, %v3709_v0  ;;  %v1919_v53 = vmul.f32 %v1618_v33, %v3719_v8 }
 0x1c4   : > { %2129 = vst.msk [vmem:[#allocation3 + $0x9c] sm:$0xf] %vm2109_vm1, %v2096_v13  ;;  %2120 = vst.msk [vmem:[#allocation3 + $0x54] sm:$0xf] %vm2109_vm1, %v2087_v14  ;;  %v5139_v27 = vld [vmem:[#allocation37_spill] sm:$0xff]  ;;  %v4628_v21 = vadd.f32 %v4620_v43, %v5140_v6  ;;  %v1778_v13 = vmul.f32 %v1620_v39, %v3717_v7  ;;  %v5142_v2 = vld [vmem:[#allocation60_spill] sm:$0xff] }
 0x1c5   : > { %2121 = vst.msk [vmem:[#allocation3 + $0x5c] sm:$0xf] %vm2109_vm1, %v2088_v32  ;;  %2130 = vst.msk [vmem:[#allocation3 + $0xa4] sm:$0xf] %vm2109_vm1, %v2097_v11  ;;  %v4624_v9 = vadd.f32 %v4620_v43, %v5139_v27  ;;  %v5141_v28 = vld [vmem:[#allocation33_spill] sm:$0xff]  ;;  %v4641_v32 = vmul.f32 %v1621_v46, %v3717_v7  ;;  %v1826_v11 = vmul.f32 %v1525_v36, %v3711_v1 }
 0x1c6   : > { %2131 = vst.msk [vmem:[#allocation3 + $0xac] sm:$0xf] %vm2109_vm1, %v2098_v17  ;;  %2122 = vst.msk [vmem:[#allocation3 + $0x64] sm:$0xf] %vm2109_vm1, %v2089_v24  ;;  %v4632_v26 = vadd.f32 %v4620_v43, %v5141_v28  ;;  %v1619_v14 = vld [vmem:[#allocation2 + $0x142] sm:$0xff]  ;;  %v1921_v17 = vmul.f32 %v1620_v39, %v3719_v8  ;;  %v1539_v24 = vmul.f32 %v1523_v38, %v3685_v34 }
 0x1c7   : > { %2123 = vst.msk [vmem:[#allocation3 + $0x6c] sm:$0xf] %vm2109_vm1, %v2090_v5  ;;  %2132 = vst.msk [vmem:[#allocation3 + $0xb4] sm:$0xf] %vm2109_vm1, %v2099_v55  ;;  %v1634_v5 = vmul.f32 %v1618_v33, %v3698_v42  ;;  %v1635_v55 = vmul.f32 %v1619_v14, %v3698_v42  ;;  %v3191_v60 = vld [vmem:[#allocation3 + $0x14] ss:$8 sps:$4 sm:$0xff]   ;;  %v1935_v6 = vadd.f32 %v1919_v53, %v4557_v40 }
 0x1c8   : > { %2133 = vst.msk [vmem:[#allocation3 + $0xbc] sm:$0xf] %vm2109_vm1, %v2100_v59  ;;  %2124 = vst.msk [vmem:[#allocation3 + $0x74] sm:$0xf] %vm2109_vm1, %v2091_v44  ;;  %v1681_v59 = vmul.f32 %v1523_v38, %v3709_v0  ;;  %v1776_v44 = vmul.f32 %v1618_v33, %v3717_v7  ;;  %v5146_v36 = vld [vmem:[#allocation49_spill] sm:$0xff]  ;;  %v5148_v38 = vld [vmem:[#allocation26_spill] sm:$0xff] }
 0x1c9   : > { %2125 = vst.msk [vmem:[#allocation3 + $0x7c] sm:$0xf] %vm2109_vm1, %v2092_v30  ;;  %2134 = vst.msk [vmem:[#allocation3 + $0xc4] sm:$0xf] %vm2109_vm1, %v2101_v52  ;;  %v1605_v30 = vadd.f32 %v4533_v45, %v1541_v15  ;;  %v1603_v52 = vadd.f32 %v4546_v19, %v1539_v24  ;;  %v1650_v4 = vadd.f32 %v1634_v5, %v5142_v2  ;;  %v1670_v19 = vld [vmem:[#allocation2 + $0x180] sm:$0xff] }
 0x1ca   : > { %2135 = vst.msk [vmem:[#allocation3 + $0xcc] sm:$0xf] %vm2109_vm1, %v2102_v49  ;;  %2136 = vst.msk [vmem:[#allocation3 + $0xd4] sm:$0xf] %vm2109_vm1, %v2103_v16  ;;  %v4602_v16 = vmul.f32 %v5119_v62, %v881_v3  ;;  %v1777_v49 = vmul.f32 %v1619_v14, %v3717_v7  ;;  %v1920_v45 = vmul.f32 %v1619_v14, %v3719_v8  ;;  %v5147_v58 = vld [vmem:[#allocation61_spill] sm:$0xff] }
 0x1cb   : > { %2137 = vst.msk [vmem:[#allocation3 + $0xdc] sm:$0xf] %vm2109_vm1, %v2104_v35  ;;  %2139 = vst.msk [vmem:[#allocation3 + $0xec] sm:$0xf] %vm2109_vm1, %v2106_v20  ;;  %v2947_v35 = vpack.c.bf16 %v1416_v41, %v1416_v41  ;;  %v5143_v20 = vld [vmem:[#allocation28_spill] sm:$0xff]  ;;  %v5144_v41 = vld [vmem:[#allocation58_spill] sm:$0xff]  ;;  %v1651_v12 = vadd.f32 %v1635_v55, %v1603_v52  ;;  %v1698_v39 = vadd.f32 %v5146_v36, %v1650_v4 }
 0x1cc   : > { %2140 = vst.msk [vmem:[#allocation3 + $0xf4] sm:$0xf] %vm2109_vm1, %v2107_v57  ;;  %2141 = vst.msk [vmem:[#allocation3 + $0xfc] sm:$0xf] %vm2109_vm1, %v2108_v48  ;;  %v4607_v48 = vmin.f32 %v863_v47, 6.0  ;;  %v1697_v57 = vadd.f32 %v1681_v59, %v5143_v20  ;;  %v1792_v3 = vadd.f32 %v1776_v44, %v5144_v41  ;;  %v4665_v33 = vadd.f32 %v1637_v29, %v1605_v30  ;;  %v5149_v59 = vld [vmem:[#allocation54_spill] sm:$0xff] }
 0x1cd   : > { %1495 = vst [vmem:[#allocation3] sm:$0xf] %v2946_v50  ;;  %1496 = vst [vmem:[#allocation3 + $0x8] sm:$0xf] %v2947_v35  ;;  %v5145_v50 = vld [vmem:[#allocation25_spill] sm:$0xff]  ;;  %v1840_v35 = vadd.f32 %v1824_v18, %v4560_v25  ;;  %v4671_v14 = vmul.f32 %v1670_v19, %v3709_v0  ;;  %v1951_v52 = vadd.f32 %v4620_v43, %v1935_v6 }
 0x1ce   : > { %896 = vst [vmem:[#allocation2 + $0x169] sm:$0xff] %v4607_v48  ;;  %899 = vst [vmem:[#allocation2 + $0x189] sm:$0xff] %v4609_v51  ;;  %v1652_v47 = vadd.f32 %v1636_v31, %v5145_v50  ;;  %v1745_v15 = vadd.f32 %v5147_v58, %v1697_v57  ;;  %v1841_v27 = vadd.f32 %v5148_v38, %v1792_v3  ;;  %v3190_v24 = vld [vmem:[#allocation3 + $0x4] ss:$8 sps:$4 sm:$0xff]  }
 0x1cf   : > { %v4668_v31 = vmul.f32 %v1621_v46, %v3719_v8  ;;  %v1888_v25 = vadd.f32 %v1872_v37, %v1840_v35  ;;  %2924 = vmatprep.mubr.msk.bf16.mxu0 %vm479_vm0, %v3190_v24  ;;  %v5150_v40 = vld [vmem:[#allocation17_spill] sm:$0xff]  ;;  %v5151_v37 = vld [vmem:[#allocation30_spill] sm:$0xff]  ;;  %v1699_v4 = vadd.f32 %v1683_v54, %v1651_v12  ;;  %v1732_v57 = vmul.f32 %v5114_v56, %v4607_v48 }
 0x1d0   : > { %v1793_v55 = vadd.f32 %v1777_v49, %v1745_v15  ;;  %v1889_v44 = vadd.f32 %v5149_v59, %v1841_v27  ;;  %v1590_v18 = vmul.f32 %v5150_v40, %v4607_v48  ;;  %v1746_v2 = vadd.f32 %v5151_v37, %v1698_v39 }
 0x1d1   : > { %v1936_v29 = vadd.f32 %v1920_v45, %v1888_v25  ;;  %v1967_v49 = vmax.f32 %v1951_v52, 0.0  ;;  %v4689_v36 = vmul.f32 %v1670_v19, %v3711_v1  ;;  %v1875_v54 = vmul.f32 %v5119_v62, %v4607_v48  ;;  %v3193_v25 = vld [vmem:[#allocation3 + $0x10] ss:$8 sps:$4 sm:$0xff]  }
 0x1d2   : > { %v1842_v20 = vadd.f32 %v1826_v11, %v1793_v55  ;;  %v1794_v53 = vadd.f32 %v1778_v13, %v1746_v2  ;;  %v4686_v35 = vadd.f32 %v1921_v17, %v1889_v44  ;;  %v5152_v11 = vld [vmem:[#allocation51_spill] sm:$0xff]  ;;  %v4705_v19 = vmul.f32 %v5114_v56, %v4609_v51  ;;  %v5153_v44 = vld [vmem:[#allocation41_spill] sm:$0xff] }
 0x1d3   : > { %v1952_v41 = vadd.f32 %v4620_v43, %v1936_v29  ;;  %v1983_v45 = vmin.f32 %v1967_v49, 6.0  ;;  %v4720_v55 = vmul.f32 %v5119_v62, %v4609_v51  ;;  %v880_v59 = vmin.f32 %v864_v22, 6.0  ;;  %v5155_v49 = vld [vmem:[#allocation21_spill] sm:$0xff] }
 0x1d4   : > { %v3188_v28 = vld [vmem:[#allocation3] ss:$8 sps:$4 sm:$0xff]   ;;  %v4694_v12 = vadd.f32 %v5152_v11, %v1842_v20  ;;  %v1747_v52 = vadd.f32 %v5153_v44, %v1699_v4  ;;  %v1403_v29 = vmax.f32 %v4614_v23, 0.0  ;;  %v1408_v23 = vmax.f32 %v4632_v26, 0.0 }
 0x1d5   : > { %v1526_v5 = vld [vmem:[#allocation2 + $0x168] sm:$0xff]  ;;  %2486 = vmatmul.mubr.bf16.vlgmr.msra.gmra.mxu0 %v3188_v28  ;;  %v1968_v39 = vmax.f32 %v1952_v41, 0.0  ;;  %v2968_v13 = vpack.c.bf16 %v1983_v45, %v1983_v45  ;;  %897 = vst [vmem:[#allocation2 + $0x171] sm:$0xff] %v880_v59  ;;  %v1591_v10 = vmul.f32 %v5150_v40, %v880_v59  ;;  %v1733_v51 = vmul.f32 %v5114_v56, %v880_v59  ;;  %v5156_v41 = vld [vmem:[#allocation29_spill] sm:$0xff] }
 0x1d6   : > { %v1542_v30 = vmul.f32 %v1526_v5, %v3685_v34  ;;  %v1684_v46 = vmul.f32 %v1526_v5, %v3709_v0  ;;  %2925 = vmatprep.mubr.msk.bf16.mxu0 %vm479_vm0, %v3191_v60  ;;  %v1827_v50 = vmul.f32 %v1526_v5, %v3711_v1  ;;  %v1766_v38 = vld [vmem:[#allocation2 + $0x182] sm:$0xff]  ;;  %v1767_v48 = vld [vmem:[#allocation2 + $0x18a] sm:$0xff]  ;;  %v1419_v22 = vmin.f32 %v1403_v29, 6.0 }
 0x1d7   : > { %v1984_v27 = vmin.f32 %v1968_v39, 6.0  ;;  %v4710_v28 = vmul.f32 %v1766_v38, %v3717_v7  ;;  %v4713_v24 = vmul.f32 %v1767_v48, %v3717_v7  ;;  %2063 = vst [vmem:[#allocation3 + $0xb0] sm:$0xf] %v2968_v13  ;;  %v4729_v37 = vmul.f32 %v1766_v38, %v3719_v8  ;;  %v5159_v39 = vld [vmem:[#allocation39_spill] sm:$0xff]  ;;  %v5161_v13 = vld [vmem:[#allocation48_spill] sm:$0xff] }
 0x1d8   : > { %v1700_v3 = vadd.f32 %v1684_v46, %v1652_v47  ;;  %v4696_v60 = vadd.f32 %v1590_v18, %v1542_v30  ;;  %v1843_v58 = vadd.f32 %v1827_v50, %v1794_v53  ;;  %v1671_v47 = vld [vmem:[#allocation2 + $0x188] sm:$0xff]  ;;  %v1404_v30 = vmax.f32 %v4624_v9, 0.0  ;;  %v5158_v50 = vld [vmem:[#allocation45_spill] sm:$0xff] }
 0x1d9   : > { %v4701_v17 = vmul.f32 %v1671_v47, %v3709_v0  ;;  %v4716_v5 = vmul.f32 %v1671_v47, %v3711_v1  ;;  %v2969_v18 = vpack.c.bf16 %v1984_v27, %v1984_v27  ;;  %v1407_v46 = vmax.f32 %v4628_v21, 0.0  ;;  %v5154_v21 = vld [vmem:[#allocation36_spill] sm:$0xff] }
 0x1da   : > { %v4698_v15 = vadd.f32 %v1732_v57, %v1700_v3  ;;  %v4707_v6 = vadd.f32 %v1875_v54, %v1843_v58  ;;  %v4732_v2 = vmul.f32 %v1767_v48, %v3719_v8  ;;  %v1420_v4 = vmin.f32 %v1404_v30, 6.0  ;;  %v5157_v3 = vld [vmem:[#allocation31_spill] sm:$0xff]  ;;  %v5160_v47 = vld [vmem:[#allocation40_spill] sm:$0xff] }
 0x1db   : > { %2064 = vst [vmem:[#allocation3 + $0xb8] sm:$0xf] %v2969_v18  ;;  %v1423_v20 = vmin.f32 %v1407_v46, 6.0  ;;  %v1795_v9 = vadd.f32 %v4641_v32, %v1747_v52  ;;  %v1881_v57 = vadd.f32 %v5155_v49, %v5154_v21  ;;  %v1882_v53 = vadd.f32 %v5157_v3, %v5156_v41  ;;  %v5163_v52 = vld [vmem:[#allocation38_spill] sm:$0xff]  ;;  %v5164_v49 = vld [vmem:[#allocation44_spill] sm:$0xff] }
 0x1dc   : > { %v1949_v45 = vadd.f32 %v4620_v43, %v5158_v50  ;;  %v2950_v40 = vpack.c.bf16 %v1419_v22, %v1419_v22  ;;  %v2951_v54 = vpack.c.bf16 %v1420_v4, %v1420_v4  ;;  %v1424_v56 = vmin.f32 %v1408_v23, 6.0  ;;  %v1622_v4 = vld [vmem:[#allocation2 + $0x16a] sm:$0xff]  ;;  %v1623_v23 = vld [vmem:[#allocation2 + $0x172] sm:$0xff] }
 0x1dd   : > { %2494 = vmatmul.mubr.bf16.gmra.mxu0 %v3193_v25  ;;  %v2954_v11 = vpack.c.bf16 %v1423_v20, %v1423_v20  ;;  %v1929_v58 = vadd.f32 %v5159_v39, %v1881_v57  ;;  %v1930_v26 = vadd.f32 %v5160_v47, %v1882_v53  ;;  %v4748_v32 = vadd.f32 %v4620_v43, %v5161_v13  ;;  %v5162_v25 = vld [vmem:[#allocation47_spill] sm:$0xff]  ;;  %v5166_v3 = vld [vmem:[#allocation46_spill] sm:$0xff] }
 0x1de   : > { %v1965_v38 = vmax.f32 %v1949_v45, 0.0  ;;  %v1876_v48 = vmul.f32 %v5119_v62, %v880_v59  ;;  %1499 = vst [vmem:[#allocation3 + $0x20] sm:$0xf] %v2950_v40  ;;  %1500 = vst [vmem:[#allocation3 + $0x28] sm:$0xf] %v2951_v54  ;;  %v2955_v27 = vpack.c.bf16 %v1424_v56, %v1424_v56  ;;  %v4753_v44 = vadd.f32 %v4620_v43, %v5162_v25  ;;  %v1527_v59 = vld [vmem:[#allocation2 + $0x170] sm:$0xff] }
 0x1df   : > { %1503 = vst [vmem:[#allocation3 + $0x40] sm:$0xf] %v2954_v11  ;;  %v4757_v18 = vadd.f32 %v4620_v43, %v5163_v52  ;;  %v1945_v29 = vadd.f32 %v4620_v43, %v1929_v58  ;;  %v1946_v30 = vadd.f32 %v4620_v43, %v1930_v26  ;;  %v1966_v46 = vmax.f32 %v4748_v32, 0.0  ;;  %v5165_v57 = vld [vmem:[#allocation27_spill] sm:$0xff]  ;;  %v5167_v53 = vld [vmem:[#allocation34_spill] sm:$0xff] }
 0x1e0   : > { %v4762_v22 = vmin.f32 %v1965_v38, 6.0  ;;  %1504 = vst [vmem:[#allocation3 + $0x48] sm:$0xf] %v2955_v27  ;;  %v1411_v20 = vmax.f32 %v4753_v44, 0.0  ;;  %v4768_v41 = vadd.f32 %v5165_v57, %v5164_v49  ;;  %v4772_v50 = vadd.f32 %v5167_v53, %v5166_v3 }
 0x1e1   : > { %v1412_v21 = vmax.f32 %v4757_v18, 0.0  ;;  %v1543_v45 = vmul.f32 %v1527_v59, %v3685_v34  ;;  %v1638_v40 = vmul.f32 %v1622_v4, %v3698_v42  ;;  %v1639_v54 = vmul.f32 %v1623_v23, %v3698_v42 }
 0x1e2   : > { %v1685_v56 = vmul.f32 %v1527_v59, %v3709_v0  ;;  %v1780_v11 = vmul.f32 %v1622_v4, %v3717_v7  ;;  %v1781_v39 = vmul.f32 %v1623_v23, %v3717_v7  ;;  %v1828_v58 = vmul.f32 %v1527_v59, %v3711_v1  ;;  %v3194_v1 = vld [vmem:[#allocation3 + $0x24] ss:$8 sps:$4 sm:$0xff]  }
 0x1e3   : > { %v1923_v47 = vmul.f32 %v1622_v4, %v3719_v8  ;;  %v1607_v26 = vadd.f32 %v1591_v10, %v1543_v45  ;;  %v1654_v13 = vadd.f32 %v1638_v40, %v4696_v60  ;;  %v1924_v34 = vmul.f32 %v1623_v23, %v3719_v8  ;;  %2926 = vmatprep.mubr.msk.bf16.mxu0 %vm479_vm0, %v3194_v1 }
 0x1e4   : > { %v1701_v38 = vadd.f32 %v1685_v56, %v4665_v33  ;;  %v1796_v27 = vadd.f32 %v1780_v11, %v4698_v15  ;;  %v1844_v42 = vadd.f32 %v1828_v58, %v1795_v9  ;;  %v1961_v25 = vmax.f32 %v1945_v29, 0.0 }
 0x1e5   : > { %v1939_v0 = vadd.f32 %v1923_v47, %v4707_v6  ;;  %v1655_v44 = vadd.f32 %v1639_v54, %v1607_v26  ;;  %v1702_v7 = vadd.f32 %v4671_v14, %v1654_v13  ;;  %v1962_v59 = vmax.f32 %v1946_v30, 0.0  ;;  %v3196_v33 = vld [vmem:[#allocation3 + $0x20] ss:$8 sps:$4 sm:$0xff]   ;;  %v3197_v6 = vld [vmem:[#allocation3 + $0x34] ss:$8 sps:$4 sm:$0xff]  }
 0x1e6   : > { %v1749_v52 = vadd.f32 %v1733_v51, %v1701_v38  ;;  %v1845_v10 = vadd.f32 %v4689_v36, %v1796_v27  ;;  %v1892_v4 = vadd.f32 %v1876_v48, %v1844_v42  ;;  %v1977_v49 = vmin.f32 %v1961_v25, 6.0  ;;  %2502 = vmatmul.mubr.bf16.gmra.mxu0 %v3196_v33  ;;  %v4804_v54 = vld [vmem:[#allocation3 + $0x40] sm:$0xff]  ;;  %v3199_v26 = vld [vmem:[#allocation3 + $0x30] ss:$8 sps:$4 sm:$0xff]  }
 0x1e7   : > { %v1955_v60 = vadd.f32 %v4620_v43, %v1939_v0  ;;  %v1703_v23 = vadd.f32 %v4701_v17, %v1655_v44  ;;  %v1750_v15 = vadd.f32 %v4599_v61, %v1702_v7  ;;  %v1978_v29 = vmin.f32 %v1962_v59, 6.0  ;;  %v4794_v36 = vld [vmem:[#allocation3 + $0x48] sm:$0xff]  ;;  %2927 = vmatprep.mubr.msk.bf16.mxu0 %vm479_vm0, %v3197_v6  ;;  %v5169_v38 = vld [vmem:[#allocation43_spill] sm:$0xff]  ;;  %v1912_v25 = vld [vmem:[#allocation2 + $0x1a2] sm:$0xff] }
 0x1e8   : > { %v1797_v9 = vadd.f32 %v1781_v39, %v1749_v52  ;;  %v1893_v14 = vadd.f32 %v4602_v16, %v1845_v10  ;;  %v1940_v51 = vadd.f32 %v1924_v34, %v1892_v4  ;;  %v2962_v48 = vpack.c.bf16 %v1977_v49, %v1977_v49  ;;  %v1864_v34 = vld [vmem:[#allocation2 + $0x1a1] sm:$0xff]  ;;  %v3204_v10 = vld [vmem:[#allocation3 + $0x84] ss:$8 sps:$4 sm:$0xff]  }
 0x1e9   : > { %v1971_v30 = vmax.f32 %v1955_v60, 0.0  ;;  %v1751_v57 = vadd.f32 %v4705_v19, %v1703_v23  ;;  %v1798_v3 = vadd.f32 %v4710_v28, %v1750_v15  ;;  %v2963_v61 = vpack.c.bf16 %v1978_v29, %v1978_v29  ;;  %v1911_v0 = vld [vmem:[#allocation2 + $0x19a] sm:$0xff]  ;;  %2932 = vmatprep.mubr.msk.bf16.mxu1 %vm479_vm0, %v3204_v10  ;;  %v3205_v29 = vld [vmem:[#allocation3 + $0x94] ss:$8 sps:$4 sm:$0xff]  }
 0x1ea   : > { %v1846_v17 = vadd.f32 %v4716_v5, %v1797_v9  ;;  %v1938_v53 = vadd.f32 %v4668_v31, %v4694_v12  ;;  %v1941_v16 = vadd.f32 %v4729_v37, %v1893_v14  ;;  %v1956_v45 = vadd.f32 %v4620_v43, %v1940_v51  ;;  %2057 = vst [vmem:[#allocation3 + $0x80] sm:$0xf] %v2962_v48  ;;  %v4855_v10 = vld [vmem:[%s4984_s6] ss:$0 sm:$0xff] }
 0x1eb   : > { %v1987_v40 = vmin.f32 %v1971_v30, 6.0  ;;  %v1799_v19 = vadd.f32 %v4713_v24, %v1751_v57  ;;  %2058 = vst [vmem:[#allocation3 + $0x88] sm:$0xf] %v2963_v61  ;;  %v2890_v5 = vcombine.low %v4804_v54, %v4794_v36  ;;  %v1982_v56 = vmin.f32 %v1966_v46, 6.0  ;;  %v5168_v46 = vld [vmem:[#allocation42_spill] sm:$0xff] }
 0x1ec   : > { %v1894_v28 = vadd.f32 %v4720_v55, %v1846_v17  ;;  %v1972_v31 = vmax.f32 %v1956_v45, 0.0  ;;  %v2966_v37 = vpack.c.bf16 %v4762_v22, %v4762_v22  ;;  %v1427_v11 = vmin.f32 %v1411_v20, 6.0  ;;  %v1863_v20 = vld [vmem:[#allocation2 + $0x199] sm:$0xff]  ;;  %v3207_v45 = vld [vmem:[#allocation3 + $0x54] ss:$8 sps:$4 sm:$0xff]  }
 0x1ed   : > { %v2972_v12 = vpack.c.bf16 %v1987_v40, %v1987_v40  ;;  %v1847_v39 = vadd.f32 %v4605_v63, %v1798_v3  ;;  %v2967_v24 = vpack.c.bf16 %v1982_v56, %v1982_v56  ;;  %v1428_v55 = vmin.f32 %v1412_v21, 6.0  ;;  %v2161_v56 = vld [vmem:[#allocation3 + $0x98] sm:$0xff]  ;;  %v2152_v36 = vld [vmem:[#allocation3 + $0x50] sm:$0xff] }
 0x1ee   : > { %v1942_v58 = vadd.f32 %v4732_v2, %v1894_v28  ;;  %v1988_v47 = vmin.f32 %v1972_v31, 6.0  ;;  %2061 = vst [vmem:[#allocation3 + $0xa0] sm:$0xf] %v2966_v37  ;;  %v2958_v32 = vpack.c.bf16 %v1427_v11, %v1427_v11  ;;  %v1375_v13 = vadd.f32 %v5168_v46, %v4768_v41  ;;  %v3200_v2 = vld [vmem:[#allocation3 + $0x44] ss:$8 sps:$4 sm:$0xff]   ;;  %2510 = vmatmul.mubr.bf16.gmra.mxu0 %v3199_v26  ;;  %v2160_v28 = vld [vmem:[#allocation3 + $0x90] sm:$0xff] }
 0x1ef   : > { %2067 = vst [vmem:[#allocation3 + $0xd0] sm:$0xf] %v2972_v12  ;;  %v1376_v22 = vadd.f32 %v5169_v38, %v4772_v50  ;;  %v1848_v27 = vadd.f32 %v4605_v63, %v1799_v19  ;;  %2062 = vst [vmem:[#allocation3 + $0xa8] sm:$0xf] %v2967_v24  ;;  %v2959_v42 = vpack.c.bf16 %v1428_v55, %v1428_v55  ;;  %2928 = vmatprep.mubr.msk.bf16.mxu0 %vm479_vm0, %v3200_v2  ;;  %v3209_v55 = vld [vmem:[#allocation3 + $0xa4] ss:$8 sps:$4 sm:$0xff]  }
 0x1f0   : > { %v1953_v18 = vadd.f32 %v4620_v43, %v4686_v35  ;;  %v1954_v21 = vadd.f32 %v4620_v43, %v1938_v53  ;;  %v2973_v44 = vpack.c.bf16 %v1988_v47, %v1988_v47  ;;  %1507 = vst [vmem:[#allocation3 + $0x60] sm:$0xf] %v2958_v32  ;;  %v1397_v41 = vadd.f32 %v4620_v43, %v1375_v13  ;;  %v3215_v2 = vld [vmem:[#allocation3 + $0x74] ss:$8 sps:$4 sm:$0xff]  }
 0x1f1   : > { %v1398_v50 = vadd.f32 %v4620_v43, %v1376_v22  ;;  %v1957_v7 = vadd.f32 %v4620_v43, %v1941_v16  ;;  %1508 = vst [vmem:[#allocation3 + $0x68] sm:$0xf] %v2959_v42  ;;  %v1958_v35 = vadd.f32 %v4620_v43, %v1942_v58  ;;  %v1879_v1 = vmul.f32 %v1863_v20, %v5119_v62  ;;  %v2153_v58 = vld [vmem:[#allocation3 + $0x58] sm:$0xff]  ;;  %v2164_v42 = vld [vmem:[#allocation3 + $0xb0] sm:$0xff] }
 0x1f2   : > { %v1969_v63 = vmax.f32 %v1953_v18, 0.0  ;;  %v1970_v52 = vmax.f32 %v1954_v21, 0.0  ;;  %2068 = vst [vmem:[#allocation3 + $0xd8] sm:$0xf] %v2973_v44  ;;  %v3202_v59 = vld [vmem:[#allocation3 + $0x80] ss:$8 sps:$4 sm:$0xff]   ;;  %v1880_v60 = vmul.f32 %v1864_v34, %v5119_v62  ;;  %v1927_v33 = vmul.f32 %v1911_v0, %v3719_v8 }
 0x1f3   : > { %v1413_v4 = vmax.f32 %v1397_v41, 0.0  ;;  %v1928_v49 = vmul.f32 %v1912_v25, %v3719_v8  ;;  %v1414_v23 = vmax.f32 %v1398_v50, 0.0  ;;  %v1973_v6 = vmax.f32 %v1957_v7, 0.0  ;;  %2550 = vmatmul.mubr.bf16.vlgmr.msra.gmra.mxu1 %v3202_v59  ;;  %v3213_v20 = vld [vmem:[#allocation3 + $0xb4] ss:$8 sps:$4 sm:$0xff]  }
 0x1f4   : > { %v1985_v15 = vmin.f32 %v1969_v63, 6.0  ;;  %v1986_v9 = vmin.f32 %v1970_v52, 6.0  ;;  %v1974_v51 = vmax.f32 %v1958_v35, 0.0  ;;  %v1895_v30 = vadd.f32 %v1879_v1, %v1847_v39  ;;  %2933 = vmatprep.mubr.msk.bf16.mxu1 %vm479_vm0, %v3205_v29  ;;  %v2165_v18 = vld [vmem:[#allocation3 + $0xb8] sm:$0xff]  ;;  %v3217_v25 = vld [vmem:[#allocation3 + $0xc4] ss:$8 sps:$4 sm:$0xff]  }
 0x1f5   : > { %v1429_v14 = vmin.f32 %v1413_v4, 6.0  ;;  %v1896_v48 = vadd.f32 %v1880_v60, %v1848_v27  ;;  %v1430_v57 = vmin.f32 %v1414_v23, 6.0  ;;  %v1989_v62 = vmin.f32 %v1973_v6, 6.0  ;;  %v2162_v46 = vld [vmem:[#allocation3 + $0xa0] sm:$0xff]  ;;  %v3220_v7 = vld [vmem:[#allocation3 + $0xd4] ss:$8 sps:$4 sm:$0xff]  }
 0x1f6   : > { %v2970_v3 = vpack.c.bf16 %v1985_v15, %v1985_v15  ;;  %v2971_v17 = vpack.c.bf16 %v1986_v9, %v1986_v9  ;;  %v1990_v8 = vmin.f32 %v1974_v51, 6.0  ;;  %v1943_v53 = vadd.f32 %v1927_v33, %v1895_v30  ;;  %2518 = vmatmul.mubr.bf16.gmra.mxu0 %v2890_v5  ;;  %v2163_v13 = vld [vmem:[#allocation3 + $0xa8] sm:$0xff]  ;;  %v3226_v1 = vld [vmem:[#allocation3 + $0xf4] ss:$8 sps:$4 sm:$0xff]  }
 0x1f7   : > { %v2960_v61 = vpack.c.bf16 %v1429_v14, %v1429_v14  ;;  %v1944_v16 = vadd.f32 %v1928_v49, %v1896_v48  ;;  %v2961_v40 = vpack.c.bf16 %v1430_v57, %v1430_v57  ;;  %v2974_v19 = vpack.c.bf16 %v1989_v62, %v1989_v62  ;;  %2929 = vmatprep.mubr.msk.bf16.mxu0 %vm479_vm0, %v3207_v45  ;;  %v2154_v34 = vld [vmem:[#allocation3 + $0x60] sm:$0xff] }
 0x1f8   : > { %2065 = vst [vmem:[#allocation3 + $0xc0] sm:$0xf] %v2970_v3  ;;  %2066 = vst [vmem:[#allocation3 + $0xc8] sm:$0xf] %v2971_v17  ;;  %v2975_v31 = vpack.c.bf16 %v1990_v8, %v1990_v8  ;;  %v1959_v12 = vadd.f32 %v4620_v43, %v1943_v53  ;;  %v2900_v24 = vcombine.low %v2160_v28, %v2161_v56  ;;  %v2155_v38 = vld [vmem:[#allocation3 + $0x68] sm:$0xff] }
 0x1f9   : > { %1509 = vst [vmem:[#allocation3 + $0x70] sm:$0xf] %v2960_v61  ;;  %v1960_v37 = vadd.f32 %v4620_v43, %v1944_v16  ;;  %1510 = vst [vmem:[#allocation3 + $0x78] sm:$0xf] %v2961_v40  ;;  %v2892_v54 = vcombine.low %v2152_v36, %v2153_v58  ;;  %v3211_v43 = vld [vmem:[#allocation3 + $0x64] ss:$8 sps:$4 sm:$0xff]   ;;  %v2902_v22 = vcombine.low %v2162_v46, %v2163_v13 }
 0x1fa   : > { %2069 = vst [vmem:[#allocation3 + $0xe0] sm:$0xf] %v2974_v19  ;;  %2070 = vst [vmem:[#allocation3 + $0xe8] sm:$0xf] %v2975_v31  ;;  %v1975_v11 = vmax.f32 %v1959_v12, 0.0  ;;  %v2894_v27 = vcombine.low %v2154_v34, %v2155_v38  ;;  %v2904_v0 = vcombine.low %v2164_v42, %v2165_v18 }
 0x1fb   : > { %v1976_v39 = vmax.f32 %v1960_v37, 0.0  ;;  %2558 = vmatmul.mubr.bf16.gmra.mxu1 %v2900_v24  ;;  %v3222_v63 = vld [vmem:[#allocation3 + $0xd0] ss:$8 sps:$4 sm:$0xff]   ;;  %v3223_v52 = vld [vmem:[#allocation3 + $0xe4] ss:$8 sps:$4 sm:$0xff]  }
 0x1fc   : > { %v1991_v47 = vmin.f32 %v1975_v11, 6.0  ;;  %2934 = vmatprep.mubr.msk.bf16.mxu1 %vm479_vm0, %v3209_v55 }
 0x1fd   : > { %v1992_v26 = vmin.f32 %v1976_v39, 6.0 }
 0x1fe   : > { %v2976_v5 = vpack.c.bf16 %v1991_v47, %v1991_v47  ;;  %2526 = vmatmul.mubr.bf16.gmra.mxu0 %v2892_v54 }
 0x1ff   : > { %v2977_v32 = vpack.c.bf16 %v1992_v26, %v1992_v26  ;;  %2930 = vmatprep.mubr.msk.bf16.mxu0 %vm479_vm0, %v3211_v43  ;;  %v3219_v50 = vld [vmem:[#allocation3 + $0xc0] ss:$8 sps:$4 sm:$0xff]  }
 0x200   : > { %2071 = vst [vmem:[#allocation3 + $0xf0] sm:$0xf] %v2976_v5  ;;  %v2157_v21 = vld [vmem:[#allocation3 + $0x78] sm:$0xff]  ;;  %v2156_v44 = vld [vmem:[#allocation3 + $0x70] sm:$0xff] }
 0x201   : > { %2072 = vst [vmem:[#allocation3 + $0xf8] sm:$0xf] %v2977_v32  ;;  %v2896_v41 = vcombine.low %v2156_v44, %v2157_v21  ;;  %v3225_v35 = vld [vmem:[#allocation3 + $0xe0] ss:$8 sps:$4 sm:$0xff]  }
 0x203   : > { %2566 = vmatmul.mubr.bf16.gmra.mxu1 %v2902_v22 }
 0x204   : > { %2935 = vmatprep.mubr.msk.bf16.mxu1 %vm479_vm0, %v3213_v20 }
 0x206   : > { %2534 = vmatmul.mubr.bf16.gmra.mxu0 %v2894_v27 }
 0x207   : > { %2931 = vmatprep.mubr.msk.bf16.mxu0 %vm479_vm0, %v3215_v2 }
 0x208   : > { %v3228_v59 = vld [vmem:[#allocation3 + $0xf0] ss:$8 sps:$4 sm:$0xff]  }
 0x20b   : > { %2574 = vmatmul.mubr.bf16.gmra.mxu1 %v2904_v0 }
 0x20c   : > { %2936 = vmatprep.mubr.msk.bf16.mxu1 %vm479_vm0, %v3217_v25 }
 0x20e   : > { %2542 = vmatmul.mubr.bf16.gmra.mxu0 %v2896_v41 }
 0x213   : > { %2582 = vmatmul.mubr.bf16.gmra.mxu1 %v3219_v50 }
 0x214   : > { %2937 = vmatprep.mubr.msk.bf16.mxu1 %vm479_vm0, %v3220_v7 }
 0x21b   : > { %2590 = vmatmul.mubr.bf16.gmra.mxu1 %v3222_v63 }
 0x21c   : > { %2938 = vmatprep.mubr.msk.bf16.mxu1 %vm479_vm0, %v3223_v52 }
 0x223   : > { %2598 = vmatmul.mubr.bf16.gmra.mxu1 %v3225_v35 }
 0x224   : > { %2939 = vmatprep.mubr.msk.bf16.mxu1 %vm479_vm0, %v3226_v1 }
 0x22b   : > { %2606 = vmatmul.mubr.bf16.gmra.mxu1 %v3228_v59 }
 0x295   : > { %v2487_v4 = vpop.f32.mrf.mxu0 }
 0x296   : > { %v2488_v60 = vadd.f32 %v4855_v10, %v2487_v4 }
 0x297   : > { %v2489_v33 = vpop.f32.mrf.mxu0 }
 0x298   : > { %2614 = vst [vmem:[%s4858_s20] sm:$0xff] %v2488_v60 }
 0x299   : > { %v2490_v49 = vpop.f32.mrf.mxu0 }
 0x29a   : > { %v2491_v23 = vadd.f32 %v4855_v10, %v2490_v49 }
 0x29b   : > { %v2492_v15 = vpop.f32.mrf.mxu0 }
 0x29c   : > { %2615 = vst [vmem:[%s4858_s20 + $0x8] sm:$0xff] %v2491_v23 }
 0x29d   : > { %v2495_v9 = vpop.f32.mrf.mxu0 }
 0x29e   : > { %v2496_v6 = vadd.f32 %v4855_v10, %v2495_v9 }
 0x29f   : > { %v2497_v29 = vpop.f32.mrf.mxu0 }
 0x2a0   : > { %2616 = vst [vmem:[%s4858_s20 + $0x10] sm:$0xff] %v2496_v6 }
 0x2a1   : > { %v2498_v14 = vpop.f32.mrf.mxu0 }
 0x2a2   : > { %v2499_v51 = vadd.f32 %v4855_v10, %v2498_v14 }
 0x2a3   : > { %v2500_v30 = vpop.f32.mrf.mxu0 }
 0x2a4   : > { %2617 = vst [vmem:[%s4858_s20 + $0x18] sm:$0xff] %v2499_v51 }
 0x2a6   : > { %v2503_v48 = vpop.f32.mrf.mxu0 }
 0x2a7   : > { %v2504_v57 = vadd.f32 %v4855_v10, %v2503_v48 }
 0x2a8   : > { %v2505_v3 = vpop.f32.mrf.mxu0 }
 0x2a9   : > { %2618 = vst [vmem:[%s4858_s20 + $0x20] sm:$0xff] %v2504_v57 }
 0x2aa   : > { %v2506_v17 = vpop.f32.mrf.mxu0 }
 0x2ab   : > { %v2507_v62 = vadd.f32 %v4855_v10, %v2506_v17 }
 0x2ac   : > { %v2508_v61 = vpop.f32.mrf.mxu0 }
 0x2ad   : > { %2619 = vst [vmem:[%s4858_s20 + $0x28] sm:$0xff] %v2507_v62 }
 0x2ae   : > { %v2511_v8 = vpop.f32.mrf.mxu0 }
 0x2af   : > { %v2512_v53 = vadd.f32 %v4855_v10, %v2511_v8 }
 0x2b0   : > { %v2513_v16 = vpop.f32.mrf.mxu0 }
 0x2b1   : > { %2620 = vst [vmem:[%s4858_s20 + $0x30] sm:$0xff] %v2512_v53 }
 0x2b2   : > { %v2514_v45 = vpop.f32.mrf.mxu0 }
 0x2b3   : > { %v2551_v40 = vpop.f32.mrf.mxu1  ;;  %v2515_v19 = vadd.f32 %v4855_v10, %v2514_v45 }
 0x2b4   : > { %v2552_v28 = vadd.f32 %v4855_v10, %v2551_v40  ;;  %v2516_v56 = vpop.f32.mrf.mxu0 }
 0x2b5   : > { %2621 = vst [vmem:[%s4858_s20 + $0x38] sm:$0xff] %v2515_v19  ;;  %v2553_v31 = vpop.f32.mrf.mxu1 }
 0x2b6   : > { %2630 = vst [vmem:[%s4858_s20 + $0x80] sm:$0xff] %v2552_v28  ;;  %v2519_v12 = vpop.f32.mrf.mxu0 }
 0x2b7   : > { %v2554_v37 = vpop.f32.mrf.mxu1  ;;  %v2520_v11 = vadd.f32 %v4855_v10, %v2519_v12 }
 0x2b8   : > { %v2555_v39 = vadd.f32 %v4855_v10, %v2554_v37  ;;  %v2521_v58 = vpop.f32.mrf.mxu0 }
 0x2b9   : > { %2622 = vst [vmem:[%s4858_s20 + $0x40] sm:$0xff] %v2520_v11  ;;  %v2556_v24 = vpop.f32.mrf.mxu1 }
 0x2ba   : > { %2631 = vst [vmem:[%s4858_s20 + $0x88] sm:$0xff] %v2555_v39  ;;  %v2522_v55 = vpop.f32.mrf.mxu0 }
 0x2bb   : > { %v2559_v47 = vpop.f32.mrf.mxu1  ;;  %v2523_v26 = vadd.f32 %v4855_v10, %v2522_v55 }
 0x2bc   : > { %v2560_v36 = vadd.f32 %v4855_v10, %v2559_v47  ;;  %v2524_v54 = vpop.f32.mrf.mxu0 }
 0x2bd   : > { %2623 = vst [vmem:[%s4858_s20 + $0x48] sm:$0xff] %v2523_v26  ;;  %v2561_v5 = vpop.f32.mrf.mxu1 }
 0x2be   : > { %2632 = vst [vmem:[%s4858_s20 + $0x90] sm:$0xff] %v2560_v36  ;;  %v2527_v32 = vpop.f32.mrf.mxu0 }
 0x2bf   : > { %v2562_v43 = vpop.f32.mrf.mxu1  ;;  %v2528_v46 = vadd.f32 %v4855_v10, %v2527_v32 }
 0x2c0   : > { %v2563_v13 = vadd.f32 %v4855_v10, %v2562_v43  ;;  %v2529_v38 = vpop.f32.mrf.mxu0 }
 0x2c1   : > { %2624 = vst [vmem:[%s4858_s20 + $0x50] sm:$0xff] %v2528_v46  ;;  %v2564_v22 = vpop.f32.mrf.mxu1 }
 0x2c2   : > { %2633 = vst [vmem:[%s4858_s20 + $0x98] sm:$0xff] %v2563_v13  ;;  %v2530_v20 = vpop.f32.mrf.mxu0 }
 0x2c3   : > { %v2567_v34 = vpop.f32.mrf.mxu1  ;;  %v2531_v27 = vadd.f32 %v4855_v10, %v2530_v20 }
 0x2c4   : > { %v2568_v2 = vadd.f32 %v4855_v10, %v2567_v34  ;;  %v2532_v42 = vpop.f32.mrf.mxu0 }
 0x2c5   : > { %2625 = vst [vmem:[%s4858_s20 + $0x58] sm:$0xff] %v2531_v27  ;;  %v2569_v18 = vpop.f32.mrf.mxu1 }
 0x2c6   : > { %2634 = vst [vmem:[%s4858_s20 + $0xa0] sm:$0xff] %v2568_v2  ;;  %v2535_v21 = vpop.f32.mrf.mxu0 }
 0x2c7   : > { %v2570_v0 = vpop.f32.mrf.mxu1  ;;  %v2536_v25 = vadd.f32 %v4855_v10, %v2535_v21 }
 0x2c8   : > { %v2571_v44 = vadd.f32 %v4855_v10, %v2570_v0  ;;  %v2537_v41 = vpop.f32.mrf.mxu0 }
 0x2c9   : > { %2626 = vst [vmem:[%s4858_s20 + $0x60] sm:$0xff] %v2536_v25  ;;  %v2572_v50 = vpop.f32.mrf.mxu1 }
 0x2ca   : > { %2635 = vst [vmem:[%s4858_s20 + $0xa8] sm:$0xff] %v2571_v44  ;;  %v2538_v7 = vpop.f32.mrf.mxu0 }
 0x2cb   : > { %v2575_v63 = vpop.f32.mrf.mxu1  ;;  %v2539_v52 = vadd.f32 %v4855_v10, %v2538_v7 }
 0x2cc   : > { %v2576_v35 = vadd.f32 %v4855_v10, %v2575_v63  ;;  %v2540_v1 = vpop.f32.mrf.mxu0 }
 0x2cd   : > { %2627 = vst [vmem:[%s4858_s20 + $0x68] sm:$0xff] %v2539_v52  ;;  %v2577_v59 = vpop.f32.mrf.mxu1 }
 0x2ce   : > { %2636 = vst [vmem:[%s4858_s20 + $0xb0] sm:$0xff] %v2576_v35  ;;  %v2543_v4 = vpop.f32.mrf.mxu0 }
 0x2cf   : > { %v2578_v60 = vpop.f32.mrf.mxu1  ;;  %v2544_v33 = vadd.f32 %v4855_v10, %v2543_v4 }
 0x2d0   : > { %v2579_v49 = vadd.f32 %v4855_v10, %v2578_v60  ;;  %v2545_v23 = vpop.f32.mrf.mxu0 }
 0x2d1   : > { %2628 = vst [vmem:[%s4858_s20 + $0x70] sm:$0xff] %v2544_v33  ;;  %v2580_v15 = vpop.f32.mrf.mxu1 }
 0x2d2   : > { %2637 = vst [vmem:[%s4858_s20 + $0xb8] sm:$0xff] %v2579_v49  ;;  %v2546_v9 = vpop.f32.mrf.mxu0 }
 0x2d3   : > { %v2583_v6 = vpop.f32.mrf.mxu1  ;;  %v2547_v29 = vadd.f32 %v4855_v10, %v2546_v9 }
 0x2d4   : > { %v2584_v14 = vadd.f32 %v4855_v10, %v2583_v6  ;;  %v2548_v51 = vpop.f32.mrf.mxu0 }
 0x2d5   : > { %2629 = vst [vmem:[%s4858_s20 + $0x78] sm:$0xff] %v2547_v29  ;;  %v2585_v30 = vpop.f32.mrf.mxu1 }
 0x2d6   : > { %2638 = vst [vmem:[%s4858_s20 + $0xc0] sm:$0xff] %v2584_v14 }
 0x2d7   : > { %v2586_v48 = vpop.f32.mrf.mxu1 }
 0x2d8   : > { %v2587_v57 = vadd.f32 %v4855_v10, %v2586_v48 }
 0x2d9   : > { %v2588_v3 = vpop.f32.mrf.mxu1 }
 0x2da   : > { %2639 = vst [vmem:[%s4858_s20 + $0xc8] sm:$0xff] %v2587_v57 }
 0x2db   : > { %v2591_v17 = vpop.f32.mrf.mxu1 }
 0x2dc   : > { %v2592_v62 = vadd.f32 %v4855_v10, %v2591_v17 }
 0x2dd   : > { %v2593_v61 = vpop.f32.mrf.mxu1 }
 0x2de   : > { %2640 = vst [vmem:[%s4858_s20 + $0xd0] sm:$0xff] %v2592_v62 }
 0x2df   : > { %v2594_v8 = vpop.f32.mrf.mxu1 }
 0x2e0   : > { %v2595_v53 = vadd.f32 %v4855_v10, %v2594_v8 }
 0x2e1   : > { %v2596_v16 = vpop.f32.mrf.mxu1 }
 0x2e2   : > { %2641 = vst [vmem:[%s4858_s20 + $0xd8] sm:$0xff] %v2595_v53 }
 0x2e3   : > { %v2599_v45 = vpop.f32.mrf.mxu1 }
 0x2e4   : > { %v2600_v40 = vadd.f32 %v4855_v10, %v2599_v45 }
 0x2e5   : > { %v2601_v19 = vpop.f32.mrf.mxu1 }
 0x2e6   : > { %2642 = vst [vmem:[%s4858_s20 + $0xe0] sm:$0xff] %v2600_v40 }
 0x2e7   : > { %v2602_v28 = vpop.f32.mrf.mxu1 }
 0x2e8   : > { %v2603_v56 = vadd.f32 %v4855_v10, %v2602_v28 }
 0x2e9   : > { %v2604_v31 = vpop.f32.mrf.mxu1 }
 0x2ea   : > { %2643 = vst [vmem:[%s4858_s20 + $0xe8] sm:$0xff] %v2603_v56 }
 0x2eb   : > { %v2607_v12 = vpop.f32.mrf.mxu1 }
 0x2ec   : > { %v2608_v37 = vadd.f32 %v4855_v10, %v2607_v12 }
 0x2ed   : > { %v2609_v11 = vpop.f32.mrf.mxu1 }
 0x2ee   : > { %2644 = vst [vmem:[%s4858_s20 + $0xf0] sm:$0xff] %v2608_v37 }
 0x2ef   : > { %v2610_v39 = vpop.f32.mrf.mxu1 }
 0x2f0   : > { %v2611_v58 = vadd.f32 %v4855_v10, %v2610_v39 }
 0x2f1   : > { %v2612_v24 = vpop.f32.mrf.mxu1 }
 0x2f2   : > { %2645 = vst [vmem:[%s4858_s20 + $0xf8] sm:$0xff] %v2611_v58 }
 0x2f3   : > { %3351 = shalt.err (!%p3348_p11)
}
 0x2f4   : > { %s3352_s10 = scalar_lea.hbm %s4926_s3, 4096  ;;  %s3356_s19 = scalar_lea.hbm %s4985_s7, 8192 }
 0x2f5   : > { %p3353_p10 = scmp.ne.s32.totalorder %s4926_s3, %s3352_s10  ;;  %p3357_p12 = scmp.lt.s32.totalorder %s4926_s3, %s4985_s7 }
 0x2f6   : > { %p3358_p9 = scmp.lt.s32.totalorder %s3356_s19, %s3352_s10 }
 0x2f7   : > { %p3354_p7 = pnand %p3353_p10, %p5170_p4 }
 0x2f8   : > { %p3359_p5 = por %p3358_p9, %p3357_p12 }
 0x2f9   : > { %p3355_p6 = pneg %p3354_p7 }
 0x2fb   : > { %p3360_p1 = pnand %p3359_p5, %p3355_p6 }
 0x2fd   : > { %3363 = shalt.err (!%p3360_p1)
}
 0x2fe   : > { %s3437_s5 = smov 128   ;;  %s3438_s30 = smov 8  }
 0x2ff   : > { %3073 = dma.vmem_to_hbm [thread:$0]  (%p5170_p4), %s4928_s21, 4096, %s4926_s3, %s2647_s9, %s3437_s5, %s3437_s5, %s3438_s30  }
 0x300 PF: > { %s2678_s1 = sand.u32 1, %s3406_s24   ;;  %p5171_p8 = scmp.ne.s32.totalorder %s5007_s12, 0 }
 0x301   : > { %p5172_p13 = scmp.ge.s32.totalorder %s3426_s29, 2  ;;  %s2679_s27 = scalar_lea.sflag [#allocation6], %s2678_s1 }
 0x303   : > { %p3090_p0 = pnand %p5172_p13, %p5171_p8 }
 0x305   : > { %p3091_p3 = pneg %p3090_p0 }
 0x307   : > { %3401 = dma.done.wait (%p3091_p3), %s2679_s27, 4096  }
 0x308   : > { %3403 = vsyncadd (%p3091_p3), %s2679_s27, 4294963200  ;;  %s25_s29 = sadd.s32 1, %s3426_s29   ;;  %s5173_s24 = smov %s3410_s25 }
 0x309   : > { %p22_p2 = scmp.ge.s32.totalorder %s25_s29, 4   ;;  %s5174_s25 = smov %s3414_s26 }
 0x30a   : > { %s5175_s26 = smov %s3600_s15  ;;  %s5176_s27 = smov %s3422_s28 }
 0x30b   : > { %s5177_s28 = smov %s5179_s16  ;;  %24 = sbr.rel (!%p22_p2) target bundleno = 12 (0xc), region = 117 }
 0x310   :  { %2684 = vsyncpa [#allocation5], 1 }
 0x311   :  { %2686 = vsyncpa [#allocation5 + $0x1], 1 }
 0x312   :  { %2687 = vsyncpa [#allocation8], 1 }
 0x313   :  { %2688 = vsyncpa [#allocation11], 1 }
 0x314   :  { %2689 = vsyncpa [#allocation6], 1 }
 0x315   :  { %2691 = vsyncpa [#allocation6 + $0x1], 1 }

</bundles_post_ra>
